<compile_context>
chip_gen: v7x
topology: tpu7x:2x2x1
jax: 0.10.0
libtpu: 0.0.40
codegen_flags: <defaults>
</compile_context>

<pallas_src>
from typing import List, Optional

import jax
import jax.numpy as jnp
from jax.experimental import pallas as pl
from jax.experimental.pallas import tpu as pltpu

BN_EPS = 1e-5
LANE = 128                      # channel / K axes padded to the TPU lane width


def _round_up(x: int, m: int) -> int:
    return (x + m - 1) // m * m


def _vmem_phys_bytes() -> int:
    try:
        return int(getattr(pltpu.get_tpu_info(), "vmem_capacity_bytes"))
    except Exception:
        return 64 << 20          # conservative default (v7x-like)


_VMEM_PHYS = _vmem_phys_bytes()
_SMALL_VMEM = _VMEM_PHYS <= (64 << 20)          # v7x: 64 MiB / TC
_VMEM_LIMIT = (48 << 20) if _SMALL_VMEM else (64 << 20)
_TM_MAX = 1024 if _SMALL_VMEM else 2048         # v5e/v6e: big tiles amortize step overhead
_VMEM_BUDGET = _VMEM_LIMIT // 2                 # headroom for pipelining buffers


def _pick_tm(m: int, kdim: int, cp: int) -> int:
    """M-tile for a conv layer.

    Fits 2x (double-buffered) bf16 patches-in + bf16 y-out tiles plus the
    resident (K,Cp) bf16 weight block inside the VMEM budget, keeps tm a
    multiple of 8, and (when m allows) guarantees >= 2 grid steps so the
    'parallel' axis can shard across both v7x TensorCores.
    """
    resident = 4 * kdim * cp                    # bf16 weights, double-buffered
    row_bytes = 4 * (kdim + cp) + 16            # bf16 in + bf16 out per M row, x2 buffers
    fit = max(8, int((_VMEM_BUDGET - resident) // row_bytes) // 8 * 8)
    cap = max(8, min(_TM_MAX, fit))
    half = _round_up((m + 1) // 2, 8)           # grid >= 2 whenever m > 8
    return max(8, min(cap, half))


# ----------------------------------------------------------------------------
# Kernel 1: tiled bf16 MXU matmul -> bf16 pre-BN tile + f32 per-tile stats
# ----------------------------------------------------------------------------
def _mm_stats(patches, w2d, tm):
    m_pad, kdim = patches.shape
    cp = w2d.shape[1]
    grid = m_pad // tm

    def kernel(p_ref, w_ref, y_ref, s_ref, ss_ref):
        y = jnp.dot(p_ref[...], w_ref[...], preferred_element_type=jnp.float32)
        y_ref[...] = y.astype(y_ref.dtype)                       # bf16 intermediate
        s_ref[...] = jnp.sum(y, axis=0, keepdims=True).reshape(1, 1, cp)
        ss_ref[...] = jnp.sum(y * y, axis=0, keepdims=True).reshape(1, 1, cp)

    return pl.pallas_call(
        kernel,
        out_shape=(jax.ShapeDtypeStruct((m_pad, cp), jnp.bfloat16),
                   jax.ShapeDtypeStruct((grid, 1, cp), jnp.float32),
                   jax.ShapeDtypeStruct((grid, 1, cp), jnp.float32)),
        grid=(grid,),
        in_specs=[pl.BlockSpec((tm, kdim), lambda i: (i, 0)),
                  pl.BlockSpec((kdim, cp), lambda i: (0, 0))],     # resident weights
        out_specs=(pl.BlockSpec((tm, cp), lambda i: (i, 0)),
                   pl.BlockSpec((1, 1, cp), lambda i: (i, 0, 0)),
                   pl.BlockSpec((1, 1, cp), lambda i: (i, 0, 0))),
        compiler_params=pltpu.CompilerParams(
            dimension_semantics=("parallel",),
            vmem_limit_bytes=_VMEM_LIMIT),
    )(patches, w2d)


# ----------------------------------------------------------------------------
# Kernel 2: in-kernel BN fold + affine + ReLU (optionally fused residual add)
# ----------------------------------------------------------------------------
def _bn_act(y, s, ss, gb, tm, m_real):
    m_pad, cp = y.shape
    g1 = s.shape[0]
    grid = m_pad // tm
    inv_m = 1.0 / float(m_real)

    def kernel(y_ref, s_ref, ss_ref, gb_ref, o_ref):
        # Recomputed every grid step (tiny reduce + rsqrt) so the grid stays
        # "parallel" (no ordering assumption across TensorCores).
        mean = jnp.sum(s_ref[...], axis=0) * inv_m                 # (1, cp)
        msq = jnp.sum(ss_ref[...], axis=0) * inv_m                 # (1, cp)
        var = jnp.maximum(msq - mean * mean, 0.0)
        scale = gb_ref[0:1, :] * jax.lax.rsqrt(var + BN_EPS)
        shift = gb_ref[1:2, :] - mean * scale
        v = y_ref[...].astype(jnp.float32) * scale + shift
        o_ref[...] = jnp.maximum(v, 0.0).astype(o_ref.dtype)

    return pl.pallas_call(
        kernel,
        out_shape=jax.ShapeDtypeStruct((m_pad, cp), jnp.bfloat16),
        grid=(grid,),
        in_specs=[pl.BlockSpec((tm, cp), lambda i: (i, 0)),
                  pl.BlockSpec((g1, 1, cp), lambda i: (0, 0, 0)),
                  pl.BlockSpec((g1, 1, cp), lambda i: (0, 0, 0)),
                  pl.BlockSpec((2, cp), lambda i: (0, 0))],
        out_specs=pl.BlockSpec((tm, cp), lambda i: (i, 0)),
        compiler_params=pltpu.CompilerParams(
            dimension_semantics=("parallel",),
            vmem_limit_bytes=_VMEM_LIMIT),
    )(y, s, ss, gb)


def _bn_add_act(y1, y2, s1, ss1, s2, ss2, gb1, gb2, tm, m_real):
    assert y1.shape == y2.shape and s1.shape == s2.shape
    m_pad, cp = y1.shape
    g1 = s1.shape[0]
    grid = m_pad // tm
    inv_m = 1.0 / float(m_real)

    def kernel(y1_ref, y2_ref, s1_ref, ss1_ref, s2_ref, ss2_ref,
               gb1_ref, gb2_ref, o_ref):
        def fold(s_ref, ss_ref, gb_ref):
            mean = jnp.sum(s_ref[...], axis=0) * inv_m
            msq = jnp.sum(ss_ref[...], axis=0) * inv_m
            var = jnp.maximum(msq - mean * mean, 0.0)
            scale = gb_ref[0:1, :] * jax.lax.rsqrt(var + BN_EPS)
            shift = gb_ref[1:2, :] - mean * scale
            return scale, shift

        sc1, sh1 = fold(s1_ref, ss1_ref, gb1_ref)
        sc2, sh2 = fold(s2_ref, ss2_ref, gb2_ref)
        shift = sh1 + sh2                                # pre-combined shift (3 terms)
        v = (y1_ref[...].astype(jnp.float32) * sc1
             + y2_ref[...].astype(jnp.float32) * sc2 + shift)
        o_ref[...] = jnp.maximum(v, 0.0).astype(o_ref.dtype)

    return pl.pallas_call(
        kernel,
        out_shape=jax.ShapeDtypeStruct((m_pad, cp), jnp.bfloat16),
        grid=(grid,),
        in_specs=[pl.BlockSpec((tm, cp), lambda i: (i, 0)),
                  pl.BlockSpec((tm, cp), lambda i: (i, 0)),
                  pl.BlockSpec((g1, 1, cp), lambda i: (0, 0, 0)),
                  pl.BlockSpec((g1, 1, cp), lambda i: (0, 0, 0)),
                  pl.BlockSpec((g1, 1, cp), lambda i: (0, 0, 0)),
                  pl.BlockSpec((g1, 1, cp), lambda i: (0, 0, 0)),
                  pl.BlockSpec((2, cp), lambda i: (0, 0)),
                  pl.BlockSpec((2, cp), lambda i: (0, 0))],
        out_specs=pl.BlockSpec((tm, cp), lambda i: (i, 0)),
        compiler_params=pltpu.CompilerParams(
            dimension_semantics=("parallel",),
            vmem_limit_bytes=_VMEM_LIMIT),
    )(y1, y2, s1, ss1, s2, ss2, gb1, gb2)


# ----------------------------------------------------------------------------
# Thin JAX glue: im2col (TODO above) with lane-aligned K padding
# ----------------------------------------------------------------------------
def _im2col(x, k, stride, pad, kdim):
    n, h, w, c = x.shape
    ho = (h + 2 * pad - k) // stride + 1
    wo = (w + 2 * pad - k) // stride + 1
    if pad:
        x = jnp.pad(x, ((0, 0), (pad, pad), (pad, pad), (0, 0)))
    if k == 1 and stride == 1:
        patches = x.reshape(n * ho * wo, c)
    else:
        cols = [x[:, ki:ki + (ho - 1) * stride + 1:stride,
                   kj:kj + (wo - 1) * stride + 1:stride, :]
                for ki in range(k) for kj in range(k)]
        patches = jnp.concatenate(cols, axis=-1).reshape(n * ho * wo, k * k * c)
    if patches.shape[1] != kdim:                     # e.g. stem: 147 -> 256 zero cols
        patches = jnp.pad(patches, ((0, 0), (0, kdim - patches.shape[1])))
    return patches, ho, wo


# ----------------------------------------------------------------------------
# Layer forward functions (activations: NHWC bf16, channels padded to 128)
# ----------------------------------------------------------------------------
def _conv_pre(x, p, tm=None):
    n = x.shape[0]
    patches, ho, wo = _im2col(x.astype(jnp.bfloat16), p["k"], p["stride"],
                              p["pad"], p["kdim"])
    m = n * ho * wo
    if tm is None:
        tm = _pick_tm(m, p["kdim"], p["cp"])
    m_pad = _round_up(m, tm)
    if m_pad != m:
        patches = jnp.pad(patches, ((0, m_pad - m), (0, 0)))
    y, s, ss = _mm_stats(patches, p["w2d"], tm)
    return y, s, ss, (n, ho, wo, p["cp"]), tm, m


def conv_bn_relu(x, p):
    y, s, ss, shp, tm, m = _conv_pre(x, p)
    out = _bn_act(y, s, ss, p["gb"], tm, m)
    return out[:m].reshape(shp)


def residual_block_fwd(x, bp):
    h = conv_bn_relu(x, bp["conv1"])                          # conv1 -> bn1 -> relu
    y2, s2, ss2, shp, tm, m = _conv_pre(h, bp["conv2"])       # conv2 -> bn2
    yr, sr, ssr, _, _, mr = _conv_pre(x, bp["conv_res"], tm=tm)   # residual -> bn_res
    assert mr == m
    out = _bn_add_act(y2, yr, s2, ss2, sr, ssr,
                      bp["conv2"]["gb"], bp["conv_res"]["gb"], tm, m)
    return out[:m].reshape(shp)                               # relu(bn2 + bn_res)


def root_fwd(children, rp):
    return conv_bn_relu(jnp.concatenate(children, axis=-1), rp)


def tree_fwd(tp, x, children: Optional[List] = None):
    if children is None:
        children = []
    if tp["height"] == 1:
        xl = residual_block_fwd(x, tp["tree_l"])
        xr = residual_block_fwd(xl, tp["tree_r"])
        return root_fwd(children + [xl, xr], tp["root"])
    xl = tree_fwd(tp["tree_l"], x)
    return tree_fwd(tp["tree_r"], xl, children + [xl])


def dla_down_fwd(params, img_nchw):
    x = jnp.transpose(img_nchw, (0, 2, 3, 1)).astype(jnp.bfloat16)   # NCHW -> NHWC
    x = conv_bn_relu(x, params["projection"])
    c_real = params["projection"]["cout"]
    feats = []
    for bp in params["blocks"]:
        x = residual_block_fwd(x, bp)
        c_real = bp["cout"]
    feats.append((x, c_real))
    for tp in params["trees"]:
        x = tree_fwd(tp, x)
        feats.append((x, tp["cout"]))
    # strip channel padding, return NCHW f32 (PyTorch interface)
    return [jnp.transpose(a[..., :c].astype(jnp.float32), (0, 3, 1, 2))
            for a, c in feats]


# ----------------------------------------------------------------------------
# Deterministic synthetic parameters (shapes follow the PyTorch __init__;
# channel / K axes zero-padded to the 128-lane storage layout).  Conv biases
# are omitted: a per-channel constant cancels exactly in training-mode BN.
# ----------------------------------------------------------------------------
def _init_conv_bn(key, cin, cout, k, stride, pad, cin_storage):
    kw, kg, kb = jax.random.split(key, 3)
    w = 0.1 * jax.random.normal(kw, (cout, cin, k, k), jnp.float32)
    gamma = 1.0 + 0.05 * jax.random.normal(kg, (cout,), jnp.float32)
    beta = 0.05 * jax.random.normal(kb, (cout,), jnp.float32)
    cp = _round_up(cout, LANE)
    kdim = _round_up(k * k * cin_storage, LANE)
    w_pad = jnp.zeros((k, k, cin_storage, cp), jnp.float32)
    w_pad = w_pad.at[:, :, :cin, :cout].set(jnp.transpose(w, (2, 3, 1, 0)))
    w2d = w_pad.reshape(k * k * cin_storage, cp)
    if w2d.shape[0] != kdim:
        w2d = jnp.pad(w2d, ((0, kdim - w2d.shape[0]), (0, 0)))
    gb = jnp.zeros((2, cp), jnp.float32).at[0, :cout].set(gamma).at[1, :cout].set(beta)
    return {"w2d": w2d.astype(jnp.bfloat16), "gb": gb,
            "k": k, "stride": stride, "pad": pad, "cout": cout, "cp": cp,
            "kdim": kdim}


def _init_residual_block(key, cin, cout, stride, cin_storage):
    k1, k2, k3 = jax.random.split(key, 3)
    cp = _round_up(cout, LANE)
    return {"conv1": _init_conv_bn(k1, cin, cout, 3, stride, 1, cin_storage),
            "conv2": _init_conv_bn(k2, cout, cout, 3, 1, 1, cp),
            "conv_res": _init_conv_bn(k3, cin, cout, 1, stride, 0, cin_storage),
            "cout": cout, "cp": cp}


def _init_root(key, root_channels, cout, child_real, child_storage):
    n = root_channels // child_real
    assert n * child_real == root_channels
    kw, kg, kb = jax.random.split(key, 3)
    w = 0.1 * jax.random.normal(kw, (cout, root_channels), jnp.float32)
    gamma = 1.0 + 0.05 * jax.random.normal(kg, (cout,), jnp.float32)
    beta = 0.05 * jax.random.normal(kb, (cout,), jnp.float32)
    cp = _round_up(cout, LANE)
    w3 = jnp.transpose(w.reshape(cout, n, child_real), (1, 2, 0))     # (n, creal, cout)
    w_pad = jnp.zeros((n, child_storage, cp), jnp.float32)
    w_pad = w_pad.at[:, :child_real, :cout].set(w3)
    gb = jnp.zeros((2, cp), jnp.float32).at[0, :cout].set(gamma).at[1, :cout].set(beta)
    return {"w2d": w_pad.reshape(n * child_storage, cp).astype(jnp.bfloat16),
            "gb": gb, "k": 1, "stride": 1, "pad": 0, "cout": cout, "cp": cp,
            "kdim": n * child_storage}


def _init_tree(key, cin, cout, height, root_channels, stride, cin_storage):
    if root_channels is None:
        root_channels = 2 * cout
    cp = _round_up(cout, LANE)
    if height == 1:
        kl, kr, krt = jax.random.split(key, 3)
        return {"height": 1,
                "tree_l": _init_residual_block(kl, cin, cout, stride, cin_storage),
                "tree_r": _init_residual_block(kr, cout, cout, 1, cp),
                "root": _init_root(krt, root_channels, cout, cout, cp),
                "cout": cout, "cp": cp}
    kl, kr = jax.random.split(key)
    return {"height": height,
            "tree_l": _init_tree(kl, cin, cout, height - 1, None, stride, cin_storage),
            "tree_r": _init_tree(kr, cout, cout, height - 1, root_channels + cout, 1, cp),
            "cout": cout, "cp": cp}


def init_dla_down(key, heights, channels, downsamples):
    kp, kb, kt = jax.random.split(key, 3)
    c0 = channels[0]
    cp0 = _round_up(c0, LANE)
    params = {"projection": _init_conv_bn(kp, 3, c0, 7, 1, 3, cin_storage=3),
              "blocks": [], "trees": []}
    if downsamples > 0:
        for bk in jax.random.split(kb, downsamples):
            params["blocks"].append(_init_residual_block(bk, c0, c0, 2, cp0))
    cin_s = cp0
    for i, tk in enumerate(jax.random.split(kt, len(heights))):
        t = _init_tree(tk, channels[i], channels[i + 1], heights[i], None, 2, cin_s)
        params["trees"].append(t)
        cin_s = t["cp"]
    return params


if __name__ == "__main__":
    key = jax.random.PRNGKey(0)
    kimg, kparam = jax.random.split(key)

    # DLADown(heights=[2, 1], channels=[4, 8, 16], downsamples=1, block=ResidualBlock)
    heights = [2, 1]
    channels = [4, 8, 16]
    downsamples = 1

    img = jax.random.normal(kimg, (2, 3, 16, 16), jnp.float32)   # NCHW
    params = init_dla_down(kparam, heights, channels, downsamples)

    fwd = jax.jit(lambda im: dla_down_fwd(params, im))
    outs = jax.block_until_ready(fwd(img))

    expected = [(2, 4, 8, 8), (2, 8, 4, 4), (2, 16, 2, 2)]
    assert len(outs) == len(expected)
    for o, e in zip(outs, expected):
        assert o.shape == e, (o.shape, e)
        assert bool(jnp.all(jnp.isfinite(o)))
    print("KERNEL_OK")
</pallas_src>

<mosaic_0001>
module attributes {stable_mosaic.version = 11 : i64} {
  func.func @kernel(%arg0: i32, %arg1: memref<256x256xbf16, #tpu.memory_space<vmem>>, %arg2: memref<256x128xbf16, #tpu.memory_space<vmem>>, %arg3: memref<256x128xbf16, #tpu.memory_space<vmem>>, %arg4: memref<1x1x128xf32, #tpu.memory_space<vmem>>, %arg5: memref<1x1x128xf32, #tpu.memory_space<vmem>>) attributes {dimension_semantics = [#tpu.dimension_semantics<parallel>], iteration_bounds = array<i64: 2>, scalar_prefetch = 0 : i64, scratch_operands = 0 : i64, tpu.core_type = #tpu.core_type<tc>, window_params = [{transform_indices = @transform_0, window_bounds = array<i64: 256, 256>}, {pipeline_mode = #tpu.pipeline_mode<synchronous>, transform_indices = @transform_1, window_bounds = array<i64: 256, 128>}, {transform_indices = @transform_2, window_bounds = array<i64: 256, 128>}, {transform_indices = @transform_3, window_bounds = array<i64: 1, 1, 128>}, {transform_indices = @transform_4, window_bounds = array<i64: 1, 1, 128>}]} {
    %c0 = arith.constant 0 : index
    %c0_0 = arith.constant 0 : index
    %0 = vector.load %arg1[%c0, %c0_0] : memref<256x256xbf16, #tpu.memory_space<vmem>>, vector<256x256xbf16>
    %c0_1 = arith.constant 0 : index
    %c0_2 = arith.constant 0 : index
    %1 = vector.load %arg2[%c0_1, %c0_2] : memref<256x128xbf16, #tpu.memory_space<vmem>>, vector<256x128xbf16>
    %cst = arith.constant dense<0.000000e+00> : vector<256x128xf32>
    %2 = tpu.matmul %0, %1, %cst {dimension_numbers = #tpu.dot_dimension_numbers<[1], [0], [0], [1], [0, 0, 1, 1], [], []>} : vector<256x256xbf16>, vector<256x128xbf16>, vector<256x128xf32> -> vector<256x128xf32>
    %3 = arith.truncf %2 : vector<256x128xf32> to vector<256x128xbf16>
    %c0_3 = arith.constant 0 : index
    %c0_4 = arith.constant 0 : index
    %4 = vector.load %arg3[%c0_3, %c0_4] : memref<256x128xbf16, #tpu.memory_space<vmem>>, vector<256x128xbf16>
    tpu.vector_store %arg3[%c0_3, %c0_4], %3 {strides = array<i32>} : memref<256x128xbf16, #tpu.memory_space<vmem>>, vector<256x128xbf16>,
    %cst_5 = arith.constant dense<0.000000e+00> : vector<128xf32>
    %5 = vector.multi_reduction <add>, %2, %cst_5 [0] : vector<256x128xf32> to vector<128xf32>
    %6 = vector.shape_cast %5 : vector<128xf32> to vector<1x128xf32>
    %7 = vector.shape_cast %6 : vector<1x128xf32> to vector<1x1x128xf32>
    %c0_6 = arith.constant 0 : index
    %c0_7 = arith.constant 0 : index
    %c0_8 = arith.constant 0 : index
    %8 = vector.load %arg4[%c0_6, %c0_7, %c0_8] : memref<1x1x128xf32, #tpu.memory_space<vmem>>, vector<1x1x128xf32>
    tpu.vector_store %arg4[%c0_6, %c0_7, %c0_8], %7 {strides = array<i32>} : memref<1x1x128xf32, #tpu.memory_space<vmem>>, vector<1x1x128xf32>,
    %9 = arith.mulf %2, %2 : vector<256x128xf32>
    %cst_9 = arith.constant dense<0.000000e+00> : vector<128xf32>
    %10 = vector.multi_reduction <add>, %9, %cst_9 [0] : vector<256x128xf32> to vector<128xf32>
    %11 = vector.shape_cast %10 : vector<128xf32> to vector<1x128xf32>
    %12 = vector.shape_cast %11 : vector<1x128xf32> to vector<1x1x128xf32>
    %c0_10 = arith.constant 0 : index
    %c0_11 = arith.constant 0 : index
    %c0_12 = arith.constant 0 : index
    %13 = vector.load %arg5[%c0_10, %c0_11, %c0_12] : memref<1x1x128xf32, #tpu.memory_space<vmem>>, vector<1x1x128xf32>
    tpu.vector_store %arg5[%c0_10, %c0_11, %c0_12], %12 {strides = array<i32>} : memref<1x1x128xf32, #tpu.memory_space<vmem>>, vector<1x1x128xf32>,
    return
  }
  func.func @transform_0(%arg0: i32) -> (i32, i32) {
    %c0_i32 = arith.constant 0 : i32
    %c0_i32_0 = arith.constant 0 : i32
    return %arg0, %c0_i32 : i32, i32
  }
  func.func @transform_1(%arg0: i32) -> (i32, i32) {
    %c0_i32 = arith.constant 0 : i32
    %c0_i32_0 = arith.constant 0 : i32
    %c0_i32_1 = arith.constant 0 : i32
    return %c0_i32, %c0_i32_0 : i32, i32
  }
  func.func @transform_2(%arg0: i32) -> (i32, i32) {
    %c0_i32 = arith.constant 0 : i32
    %c0_i32_0 = arith.constant 0 : i32
    return %arg0, %c0_i32 : i32, i32
  }
  func.func @transform_3(%arg0: i32) -> (i32, i32, i32) {
    %c0_i32 = arith.constant 0 : i32
    %c0_i32_0 = arith.constant 0 : i32
    %c0_i32_1 = arith.constant 0 : i32
    return %arg0, %c0_i32, %c0_i32_0 : i32, i32, i32
  }
  func.func @transform_4(%arg0: i32) -> (i32, i32, i32) {
    %c0_i32 = arith.constant 0 : i32
    %c0_i32_0 = arith.constant 0 : i32
    %c0_i32_1 = arith.constant 0 : i32
    return %arg0, %c0_i32, %c0_i32_0 : i32, i32, i32
  }
}

module attributes {stable_mosaic.version = 11 : i64} {
  func.func @kernel(%arg0: i32, %arg1: memref<256x128xbf16, #tpu.memory_space<vmem>>, %arg2: memref<2x1x128xf32, #tpu.memory_space<vmem>>, %arg3: memref<2x1x128xf32, #tpu.memory_space<vmem>>, %arg4: memref<2x128xf32, #tpu.memory_space<vmem>>, %arg5: memref<256x128xbf16, #tpu.memory_space<vmem>>) attributes {dimension_semantics = [#tpu.dimension_semantics<parallel>], iteration_bounds = array<i64: 2>, scalar_prefetch = 0 : i64, scratch_operands = 0 : i64, tpu.core_type = #tpu.core_type<tc>, window_params = [{transform_indices = @transform_0, window_bounds = array<i64: 256, 128>}, {pipeline_mode = #tpu.pipeline_mode<synchronous>, transform_indices = @transform_1, window_bounds = array<i64: 2, 1, 128>}, {pipeline_mode = #tpu.pipeline_mode<synchronous>, transform_indices = @transform_2, window_bounds = array<i64: 2, 1, 128>}, {pipeline_mode = #tpu.pipeline_mode<synchronous>, transform_indices = @transform_3, window_bounds = array<i64: 2, 128>}, {transform_indices = @transform_4, window_bounds = array<i64: 256, 128>}]} {
    %c0 = arith.constant 0 : index
    %c0_0 = arith.constant 0 : index
    %c0_1 = arith.constant 0 : index
    %0 = vector.load %arg2[%c0, %c0_0, %c0_1] : memref<2x1x128xf32, #tpu.memory_space<vmem>>, vector<2x1x128xf32>
    %cst = arith.constant dense<0.000000e+00> : vector<1x128xf32>
    %1 = vector.multi_reduction <add>, %0, %cst [0] : vector<2x1x128xf32> to vector<1x128xf32>
    %cst_2 = arith.constant 0.001953125 : f32
    %2 = vector.broadcast %cst_2 : f32 to vector<1x128xf32>
    %3 = arith.mulf %1, %2 : vector<1x128xf32>
    %c0_3 = arith.constant 0 : index
    %c0_4 = arith.constant 0 : index
    %c0_5 = arith.constant 0 : index
    %4 = vector.load %arg3[%c0_3, %c0_4, %c0_5] : memref<2x1x128xf32, #tpu.memory_space<vmem>>, vector<2x1x128xf32>
    %cst_6 = arith.constant dense<0.000000e+00> : vector<1x128xf32>
    %5 = vector.multi_reduction <add>, %4, %cst_6 [0] : vector<2x1x128xf32> to vector<1x128xf32>
    %cst_7 = arith.constant 0.001953125 : f32
    %6 = vector.broadcast %cst_7 : f32 to vector<1x128xf32>
    %7 = arith.mulf %5, %6 : vector<1x128xf32>
    %8 = arith.mulf %3, %3 : vector<1x128xf32>
    %9 = arith.subf %7, %8 : vector<1x128xf32>
    %cst_8 = arith.constant 0.000000e+00 : f32
    %10 = vector.broadcast %cst_8 : f32 to vector<1x128xf32>
    %11 = arith.maximumf %9, %10 : vector<1x128xf32>
    %c0_9 = arith.constant 0 : index
    %c0_10 = arith.constant 0 : index
    %12 = vector.load %arg4[%c0_9, %c0_10] : memref<2x128xf32, #tpu.memory_space<vmem>>, vector<1x128xf32>
    %cst_11 = arith.constant 9.99999974E-6 : f32
    %13 = vector.broadcast %cst_11 : f32 to vector<1x128xf32>
    %14 = arith.addf %11, %13 : vector<1x128xf32>
    %15 = math.rsqrt %14 : vector<1x128xf32>
    %16 = arith.mulf %12, %15 : vector<1x128xf32>
    %c1 = arith.constant 1 : index
    %c0_12 = arith.constant 0 : index
    %17 = vector.load %arg4[%c1, %c0_12] : memref<2x128xf32, #tpu.memory_space<vmem>>, vector<1x128xf32>
    %18 = arith.mulf %3, %16 : vector<1x128xf32>
    %19 = arith.subf %17, %18 : vector<1x128xf32>
    %c0_13 = arith.constant 0 : index
    %c0_14 = arith.constant 0 : index
    %20 = vector.load %arg1[%c0_13, %c0_14] : memref<256x128xbf16, #tpu.memory_space<vmem>>, vector<256x128xbf16>
    %21 = arith.extf %20 : vector<256x128xbf16> to vector<256x128xf32>
    %22 = vector.broadcast %16 : vector<1x128xf32> to vector<256x128xf32>
    %23 = arith.mulf %21, %22 : vector<256x128xf32>
    %24 = vector.broadcast %19 : vector<1x128xf32> to vector<256x128xf32>
    %25 = arith.addf %23, %24 : vector<256x128xf32>
    %cst_15 = arith.constant 0.000000e+00 : f32
    %26 = vector.broadcast %cst_15 : f32 to vector<256x128xf32>
    %27 = arith.maximumf %25, %26 : vector<256x128xf32>
    %28 = arith.truncf %27 : vector<256x128xf32> to vector<256x128xbf16>
    %c0_16 = arith.constant 0 : index
    %c0_17 = arith.constant 0 : index
    %29 = vector.load %arg5[%c0_16, %c0_17] : memref<256x128xbf16, #tpu.memory_space<vmem>>, vector<256x128xbf16>
    tpu.vector_store %arg5[%c0_16, %c0_17], %28 {strides = array<i32>} : memref<256x128xbf16, #tpu.memory_space<vmem>>, vector<256x128xbf16>,
    return
  }
  func.func @transform_0(%arg0: i32) -> (i32, i32) {
    %c0_i32 = arith.constant 0 : i32
    %c0_i32_0 = arith.constant 0 : i32
    return %arg0, %c0_i32 : i32, i32
  }
  func.func @transform_1(%arg0: i32) -> (i32, i32, i32) {
    %c0_i32 = arith.constant 0 : i32
    %c0_i32_0 = arith.constant 0 : i32
    %c0_i32_1 = arith.constant 0 : i32
    %c0_i32_2 = arith.constant 0 : i32
    return %c0_i32, %c0_i32_0, %c0_i32_1 : i32, i32, i32
  }
  func.func @transform_2(%arg0: i32) -> (i32, i32, i32) {
    %c0_i32 = arith.constant 0 : i32
    %c0_i32_0 = arith.constant 0 : i32
    %c0_i32_1 = arith.constant 0 : i32
    %c0_i32_2 = arith.constant 0 : i32
    return %c0_i32, %c0_i32_0, %c0_i32_1 : i32, i32, i32
  }
  func.func @transform_3(%arg0: i32) -> (i32, i32) {
    %c0_i32 = arith.constant 0 : i32
    %c0_i32_0 = arith.constant 0 : i32
    %c0_i32_1 = arith.constant 0 : i32
    return %c0_i32, %c0_i32_0 : i32, i32
  }
  func.func @transform_4(%arg0: i32) -> (i32, i32) {
    %c0_i32 = arith.constant 0 : i32
    %c0_i32_0 = arith.constant 0 : i32
    return %arg0, %c0_i32 : i32, i32
  }
}

module attributes {stable_mosaic.version = 11 : i64} {
  func.func @kernel(%arg0: i32, %arg1: memref<64x128xbf16, #tpu.memory_space<vmem>>, %arg2: memref<128x128xbf16, #tpu.memory_space<vmem>>, %arg3: memref<64x128xbf16, #tpu.memory_space<vmem>>, %arg4: memref<1x1x128xf32, #tpu.memory_space<vmem>>, %arg5: memref<1x1x128xf32, #tpu.memory_space<vmem>>) attributes {dimension_semantics = [#tpu.dimension_semantics<parallel>], iteration_bounds = array<i64: 2>, scalar_prefetch = 0 : i64, scratch_operands = 0 : i64, tpu.core_type = #tpu.core_type<tc>, window_params = [{transform_indices = @transform_0, window_bounds = array<i64: 64, 128>}, {pipeline_mode = #tpu.pipeline_mode<synchronous>, transform_indices = @transform_1, window_bounds = array<i64: 128, 128>}, {transform_indices = @transform_2, window_bounds = array<i64: 64, 128>}, {transform_indices = @transform_3, window_bounds = array<i64: 1, 1, 128>}, {transform_indices = @transform_4, window_bounds = array<i64: 1, 1, 128>}]} {
    %c0 = arith.constant 0 : index
    %c0_0 = arith.constant 0 : index
    %0 = vector.load %arg1[%c0, %c0_0] : memref<64x128xbf16, #tpu.memory_space<vmem>>, vector<64x128xbf16>
    %c0_1 = arith.constant 0 : index
    %c0_2 = arith.constant 0 : index
    %1 = vector.load %arg2[%c0_1, %c0_2] : memref<128x128xbf16, #tpu.memory_space<vmem>>, vector<128x128xbf16>
    %cst = arith.constant dense<0.000000e+00> : vector<64x128xf32>
    %2 = tpu.matmul %0, %1, %cst {dimension_numbers = #tpu.dot_dimension_numbers<[1], [0], [0], [1], [0, 0, 1, 1], [], []>} : vector<64x128xbf16>, vector<128x128xbf16>, vector<64x128xf32> -> vector<64x128xf32>
    %3 = arith.truncf %2 : vector<64x128xf32> to vector<64x128xbf16>
    %c0_3 = arith.constant 0 : index
    %c0_4 = arith.constant 0 : index
    %4 = vector.load %arg3[%c0_3, %c0_4] : memref<64x128xbf16, #tpu.memory_space<vmem>>, vector<64x128xbf16>
    tpu.vector_store %arg3[%c0_3, %c0_4], %3 {strides = array<i32>} : memref<64x128xbf16, #tpu.memory_space<vmem>>, vector<64x128xbf16>,
    %cst_5 = arith.constant dense<0.000000e+00> : vector<128xf32>
    %5 = vector.multi_reduction <add>, %2, %cst_5 [0] : vector<64x128xf32> to vector<128xf32>
    %6 = vector.shape_cast %5 : vector<128xf32> to vector<1x128xf32>
    %7 = vector.shape_cast %6 : vector<1x128xf32> to vector<1x1x128xf32>
    %c0_6 = arith.constant 0 : index
    %c0_7 = arith.constant 0 : index
    %c0_8 = arith.constant 0 : index
    %8 = vector.load %arg4[%c0_6, %c0_7, %c0_8] : memref<1x1x128xf32, #tpu.memory_space<vmem>>, vector<1x1x128xf32>
    tpu.vector_store %arg4[%c0_6, %c0_7, %c0_8], %7 {strides = array<i32>} : memref<1x1x128xf32, #tpu.memory_space<vmem>>, vector<1x1x128xf32>,
    %9 = arith.mulf %2, %2 : vector<64x128xf32>
    %cst_9 = arith.constant dense<0.000000e+00> : vector<128xf32>
    %10 = vector.multi_reduction <add>, %9, %cst_9 [0] : vector<64x128xf32> to vector<128xf32>
    %11 = vector.shape_cast %10 : vector<128xf32> to vector<1x128xf32>
    %12 = vector.shape_cast %11 : vector<1x128xf32> to vector<1x1x128xf32>
    %c0_10 = arith.constant 0 : index
    %c0_11 = arith.constant 0 : index
    %c0_12 = arith.constant 0 : index
    %13 = vector.load %arg5[%c0_10, %c0_11, %c0_12] : memref<1x1x128xf32, #tpu.memory_space<vmem>>, vector<1x1x128xf32>
    tpu.vector_store %arg5[%c0_10, %c0_11, %c0_12], %12 {strides = array<i32>} : memref<1x1x128xf32, #tpu.memory_space<vmem>>, vector<1x1x128xf32>,
    return
  }
  func.func @transform_0(%arg0: i32) -> (i32, i32) {
    %c0_i32 = arith.constant 0 : i32
    %c0_i32_0 = arith.constant 0 : i32
    return %arg0, %c0_i32 : i32, i32
  }
  func.func @transform_1(%arg0: i32) -> (i32, i32) {
    %c0_i32 = arith.constant 0 : i32
    %c0_i32_0 = arith.constant 0 : i32
    %c0_i32_1 = arith.constant 0 : i32
    return %c0_i32, %c0_i32_0 : i32, i32
  }
  func.func @transform_2(%arg0: i32) -> (i32, i32) {
    %c0_i32 = arith.constant 0 : i32
    %c0_i32_0 = arith.constant 0 : i32
    return %arg0, %c0_i32 : i32, i32
  }
  func.func @transform_3(%arg0: i32) -> (i32, i32, i32) {
    %c0_i32 = arith.constant 0 : i32
    %c0_i32_0 = arith.constant 0 : i32
    %c0_i32_1 = arith.constant 0 : i32
    return %arg0, %c0_i32, %c0_i32_0 : i32, i32, i32
  }
  func.func @transform_4(%arg0: i32) -> (i32, i32, i32) {
    %c0_i32 = arith.constant 0 : i32
    %c0_i32_0 = arith.constant 0 : i32
    %c0_i32_1 = arith.constant 0 : i32
    return %arg0, %c0_i32, %c0_i32_0 : i32, i32, i32
  }
}

module attributes {stable_mosaic.version = 11 : i64} {
  func.func @kernel(%arg0: i32, %arg1: memref<64x1152xbf16, #tpu.memory_space<vmem>>, %arg2: memref<1152x128xbf16, #tpu.memory_space<vmem>>, %arg3: memref<64x128xbf16, #tpu.memory_space<vmem>>, %arg4: memref<1x1x128xf32, #tpu.memory_space<vmem>>, %arg5: memref<1x1x128xf32, #tpu.memory_space<vmem>>) attributes {dimension_semantics = [#tpu.dimension_semantics<parallel>], iteration_bounds = array<i64: 2>, scalar_prefetch = 0 : i64, scratch_operands = 0 : i64, tpu.core_type = #tpu.core_type<tc>, window_params = [{transform_indices = @transform_0, window_bounds = array<i64: 64, 1152>}, {pipeline_mode = #tpu.pipeline_mode<synchronous>, transform_indices = @transform_1, window_bounds = array<i64: 1152, 128>}, {transform_indices = @transform_2, window_bounds = array<i64: 64, 128>}, {transform_indices = @transform_3, window_bounds = array<i64: 1, 1, 128>}, {transform_indices = @transform_4, window_bounds = array<i64: 1, 1, 128>}]} {
    %c0 = arith.constant 0 : index
    %c0_0 = arith.constant 0 : index
    %0 = vector.load %arg1[%c0, %c0_0] : memref<64x1152xbf16, #tpu.memory_space<vmem>>, vector<64x1152xbf16>
    %c0_1 = arith.constant 0 : index
    %c0_2 = arith.constant 0 : index
    %1 = vector.load %arg2[%c0_1, %c0_2] : memref<1152x128xbf16, #tpu.memory_space<vmem>>, vector<1152x128xbf16>
    %cst = arith.constant dense<0.000000e+00> : vector<64x128xf32>
    %2 = tpu.matmul %0, %1, %cst {dimension_numbers = #tpu.dot_dimension_numbers<[1], [0], [0], [1], [0, 0, 1, 1], [], []>} : vector<64x1152xbf16>, vector<1152x128xbf16>, vector<64x128xf32> -> vector<64x128xf32>
    %3 = arith.truncf %2 : vector<64x128xf32> to vector<64x128xbf16>
    %c0_3 = arith.constant 0 : index
    %c0_4 = arith.constant 0 : index
    %4 = vector.load %arg3[%c0_3, %c0_4] : memref<64x128xbf16, #tpu.memory_space<vmem>>, vector<64x128xbf16>
    tpu.vector_store %arg3[%c0_3, %c0_4], %3 {strides = array<i32>} : memref<64x128xbf16, #tpu.memory_space<vmem>>, vector<64x128xbf16>,
    %cst_5 = arith.constant dense<0.000000e+00> : vector<128xf32>
    %5 = vector.multi_reduction <add>, %2, %cst_5 [0] : vector<64x128xf32> to vector<128xf32>
    %6 = vector.shape_cast %5 : vector<128xf32> to vector<1x128xf32>
    %7 = vector.shape_cast %6 : vector<1x128xf32> to vector<1x1x128xf32>
    %c0_6 = arith.constant 0 : index
    %c0_7 = arith.constant 0 : index
    %c0_8 = arith.constant 0 : index
    %8 = vector.load %arg4[%c0_6, %c0_7, %c0_8] : memref<1x1x128xf32, #tpu.memory_space<vmem>>, vector<1x1x128xf32>
    tpu.vector_store %arg4[%c0_6, %c0_7, %c0_8], %7 {strides = array<i32>} : memref<1x1x128xf32, #tpu.memory_space<vmem>>, vector<1x1x128xf32>,
    %9 = arith.mulf %2, %2 : vector<64x128xf32>
    %cst_9 = arith.constant dense<0.000000e+00> : vector<128xf32>
    %10 = vector.multi_reduction <add>, %9, %cst_9 [0] : vector<64x128xf32> to vector<128xf32>
    %11 = vector.shape_cast %10 : vector<128xf32> to vector<1x128xf32>
    %12 = vector.shape_cast %11 : vector<1x128xf32> to vector<1x1x128xf32>
    %c0_10 = arith.constant 0 : index
    %c0_11 = arith.constant 0 : index
    %c0_12 = arith.constant 0 : index
    %13 = vector.load %arg5[%c0_10, %c0_11, %c0_12] : memref<1x1x128xf32, #tpu.memory_space<vmem>>, vector<1x1x128xf32>
    tpu.vector_store %arg5[%c0_10, %c0_11, %c0_12], %12 {strides = array<i32>} : memref<1x1x128xf32, #tpu.memory_space<vmem>>, vector<1x1x128xf32>,
    return
  }
  func.func @transform_0(%arg0: i32) -> (i32, i32) {
    %c0_i32 = arith.constant 0 : i32
    %c0_i32_0 = arith.constant 0 : i32
    return %arg0, %c0_i32 : i32, i32
  }
  func.func @transform_1(%arg0: i32) -> (i32, i32) {
    %c0_i32 = arith.constant 0 : i32
    %c0_i32_0 = arith.constant 0 : i32
    %c0_i32_1 = arith.constant 0 : i32
    return %c0_i32, %c0_i32_0 : i32, i32
  }
  func.func @transform_2(%arg0: i32) -> (i32, i32) {
    %c0_i32 = arith.constant 0 : i32
    %c0_i32_0 = arith.constant 0 : i32
    return %arg0, %c0_i32 : i32, i32
  }
  func.func @transform_3(%arg0: i32) -> (i32, i32, i32) {
    %c0_i32 = arith.constant 0 : i32
    %c0_i32_0 = arith.constant 0 : i32
    %c0_i32_1 = arith.constant 0 : i32
    return %arg0, %c0_i32, %c0_i32_0 : i32, i32, i32
  }
  func.func @transform_4(%arg0: i32) -> (i32, i32, i32) {
    %c0_i32 = arith.constant 0 : i32
    %c0_i32_0 = arith.constant 0 : i32
    %c0_i32_1 = arith.constant 0 : i32
    return %arg0, %c0_i32, %c0_i32_0 : i32, i32, i32
  }
}

module attributes {stable_mosaic.version = 11 : i64} {
  func.func @kernel(%arg0: i32, %arg1: memref<64x128xbf16, #tpu.memory_space<vmem>>, %arg2: memref<2x1x128xf32, #tpu.memory_space<vmem>>, %arg3: memref<2x1x128xf32, #tpu.memory_space<vmem>>, %arg4: memref<2x128xf32, #tpu.memory_space<vmem>>, %arg5: memref<64x128xbf16, #tpu.memory_space<vmem>>) attributes {dimension_semantics = [#tpu.dimension_semantics<parallel>], iteration_bounds = array<i64: 2>, scalar_prefetch = 0 : i64, scratch_operands = 0 : i64, tpu.core_type = #tpu.core_type<tc>, window_params = [{transform_indices = @transform_0, window_bounds = array<i64: 64, 128>}, {pipeline_mode = #tpu.pipeline_mode<synchronous>, transform_indices = @transform_1, window_bounds = array<i64: 2, 1, 128>}, {pipeline_mode = #tpu.pipeline_mode<synchronous>, transform_indices = @transform_2, window_bounds = array<i64: 2, 1, 128>}, {pipeline_mode = #tpu.pipeline_mode<synchronous>, transform_indices = @transform_3, window_bounds = array<i64: 2, 128>}, {transform_indices = @transform_4, window_bounds = array<i64: 64, 128>}]} {
    %c0 = arith.constant 0 : index
    %c0_0 = arith.constant 0 : index
    %c0_1 = arith.constant 0 : index
    %0 = vector.load %arg2[%c0, %c0_0, %c0_1] : memref<2x1x128xf32, #tpu.memory_space<vmem>>, vector<2x1x128xf32>
    %cst = arith.constant dense<0.000000e+00> : vector<1x128xf32>
    %1 = vector.multi_reduction <add>, %0, %cst [0] : vector<2x1x128xf32> to vector<1x128xf32>
    %cst_2 = arith.constant 7.812500e-03 : f32
    %2 = vector.broadcast %cst_2 : f32 to vector<1x128xf32>
    %3 = arith.mulf %1, %2 : vector<1x128xf32>
    %c0_3 = arith.constant 0 : index
    %c0_4 = arith.constant 0 : index
    %c0_5 = arith.constant 0 : index
    %4 = vector.load %arg3[%c0_3, %c0_4, %c0_5] : memref<2x1x128xf32, #tpu.memory_space<vmem>>, vector<2x1x128xf32>
    %cst_6 = arith.constant dense<0.000000e+00> : vector<1x128xf32>
    %5 = vector.multi_reduction <add>, %4, %cst_6 [0] : vector<2x1x128xf32> to vector<1x128xf32>
    %cst_7 = arith.constant 7.812500e-03 : f32
    %6 = vector.broadcast %cst_7 : f32 to vector<1x128xf32>
    %7 = arith.mulf %5, %6 : vector<1x128xf32>
    %8 = arith.mulf %3, %3 : vector<1x128xf32>
    %9 = arith.subf %7, %8 : vector<1x128xf32>
    %cst_8 = arith.constant 0.000000e+00 : f32
    %10 = vector.broadcast %cst_8 : f32 to vector<1x128xf32>
    %11 = arith.maximumf %9, %10 : vector<1x128xf32>
    %c0_9 = arith.constant 0 : index
    %c0_10 = arith.constant 0 : index
    %12 = vector.load %arg4[%c0_9, %c0_10] : memref<2x128xf32, #tpu.memory_space<vmem>>, vector<1x128xf32>
    %cst_11 = arith.constant 9.99999974E-6 : f32
    %13 = vector.broadcast %cst_11 : f32 to vector<1x128xf32>
    %14 = arith.addf %11, %13 : vector<1x128xf32>
    %15 = math.rsqrt %14 : vector<1x128xf32>
    %16 = arith.mulf %12, %15 : vector<1x128xf32>
    %c1 = arith.constant 1 : index
    %c0_12 = arith.constant 0 : index
    %17 = vector.load %arg4[%c1, %c0_12] : memref<2x128xf32, #tpu.memory_space<vmem>>, vector<1x128xf32>
    %18 = arith.mulf %3, %16 : vector<1x128xf32>
    %19 = arith.subf %17, %18 : vector<1x128xf32>
    %c0_13 = arith.constant 0 : index
    %c0_14 = arith.constant 0 : index
    %20 = vector.load %arg1[%c0_13, %c0_14] : memref<64x128xbf16, #tpu.memory_space<vmem>>, vector<64x128xbf16>
    %21 = arith.extf %20 : vector<64x128xbf16> to vector<64x128xf32>
    %22 = vector.broadcast %16 : vector<1x128xf32> to vector<64x128xf32>
    %23 = arith.mulf %21, %22 : vector<64x128xf32>
    %24 = vector.broadcast %19 : vector<1x128xf32> to vector<64x128xf32>
    %25 = arith.addf %23, %24 : vector<64x128xf32>
    %cst_15 = arith.constant 0.000000e+00 : f32
    %26 = vector.broadcast %cst_15 : f32 to vector<64x128xf32>
    %27 = arith.maximumf %25, %26 : vector<64x128xf32>
    %28 = arith.truncf %27 : vector<64x128xf32> to vector<64x128xbf16>
    %c0_16 = arith.constant 0 : index
    %c0_17 = arith.constant 0 : index
    %29 = vector.load %arg5[%c0_16, %c0_17] : memref<64x128xbf16, #tpu.memory_space<vmem>>, vector<64x128xbf16>
    tpu.vector_store %arg5[%c0_16, %c0_17], %28 {strides = array<i32>} : memref<64x128xbf16, #tpu.memory_space<vmem>>, vector<64x128xbf16>,
    return
  }
  func.func @transform_0(%arg0: i32) -> (i32, i32) {
    %c0_i32 = arith.constant 0 : i32
    %c0_i32_0 = arith.constant 0 : i32
    return %arg0, %c0_i32 : i32, i32
  }
  func.func @transform_1(%arg0: i32) -> (i32, i32, i32) {
    %c0_i32 = arith.constant 0 : i32
    %c0_i32_0 = arith.constant 0 : i32
    %c0_i32_1 = arith.constant 0 : i32
    %c0_i32_2 = arith.constant 0 : i32
    return %c0_i32, %c0_i32_0, %c0_i32_1 : i32, i32, i32
  }
  func.func @transform_2(%arg0: i32) -> (i32, i32, i32) {
    %c0_i32 = arith.constant 0 : i32
    %c0_i32_0 = arith.constant 0 : i32
    %c0_i32_1 = arith.constant 0 : i32
    %c0_i32_2 = arith.constant 0 : i32
    return %c0_i32, %c0_i32_0, %c0_i32_1 : i32, i32, i32
  }
  func.func @transform_3(%arg0: i32) -> (i32, i32) {
    %c0_i32 = arith.constant 0 : i32
    %c0_i32_0 = arith.constant 0 : i32
    %c0_i32_1 = arith.constant 0 : i32
    return %c0_i32, %c0_i32_0 : i32, i32
  }
  func.func @transform_4(%arg0: i32) -> (i32, i32) {
    %c0_i32 = arith.constant 0 : i32
    %c0_i32_0 = arith.constant 0 : i32
    return %arg0, %c0_i32 : i32, i32
  }
}

module attributes {stable_mosaic.version = 11 : i64} {
  func.func @kernel(%arg0: i32, %arg1: memref<16x128xbf16, #tpu.memory_space<vmem>>, %arg2: memref<128x128xbf16, #tpu.memory_space<vmem>>, %arg3: memref<16x128xbf16, #tpu.memory_space<vmem>>, %arg4: memref<1x1x128xf32, #tpu.memory_space<vmem>>, %arg5: memref<1x1x128xf32, #tpu.memory_space<vmem>>) attributes {dimension_semantics = [#tpu.dimension_semantics<parallel>], iteration_bounds = array<i64: 2>, scalar_prefetch = 0 : i64, scratch_operands = 0 : i64, tpu.core_type = #tpu.core_type<tc>, window_params = [{transform_indices = @transform_0, window_bounds = array<i64: 16, 128>}, {pipeline_mode = #tpu.pipeline_mode<synchronous>, transform_indices = @transform_1, window_bounds = array<i64: 128, 128>}, {transform_indices = @transform_2, window_bounds = array<i64: 16, 128>}, {transform_indices = @transform_3, window_bounds = array<i64: 1, 1, 128>}, {transform_indices = @transform_4, window_bounds = array<i64: 1, 1, 128>}]} {
    %c0 = arith.constant 0 : index
    %c0_0 = arith.constant 0 : index
    %0 = vector.load %arg1[%c0, %c0_0] : memref<16x128xbf16, #tpu.memory_space<vmem>>, vector<16x128xbf16>
    %c0_1 = arith.constant 0 : index
    %c0_2 = arith.constant 0 : index
    %1 = vector.load %arg2[%c0_1, %c0_2] : memref<128x128xbf16, #tpu.memory_space<vmem>>, vector<128x128xbf16>
    %cst = arith.constant dense<0.000000e+00> : vector<16x128xf32>
    %2 = tpu.matmul %0, %1, %cst {dimension_numbers = #tpu.dot_dimension_numbers<[1], [0], [0], [1], [0, 0, 1, 1], [], []>} : vector<16x128xbf16>, vector<128x128xbf16>, vector<16x128xf32> -> vector<16x128xf32>
    %3 = arith.truncf %2 : vector<16x128xf32> to vector<16x128xbf16>
    %c0_3 = arith.constant 0 : index
    %c0_4 = arith.constant 0 : index
    %4 = vector.load %arg3[%c0_3, %c0_4] : memref<16x128xbf16, #tpu.memory_space<vmem>>, vector<16x128xbf16>
    tpu.vector_store %arg3[%c0_3, %c0_4], %3 {strides = array<i32>} : memref<16x128xbf16, #tpu.memory_space<vmem>>, vector<16x128xbf16>,
    %cst_5 = arith.constant dense<0.000000e+00> : vector<128xf32>
    %5 = vector.multi_reduction <add>, %2, %cst_5 [0] : vector<16x128xf32> to vector<128xf32>
    %6 = vector.shape_cast %5 : vector<128xf32> to vector<1x128xf32>
    %7 = vector.shape_cast %6 : vector<1x128xf32> to vector<1x1x128xf32>
    %c0_6 = arith.constant 0 : index
    %c0_7 = arith.constant 0 : index
    %c0_8 = arith.constant 0 : index
    %8 = vector.load %arg4[%c0_6, %c0_7, %c0_8] : memref<1x1x128xf32, #tpu.memory_space<vmem>>, vector<1x1x128xf32>
    tpu.vector_store %arg4[%c0_6, %c0_7, %c0_8], %7 {strides = array<i32>} : memref<1x1x128xf32, #tpu.memory_space<vmem>>, vector<1x1x128xf32>,
    %9 = arith.mulf %2, %2 : vector<16x128xf32>
    %cst_9 = arith.constant dense<0.000000e+00> : vector<128xf32>
    %10 = vector.multi_reduction <add>, %9, %cst_9 [0] : vector<16x128xf32> to vector<128xf32>
    %11 = vector.shape_cast %10 : vector<128xf32> to vector<1x128xf32>
    %12 = vector.shape_cast %11 : vector<1x128xf32> to vector<1x1x128xf32>
    %c0_10 = arith.constant 0 : index
    %c0_11 = arith.constant 0 : index
    %c0_12 = arith.constant 0 : index
    %13 = vector.load %arg5[%c0_10, %c0_11, %c0_12] : memref<1x1x128xf32, #tpu.memory_space<vmem>>, vector<1x1x128xf32>
    tpu.vector_store %arg5[%c0_10, %c0_11, %c0_12], %12 {strides = array<i32>} : memref<1x1x128xf32, #tpu.memory_space<vmem>>, vector<1x1x128xf32>,
    return
  }
  func.func @transform_0(%arg0: i32) -> (i32, i32) {
    %c0_i32 = arith.constant 0 : i32
    %c0_i32_0 = arith.constant 0 : i32
    return %arg0, %c0_i32 : i32, i32
  }
  func.func @transform_1(%arg0: i32) -> (i32, i32) {
    %c0_i32 = arith.constant 0 : i32
    %c0_i32_0 = arith.constant 0 : i32
    %c0_i32_1 = arith.constant 0 : i32
    return %c0_i32, %c0_i32_0 : i32, i32
  }
  func.func @transform_2(%arg0: i32) -> (i32, i32) {
    %c0_i32 = arith.constant 0 : i32
    %c0_i32_0 = arith.constant 0 : i32
    return %arg0, %c0_i32 : i32, i32
  }
  func.func @transform_3(%arg0: i32) -> (i32, i32, i32) {
    %c0_i32 = arith.constant 0 : i32
    %c0_i32_0 = arith.constant 0 : i32
    %c0_i32_1 = arith.constant 0 : i32
    return %arg0, %c0_i32, %c0_i32_0 : i32, i32, i32
  }
  func.func @transform_4(%arg0: i32) -> (i32, i32, i32) {
    %c0_i32 = arith.constant 0 : i32
    %c0_i32_0 = arith.constant 0 : i32
    %c0_i32_1 = arith.constant 0 : i32
    return %arg0, %c0_i32, %c0_i32_0 : i32, i32, i32
  }
}

module attributes {stable_mosaic.version = 11 : i64} {
  func.func @kernel(%arg0: i32, %arg1: memref<64x128xbf16, #tpu.memory_space<vmem>>, %arg2: memref<64x128xbf16, #tpu.memory_space<vmem>>, %arg3: memref<2x1x128xf32, #tpu.memory_space<vmem>>, %arg4: memref<2x1x128xf32, #tpu.memory_space<vmem>>, %arg5: memref<2x1x128xf32, #tpu.memory_space<vmem>>, %arg6: memref<2x1x128xf32, #tpu.memory_space<vmem>>, %arg7: memref<2x128xf32, #tpu.memory_space<vmem>>, %arg8: memref<2x128xf32, #tpu.memory_space<vmem>>, %arg9: memref<64x128xbf16, #tpu.memory_space<vmem>>) attributes {dimension_semantics = [#tpu.dimension_semantics<parallel>], iteration_bounds = array<i64: 2>, scalar_prefetch = 0 : i64, scratch_operands = 0 : i64, tpu.core_type = #tpu.core_type<tc>, window_params = [{transform_indices = @transform_0, window_bounds = array<i64: 64, 128>}, {transform_indices = @transform_1, window_bounds = array<i64: 64, 128>}, {pipeline_mode = #tpu.pipeline_mode<synchronous>, transform_indices = @transform_2, window_bounds = array<i64: 2, 1, 128>}, {pipeline_mode = #tpu.pipeline_mode<synchronous>, transform_indices = @transform_3, window_bounds = array<i64: 2, 1, 128>}, {pipeline_mode = #tpu.pipeline_mode<synchronous>, transform_indices = @transform_4, window_bounds = array<i64: 2, 1, 128>}, {pipeline_mode = #tpu.pipeline_mode<synchronous>, transform_indices = @transform_5, window_bounds = array<i64: 2, 1, 128>}, {pipeline_mode = #tpu.pipeline_mode<synchronous>, transform_indices = @transform_6, window_bounds = array<i64: 2, 128>}, {pipeline_mode = #tpu.pipeline_mode<synchronous>, transform_indices = @transform_7, window_bounds = array<i64: 2, 128>}, {transform_indices = @transform_8, window_bounds = array<i64: 64, 128>}]} {
    %c0 = arith.constant 0 : index
    %c0_0 = arith.constant 0 : index
    %c0_1 = arith.constant 0 : index
    %0 = vector.load %arg3[%c0, %c0_0, %c0_1] : memref<2x1x128xf32, #tpu.memory_space<vmem>>, vector<2x1x128xf32>
    %cst = arith.constant dense<0.000000e+00> : vector<1x128xf32>
    %1 = vector.multi_reduction <add>, %0, %cst [0] : vector<2x1x128xf32> to vector<1x128xf32>
    %cst_2 = arith.constant 7.812500e-03 : f32
    %2 = vector.broadcast %cst_2 : f32 to vector<1x128xf32>
    %3 = arith.mulf %1, %2 : vector<1x128xf32>
    %c0_3 = arith.constant 0 : index
    %c0_4 = arith.constant 0 : index
    %c0_5 = arith.constant 0 : index
    %4 = vector.load %arg4[%c0_3, %c0_4, %c0_5] : memref<2x1x128xf32, #tpu.memory_space<vmem>>, vector<2x1x128xf32>
    %cst_6 = arith.constant dense<0.000000e+00> : vector<1x128xf32>
    %5 = vector.multi_reduction <add>, %4, %cst_6 [0] : vector<2x1x128xf32> to vector<1x128xf32>
    %cst_7 = arith.constant 7.812500e-03 : f32
    %6 = vector.broadcast %cst_7 : f32 to vector<1x128xf32>
    %7 = arith.mulf %5, %6 : vector<1x128xf32>
    %8 = arith.mulf %3, %3 : vector<1x128xf32>
    %9 = arith.subf %7, %8 : vector<1x128xf32>
    %cst_8 = arith.constant 0.000000e+00 : f32
    %10 = vector.broadcast %cst_8 : f32 to vector<1x128xf32>
    %11 = arith.maximumf %9, %10 : vector<1x128xf32>
    %c0_9 = arith.constant 0 : index
    %c0_10 = arith.constant 0 : index
    %12 = vector.load %arg7[%c0_9, %c0_10] : memref<2x128xf32, #tpu.memory_space<vmem>>, vector<1x128xf32>
    %cst_11 = arith.constant 9.99999974E-6 : f32
    %13 = vector.broadcast %cst_11 : f32 to vector<1x128xf32>
    %14 = arith.addf %11, %13 : vector<1x128xf32>
    %15 = math.rsqrt %14 : vector<1x128xf32>
    %16 = arith.mulf %12, %15 : vector<1x128xf32>
    %c1 = arith.constant 1 : index
    %c0_12 = arith.constant 0 : index
    %17 = vector.load %arg7[%c1, %c0_12] : memref<2x128xf32, #tpu.memory_space<vmem>>, vector<1x128xf32>
    %18 = arith.mulf %3, %16 : vector<1x128xf32>
    %19 = arith.subf %17, %18 : vector<1x128xf32>
    %c0_13 = arith.constant 0 : index
    %c0_14 = arith.constant 0 : index
    %c0_15 = arith.constant 0 : index
    %20 = vector.load %arg5[%c0_13, %c0_14, %c0_15] : memref<2x1x128xf32, #tpu.memory_space<vmem>>, vector<2x1x128xf32>
    %cst_16 = arith.constant dense<0.000000e+00> : vector<1x128xf32>
    %21 = vector.multi_reduction <add>, %20, %cst_16 [0] : vector<2x1x128xf32> to vector<1x128xf32>
    %cst_17 = arith.constant 7.812500e-03 : f32
    %22 = vector.broadcast %cst_17 : f32 to vector<1x128xf32>
    %23 = arith.mulf %21, %22 : vector<1x128xf32>
    %c0_18 = arith.constant 0 : index
    %c0_19 = arith.constant 0 : index
    %c0_20 = arith.constant 0 : index
    %24 = vector.load %arg6[%c0_18, %c0_19, %c0_20] : memref<2x1x128xf32, #tpu.memory_space<vmem>>, vector<2x1x128xf32>
    %cst_21 = arith.constant dense<0.000000e+00> : vector<1x128xf32>
    %25 = vector.multi_reduction <add>, %24, %cst_21 [0] : vector<2x1x128xf32> to vector<1x128xf32>
    %cst_22 = arith.constant 7.812500e-03 : f32
    %26 = vector.broadcast %cst_22 : f32 to vector<1x128xf32>
    %27 = arith.mulf %25, %26 : vector<1x128xf32>
    %28 = arith.mulf %23, %23 : vector<1x128xf32>
    %29 = arith.subf %27, %28 : vector<1x128xf32>
    %cst_23 = arith.constant 0.000000e+00 : f32
    %30 = vector.broadcast %cst_23 : f32 to vector<1x128xf32>
    %31 = arith.maximumf %29, %30 : vector<1x128xf32>
    %c0_24 = arith.constant 0 : index
    %c0_25 = arith.constant 0 : index
    %32 = vector.load %arg8[%c0_24, %c0_25] : memref<2x128xf32, #tpu.memory_space<vmem>>, vector<1x128xf32>
    %cst_26 = arith.constant 9.99999974E-6 : f32
    %33 = vector.broadcast %cst_26 : f32 to vector<1x128xf32>
    %34 = arith.addf %31, %33 : vector<1x128xf32>
    %35 = math.rsqrt %34 : vector<1x128xf32>
    %36 = arith.mulf %32, %35 : vector<1x128xf32>
    %c1_27 = arith.constant 1 : index
    %c0_28 = arith.constant 0 : index
    %37 = vector.load %arg8[%c1_27, %c0_28] : memref<2x128xf32, #tpu.memory_space<vmem>>, vector<1x128xf32>
    %38 = arith.mulf %23, %36 : vector<1x128xf32>
    %39 = arith.subf %37, %38 : vector<1x128xf32>
    %40 = arith.addf %19, %39 : vector<1x128xf32>
    %c0_29 = arith.constant 0 : index
    %c0_30 = arith.constant 0 : index
    %41 = vector.load %arg1[%c0_29, %c0_30] : memref<64x128xbf16, #tpu.memory_space<vmem>>, vector<64x128xbf16>
    %42 = arith.extf %41 : vector<64x128xbf16> to vector<64x128xf32>
    %43 = vector.broadcast %16 : vector<1x128xf32> to vector<64x128xf32>
    %44 = arith.mulf %42, %43 : vector<64x128xf32>
    %c0_31 = arith.constant 0 : index
    %c0_32 = arith.constant 0 : index
    %45 = vector.load %arg2[%c0_31, %c0_32] : memref<64x128xbf16, #tpu.memory_space<vmem>>, vector<64x128xbf16>
    %46 = arith.extf %45 : vector<64x128xbf16> to vector<64x128xf32>
    %47 = vector.broadcast %36 : vector<1x128xf32> to vector<64x128xf32>
    %48 = arith.mulf %46, %47 : vector<64x128xf32>
    %49 = arith.addf %44, %48 : vector<64x128xf32>
    %50 = vector.broadcast %40 : vector<1x128xf32> to vector<64x128xf32>
    %51 = arith.addf %49, %50 : vector<64x128xf32>
    %cst_33 = arith.constant 0.000000e+00 : f32
    %52 = vector.broadcast %cst_33 : f32 to vector<64x128xf32>
    %53 = arith.maximumf %51, %52 : vector<64x128xf32>
    %54 = arith.truncf %53 : vector<64x128xf32> to vector<64x128xbf16>
    %c0_34 = arith.constant 0 : index
    %c0_35 = arith.constant 0 : index
    %55 = vector.load %arg9[%c0_34, %c0_35] : memref<64x128xbf16, #tpu.memory_space<vmem>>, vector<64x128xbf16>
    tpu.vector_store %arg9[%c0_34, %c0_35], %54 {strides = array<i32>} : memref<64x128xbf16, #tpu.memory_space<vmem>>, vector<64x128xbf16>,
    return
  }
  func.func @transform_0(%arg0: i32) -> (i32, i32) {
    %c0_i32 = arith.constant 0 : i32
    %c0_i32_0 = arith.constant 0 : i32
    return %arg0, %c0_i32 : i32, i32
  }
  func.func @transform_1(%arg0: i32) -> (i32, i32) {
    %c0_i32 = arith.constant 0 : i32
    %c0_i32_0 = arith.constant 0 : i32
    return %arg0, %c0_i32 : i32, i32
  }
  func.func @transform_2(%arg0: i32) -> (i32, i32, i32) {
    %c0_i32 = arith.constant 0 : i32
    %c0_i32_0 = arith.constant 0 : i32
    %c0_i32_1 = arith.constant 0 : i32
    %c0_i32_2 = arith.constant 0 : i32
    return %c0_i32, %c0_i32_0, %c0_i32_1 : i32, i32, i32
  }
  func.func @transform_3(%arg0: i32) -> (i32, i32, i32) {
    %c0_i32 = arith.constant 0 : i32
    %c0_i32_0 = arith.constant 0 : i32
    %c0_i32_1 = arith.constant 0 : i32
    %c0_i32_2 = arith.constant 0 : i32
    return %c0_i32, %c0_i32_0, %c0_i32_1 : i32, i32, i32
  }
  func.func @transform_4(%arg0: i32) -> (i32, i32, i32) {
    %c0_i32 = arith.constant 0 : i32
    %c0_i32_0 = arith.constant 0 : i32
    %c0_i32_1 = arith.constant 0 : i32
    %c0_i32_2 = arith.constant 0 : i32
    return %c0_i32, %c0_i32_0, %c0_i32_1 : i32, i32, i32
  }
  func.func @transform_5(%arg0: i32) -> (i32, i32, i32) {
    %c0_i32 = arith.constant 0 : i32
    %c0_i32_0 = arith.constant 0 : i32
    %c0_i32_1 = arith.constant 0 : i32
    %c0_i32_2 = arith.constant 0 : i32
    return %c0_i32, %c0_i32_0, %c0_i32_1 : i32, i32, i32
  }
  func.func @transform_6(%arg0: i32) -> (i32, i32) {
    %c0_i32 = arith.constant 0 : i32
    %c0_i32_0 = arith.constant 0 : i32
    %c0_i32_1 = arith.constant 0 : i32
    return %c0_i32, %c0_i32_0 : i32, i32
  }
  func.func @transform_7(%arg0: i32) -> (i32, i32) {
    %c0_i32 = arith.constant 0 : i32
    %c0_i32_0 = arith.constant 0 : i32
    %c0_i32_1 = arith.constant 0 : i32
    return %c0_i32, %c0_i32_0 : i32, i32
  }
  func.func @transform_8(%arg0: i32) -> (i32, i32) {
    %c0_i32 = arith.constant 0 : i32
    %c0_i32_0 = arith.constant 0 : i32
    return %arg0, %c0_i32 : i32, i32
  }
}

module attributes {stable_mosaic.version = 11 : i64} {
  func.func @kernel(%arg0: i32, %arg1: memref<16x1152xbf16, #tpu.memory_space<vmem>>, %arg2: memref<1152x128xbf16, #tpu.memory_space<vmem>>, %arg3: memref<16x128xbf16, #tpu.memory_space<vmem>>, %arg4: memref<1x1x128xf32, #tpu.memory_space<vmem>>, %arg5: memref<1x1x128xf32, #tpu.memory_space<vmem>>) attributes {dimension_semantics = [#tpu.dimension_semantics<parallel>], iteration_bounds = array<i64: 2>, scalar_prefetch = 0 : i64, scratch_operands = 0 : i64, tpu.core_type = #tpu.core_type<tc>, window_params = [{transform_indices = @transform_0, window_bounds = array<i64: 16, 1152>}, {pipeline_mode = #tpu.pipeline_mode<synchronous>, transform_indices = @transform_1, window_bounds = array<i64: 1152, 128>}, {transform_indices = @transform_2, window_bounds = array<i64: 16, 128>}, {transform_indices = @transform_3, window_bounds = array<i64: 1, 1, 128>}, {transform_indices = @transform_4, window_bounds = array<i64: 1, 1, 128>}]} {
    %c0 = arith.constant 0 : index
    %c0_0 = arith.constant 0 : index
    %0 = vector.load %arg1[%c0, %c0_0] : memref<16x1152xbf16, #tpu.memory_space<vmem>>, vector<16x1152xbf16>
    %c0_1 = arith.constant 0 : index
    %c0_2 = arith.constant 0 : index
    %1 = vector.load %arg2[%c0_1, %c0_2] : memref<1152x128xbf16, #tpu.memory_space<vmem>>, vector<1152x128xbf16>
    %cst = arith.constant dense<0.000000e+00> : vector<16x128xf32>
    %2 = tpu.matmul %0, %1, %cst {dimension_numbers = #tpu.dot_dimension_numbers<[1], [0], [0], [1], [0, 0, 1, 1], [], []>} : vector<16x1152xbf16>, vector<1152x128xbf16>, vector<16x128xf32> -> vector<16x128xf32>
    %3 = arith.truncf %2 : vector<16x128xf32> to vector<16x128xbf16>
    %c0_3 = arith.constant 0 : index
    %c0_4 = arith.constant 0 : index
    %4 = vector.load %arg3[%c0_3, %c0_4] : memref<16x128xbf16, #tpu.memory_space<vmem>>, vector<16x128xbf16>
    tpu.vector_store %arg3[%c0_3, %c0_4], %3 {strides = array<i32>} : memref<16x128xbf16, #tpu.memory_space<vmem>>, vector<16x128xbf16>,
    %cst_5 = arith.constant dense<0.000000e+00> : vector<128xf32>
    %5 = vector.multi_reduction <add>, %2, %cst_5 [0] : vector<16x128xf32> to vector<128xf32>
    %6 = vector.shape_cast %5 : vector<128xf32> to vector<1x128xf32>
    %7 = vector.shape_cast %6 : vector<1x128xf32> to vector<1x1x128xf32>
    %c0_6 = arith.constant 0 : index
    %c0_7 = arith.constant 0 : index
    %c0_8 = arith.constant 0 : index
    %8 = vector.load %arg4[%c0_6, %c0_7, %c0_8] : memref<1x1x128xf32, #tpu.memory_space<vmem>>, vector<1x1x128xf32>
    tpu.vector_store %arg4[%c0_6, %c0_7, %c0_8], %7 {strides = array<i32>} : memref<1x1x128xf32, #tpu.memory_space<vmem>>, vector<1x1x128xf32>,
    %9 = arith.mulf %2, %2 : vector<16x128xf32>
    %cst_9 = arith.constant dense<0.000000e+00> : vector<128xf32>
    %10 = vector.multi_reduction <add>, %9, %cst_9 [0] : vector<16x128xf32> to vector<128xf32>
    %11 = vector.shape_cast %10 : vector<128xf32> to vector<1x128xf32>
    %12 = vector.shape_cast %11 : vector<1x128xf32> to vector<1x1x128xf32>
    %c0_10 = arith.constant 0 : index
    %c0_11 = arith.constant 0 : index
    %c0_12 = arith.constant 0 : index
    %13 = vector.load %arg5[%c0_10, %c0_11, %c0_12] : memref<1x1x128xf32, #tpu.memory_space<vmem>>, vector<1x1x128xf32>
    tpu.vector_store %arg5[%c0_10, %c0_11, %c0_12], %12 {strides = array<i32>} : memref<1x1x128xf32, #tpu.memory_space<vmem>>, vector<1x1x128xf32>,
    return
  }
  func.func @transform_0(%arg0: i32) -> (i32, i32) {
    %c0_i32 = arith.constant 0 : i32
    %c0_i32_0 = arith.constant 0 : i32
    return %arg0, %c0_i32 : i32, i32
  }
  func.func @transform_1(%arg0: i32) -> (i32, i32) {
    %c0_i32 = arith.constant 0 : i32
    %c0_i32_0 = arith.constant 0 : i32
    %c0_i32_1 = arith.constant 0 : i32
    return %c0_i32, %c0_i32_0 : i32, i32
  }
  func.func @transform_2(%arg0: i32) -> (i32, i32) {
    %c0_i32 = arith.constant 0 : i32
    %c0_i32_0 = arith.constant 0 : i32
    return %arg0, %c0_i32 : i32, i32
  }
  func.func @transform_3(%arg0: i32) -> (i32, i32, i32) {
    %c0_i32 = arith.constant 0 : i32
    %c0_i32_0 = arith.constant 0 : i32
    %c0_i32_1 = arith.constant 0 : i32
    return %arg0, %c0_i32, %c0_i32_0 : i32, i32, i32
  }
  func.func @transform_4(%arg0: i32) -> (i32, i32, i32) {
    %c0_i32 = arith.constant 0 : i32
    %c0_i32_0 = arith.constant 0 : i32
    %c0_i32_1 = arith.constant 0 : i32
    return %arg0, %c0_i32, %c0_i32_0 : i32, i32, i32
  }
}

module attributes {stable_mosaic.version = 11 : i64} {
  func.func @kernel(%arg0: i32, %arg1: memref<16x128xbf16, #tpu.memory_space<vmem>>, %arg2: memref<2x1x128xf32, #tpu.memory_space<vmem>>, %arg3: memref<2x1x128xf32, #tpu.memory_space<vmem>>, %arg4: memref<2x128xf32, #tpu.memory_space<vmem>>, %arg5: memref<16x128xbf16, #tpu.memory_space<vmem>>) attributes {dimension_semantics = [#tpu.dimension_semantics<parallel>], iteration_bounds = array<i64: 2>, scalar_prefetch = 0 : i64, scratch_operands = 0 : i64, tpu.core_type = #tpu.core_type<tc>, window_params = [{transform_indices = @transform_0, window_bounds = array<i64: 16, 128>}, {pipeline_mode = #tpu.pipeline_mode<synchronous>, transform_indices = @transform_1, window_bounds = array<i64: 2, 1, 128>}, {pipeline_mode = #tpu.pipeline_mode<synchronous>, transform_indices = @transform_2, window_bounds = array<i64: 2, 1, 128>}, {pipeline_mode = #tpu.pipeline_mode<synchronous>, transform_indices = @transform_3, window_bounds = array<i64: 2, 128>}, {transform_indices = @transform_4, window_bounds = array<i64: 16, 128>}]} {
    %c0 = arith.constant 0 : index
    %c0_0 = arith.constant 0 : index
    %c0_1 = arith.constant 0 : index
    %0 = vector.load %arg2[%c0, %c0_0, %c0_1] : memref<2x1x128xf32, #tpu.memory_space<vmem>>, vector<2x1x128xf32>
    %cst = arith.constant dense<0.000000e+00> : vector<1x128xf32>
    %1 = vector.multi_reduction <add>, %0, %cst [0] : vector<2x1x128xf32> to vector<1x128xf32>
    %cst_2 = arith.constant 3.125000e-02 : f32
    %2 = vector.broadcast %cst_2 : f32 to vector<1x128xf32>
    %3 = arith.mulf %1, %2 : vector<1x128xf32>
    %c0_3 = arith.constant 0 : index
    %c0_4 = arith.constant 0 : index
    %c0_5 = arith.constant 0 : index
    %4 = vector.load %arg3[%c0_3, %c0_4, %c0_5] : memref<2x1x128xf32, #tpu.memory_space<vmem>>, vector<2x1x128xf32>
    %cst_6 = arith.constant dense<0.000000e+00> : vector<1x128xf32>
    %5 = vector.multi_reduction <add>, %4, %cst_6 [0] : vector<2x1x128xf32> to vector<1x128xf32>
    %cst_7 = arith.constant 3.125000e-02 : f32
    %6 = vector.broadcast %cst_7 : f32 to vector<1x128xf32>
    %7 = arith.mulf %5, %6 : vector<1x128xf32>
    %8 = arith.mulf %3, %3 : vector<1x128xf32>
    %9 = arith.subf %7, %8 : vector<1x128xf32>
    %cst_8 = arith.constant 0.000000e+00 : f32
    %10 = vector.broadcast %cst_8 : f32 to vector<1x128xf32>
    %11 = arith.maximumf %9, %10 : vector<1x128xf32>
    %c0_9 = arith.constant 0 : index
    %c0_10 = arith.constant 0 : index
    %12 = vector.load %arg4[%c0_9, %c0_10] : memref<2x128xf32, #tpu.memory_space<vmem>>, vector<1x128xf32>
    %cst_11 = arith.constant 9.99999974E-6 : f32
    %13 = vector.broadcast %cst_11 : f32 to vector<1x128xf32>
    %14 = arith.addf %11, %13 : vector<1x128xf32>
    %15 = math.rsqrt %14 : vector<1x128xf32>
    %16 = arith.mulf %12, %15 : vector<1x128xf32>
    %c1 = arith.constant 1 : index
    %c0_12 = arith.constant 0 : index
    %17 = vector.load %arg4[%c1, %c0_12] : memref<2x128xf32, #tpu.memory_space<vmem>>, vector<1x128xf32>
    %18 = arith.mulf %3, %16 : vector<1x128xf32>
    %19 = arith.subf %17, %18 : vector<1x128xf32>
    %c0_13 = arith.constant 0 : index
    %c0_14 = arith.constant 0 : index
    %20 = vector.load %arg1[%c0_13, %c0_14] : memref<16x128xbf16, #tpu.memory_space<vmem>>, vector<16x128xbf16>
    %21 = arith.extf %20 : vector<16x128xbf16> to vector<16x128xf32>
    %22 = vector.broadcast %16 : vector<1x128xf32> to vector<16x128xf32>
    %23 = arith.mulf %21, %22 : vector<16x128xf32>
    %24 = vector.broadcast %19 : vector<1x128xf32> to vector<16x128xf32>
    %25 = arith.addf %23, %24 : vector<16x128xf32>
    %cst_15 = arith.constant 0.000000e+00 : f32
    %26 = vector.broadcast %cst_15 : f32 to vector<16x128xf32>
    %27 = arith.maximumf %25, %26 : vector<16x128xf32>
    %28 = arith.truncf %27 : vector<16x128xf32> to vector<16x128xbf16>
    %c0_16 = arith.constant 0 : index
    %c0_17 = arith.constant 0 : index
    %29 = vector.load %arg5[%c0_16, %c0_17] : memref<16x128xbf16, #tpu.memory_space<vmem>>, vector<16x128xbf16>
    tpu.vector_store %arg5[%c0_16, %c0_17], %28 {strides = array<i32>} : memref<16x128xbf16, #tpu.memory_space<vmem>>, vector<16x128xbf16>,
    return
  }
  func.func @transform_0(%arg0: i32) -> (i32, i32) {
    %c0_i32 = arith.constant 0 : i32
    %c0_i32_0 = arith.constant 0 : i32
    return %arg0, %c0_i32 : i32, i32
  }
  func.func @transform_1(%arg0: i32) -> (i32, i32, i32) {
    %c0_i32 = arith.constant 0 : i32
    %c0_i32_0 = arith.constant 0 : i32
    %c0_i32_1 = arith.constant 0 : i32
    %c0_i32_2 = arith.constant 0 : i32
    return %c0_i32, %c0_i32_0, %c0_i32_1 : i32, i32, i32
  }
  func.func @transform_2(%arg0: i32) -> (i32, i32, i32) {
    %c0_i32 = arith.constant 0 : i32
    %c0_i32_0 = arith.constant 0 : i32
    %c0_i32_1 = arith.constant 0 : i32
    %c0_i32_2 = arith.constant 0 : i32
    return %c0_i32, %c0_i32_0, %c0_i32_1 : i32, i32, i32
  }
  func.func @transform_3(%arg0: i32) -> (i32, i32) {
    %c0_i32 = arith.constant 0 : i32
    %c0_i32_0 = arith.constant 0 : i32
    %c0_i32_1 = arith.constant 0 : i32
    return %c0_i32, %c0_i32_0 : i32, i32
  }
  func.func @transform_4(%arg0: i32) -> (i32, i32) {
    %c0_i32 = arith.constant 0 : i32
    %c0_i32_0 = arith.constant 0 : i32
    return %arg0, %c0_i32 : i32, i32
  }
}

module attributes {stable_mosaic.version = 11 : i64} {
  func.func @kernel(%arg0: i32, %arg1: memref<16x256xbf16, #tpu.memory_space<vmem>>, %arg2: memref<256x128xbf16, #tpu.memory_space<vmem>>, %arg3: memref<16x128xbf16, #tpu.memory_space<vmem>>, %arg4: memref<1x1x128xf32, #tpu.memory_space<vmem>>, %arg5: memref<1x1x128xf32, #tpu.memory_space<vmem>>) attributes {dimension_semantics = [#tpu.dimension_semantics<parallel>], iteration_bounds = array<i64: 2>, scalar_prefetch = 0 : i64, scratch_operands = 0 : i64, tpu.core_type = #tpu.core_type<tc>, window_params = [{transform_indices = @transform_0, window_bounds = array<i64: 16, 256>}, {pipeline_mode = #tpu.pipeline_mode<synchronous>, transform_indices = @transform_1, window_bounds = array<i64: 256, 128>}, {transform_indices = @transform_2, window_bounds = array<i64: 16, 128>}, {transform_indices = @transform_3, window_bounds = array<i64: 1, 1, 128>}, {transform_indices = @transform_4, window_bounds = array<i64: 1, 1, 128>}]} {
    %c0 = arith.constant 0 : index
    %c0_0 = arith.constant 0 : index
    %0 = vector.load %arg1[%c0, %c0_0] : memref<16x256xbf16, #tpu.memory_space<vmem>>, vector<16x256xbf16>
    %c0_1 = arith.constant 0 : index
    %c0_2 = arith.constant 0 : index
    %1 = vector.load %arg2[%c0_1, %c0_2] : memref<256x128xbf16, #tpu.memory_space<vmem>>, vector<256x128xbf16>
    %cst = arith.constant dense<0.000000e+00> : vector<16x128xf32>
    %2 = tpu.matmul %0, %1, %cst {dimension_numbers = #tpu.dot_dimension_numbers<[1], [0], [0], [1], [0, 0, 1, 1], [], []>} : vector<16x256xbf16>, vector<256x128xbf16>, vector<16x128xf32> -> vector<16x128xf32>
    %3 = arith.truncf %2 : vector<16x128xf32> to vector<16x128xbf16>
    %c0_3 = arith.constant 0 : index
    %c0_4 = arith.constant 0 : index
    %4 = vector.load %arg3[%c0_3, %c0_4] : memref<16x128xbf16, #tpu.memory_space<vmem>>, vector<16x128xbf16>
    tpu.vector_store %arg3[%c0_3, %c0_4], %3 {strides = array<i32>} : memref<16x128xbf16, #tpu.memory_space<vmem>>, vector<16x128xbf16>,
    %cst_5 = arith.constant dense<0.000000e+00> : vector<128xf32>
    %5 = vector.multi_reduction <add>, %2, %cst_5 [0] : vector<16x128xf32> to vector<128xf32>
    %6 = vector.shape_cast %5 : vector<128xf32> to vector<1x128xf32>
    %7 = vector.shape_cast %6 : vector<1x128xf32> to vector<1x1x128xf32>
    %c0_6 = arith.constant 0 : index
    %c0_7 = arith.constant 0 : index
    %c0_8 = arith.constant 0 : index
    %8 = vector.load %arg4[%c0_6, %c0_7, %c0_8] : memref<1x1x128xf32, #tpu.memory_space<vmem>>, vector<1x1x128xf32>
    tpu.vector_store %arg4[%c0_6, %c0_7, %c0_8], %7 {strides = array<i32>} : memref<1x1x128xf32, #tpu.memory_space<vmem>>, vector<1x1x128xf32>,
    %9 = arith.mulf %2, %2 : vector<16x128xf32>
    %cst_9 = arith.constant dense<0.000000e+00> : vector<128xf32>
    %10 = vector.multi_reduction <add>, %9, %cst_9 [0] : vector<16x128xf32> to vector<128xf32>
    %11 = vector.shape_cast %10 : vector<128xf32> to vector<1x128xf32>
    %12 = vector.shape_cast %11 : vector<1x128xf32> to vector<1x1x128xf32>
    %c0_10 = arith.constant 0 : index
    %c0_11 = arith.constant 0 : index
    %c0_12 = arith.constant 0 : index
    %13 = vector.load %arg5[%c0_10, %c0_11, %c0_12] : memref<1x1x128xf32, #tpu.memory_space<vmem>>, vector<1x1x128xf32>
    tpu.vector_store %arg5[%c0_10, %c0_11, %c0_12], %12 {strides = array<i32>} : memref<1x1x128xf32, #tpu.memory_space<vmem>>, vector<1x1x128xf32>,
    return
  }
  func.func @transform_0(%arg0: i32) -> (i32, i32) {
    %c0_i32 = arith.constant 0 : i32
    %c0_i32_0 = arith.constant 0 : i32
    return %arg0, %c0_i32 : i32, i32
  }
  func.func @transform_1(%arg0: i32) -> (i32, i32) {
    %c0_i32 = arith.constant 0 : i32
    %c0_i32_0 = arith.constant 0 : i32
    %c0_i32_1 = arith.constant 0 : i32
    return %c0_i32, %c0_i32_0 : i32, i32
  }
  func.func @transform_2(%arg0: i32) -> (i32, i32) {
    %c0_i32 = arith.constant 0 : i32
    %c0_i32_0 = arith.constant 0 : i32
    return %arg0, %c0_i32 : i32, i32
  }
  func.func @transform_3(%arg0: i32) -> (i32, i32, i32) {
    %c0_i32 = arith.constant 0 : i32
    %c0_i32_0 = arith.constant 0 : i32
    %c0_i32_1 = arith.constant 0 : i32
    return %arg0, %c0_i32, %c0_i32_0 : i32, i32, i32
  }
  func.func @transform_4(%arg0: i32) -> (i32, i32, i32) {
    %c0_i32 = arith.constant 0 : i32
    %c0_i32_0 = arith.constant 0 : i32
    %c0_i32_1 = arith.constant 0 : i32
    return %arg0, %c0_i32, %c0_i32_0 : i32, i32, i32
  }
}

module attributes {stable_mosaic.version = 11 : i64} {
  func.func @kernel(%arg0: i32, %arg1: memref<16x384xbf16, #tpu.memory_space<vmem>>, %arg2: memref<384x128xbf16, #tpu.memory_space<vmem>>, %arg3: memref<16x128xbf16, #tpu.memory_space<vmem>>, %arg4: memref<1x1x128xf32, #tpu.memory_space<vmem>>, %arg5: memref<1x1x128xf32, #tpu.memory_space<vmem>>) attributes {dimension_semantics = [#tpu.dimension_semantics<parallel>], iteration_bounds = array<i64: 2>, scalar_prefetch = 0 : i64, scratch_operands = 0 : i64, tpu.core_type = #tpu.core_type<tc>, window_params = [{transform_indices = @transform_0, window_bounds = array<i64: 16, 384>}, {pipeline_mode = #tpu.pipeline_mode<synchronous>, transform_indices = @transform_1, window_bounds = array<i64: 384, 128>}, {transform_indices = @transform_2, window_bounds = array<i64: 16, 128>}, {transform_indices = @transform_3, window_bounds = array<i64: 1, 1, 128>}, {transform_indices = @transform_4, window_bounds = array<i64: 1, 1, 128>}]} {
    %c0 = arith.constant 0 : index
    %c0_0 = arith.constant 0 : index
    %0 = vector.load %arg1[%c0, %c0_0] : memref<16x384xbf16, #tpu.memory_space<vmem>>, vector<16x384xbf16>
    %c0_1 = arith.constant 0 : index
    %c0_2 = arith.constant 0 : index
    %1 = vector.load %arg2[%c0_1, %c0_2] : memref<384x128xbf16, #tpu.memory_space<vmem>>, vector<384x128xbf16>
    %cst = arith.constant dense<0.000000e+00> : vector<16x128xf32>
    %2 = tpu.matmul %0, %1, %cst {dimension_numbers = #tpu.dot_dimension_numbers<[1], [0], [0], [1], [0, 0, 1, 1], [], []>} : vector<16x384xbf16>, vector<384x128xbf16>, vector<16x128xf32> -> vector<16x128xf32>
    %3 = arith.truncf %2 : vector<16x128xf32> to vector<16x128xbf16>
    %c0_3 = arith.constant 0 : index
    %c0_4 = arith.constant 0 : index
    %4 = vector.load %arg3[%c0_3, %c0_4] : memref<16x128xbf16, #tpu.memory_space<vmem>>, vector<16x128xbf16>
    tpu.vector_store %arg3[%c0_3, %c0_4], %3 {strides = array<i32>} : memref<16x128xbf16, #tpu.memory_space<vmem>>, vector<16x128xbf16>,
    %cst_5 = arith.constant dense<0.000000e+00> : vector<128xf32>
    %5 = vector.multi_reduction <add>, %2, %cst_5 [0] : vector<16x128xf32> to vector<128xf32>
    %6 = vector.shape_cast %5 : vector<128xf32> to vector<1x128xf32>
    %7 = vector.shape_cast %6 : vector<1x128xf32> to vector<1x1x128xf32>
    %c0_6 = arith.constant 0 : index
    %c0_7 = arith.constant 0 : index
    %c0_8 = arith.constant 0 : index
    %8 = vector.load %arg4[%c0_6, %c0_7, %c0_8] : memref<1x1x128xf32, #tpu.memory_space<vmem>>, vector<1x1x128xf32>
    tpu.vector_store %arg4[%c0_6, %c0_7, %c0_8], %7 {strides = array<i32>} : memref<1x1x128xf32, #tpu.memory_space<vmem>>, vector<1x1x128xf32>,
    %9 = arith.mulf %2, %2 : vector<16x128xf32>
    %cst_9 = arith.constant dense<0.000000e+00> : vector<128xf32>
    %10 = vector.multi_reduction <add>, %9, %cst_9 [0] : vector<16x128xf32> to vector<128xf32>
    %11 = vector.shape_cast %10 : vector<128xf32> to vector<1x128xf32>
    %12 = vector.shape_cast %11 : vector<1x128xf32> to vector<1x1x128xf32>
    %c0_10 = arith.constant 0 : index
    %c0_11 = arith.constant 0 : index
    %c0_12 = arith.constant 0 : index
    %13 = vector.load %arg5[%c0_10, %c0_11, %c0_12] : memref<1x1x128xf32, #tpu.memory_space<vmem>>, vector<1x1x128xf32>
    tpu.vector_store %arg5[%c0_10, %c0_11, %c0_12], %12 {strides = array<i32>} : memref<1x1x128xf32, #tpu.memory_space<vmem>>, vector<1x1x128xf32>,
    return
  }
  func.func @transform_0(%arg0: i32) -> (i32, i32) {
    %c0_i32 = arith.constant 0 : i32
    %c0_i32_0 = arith.constant 0 : i32
    return %arg0, %c0_i32 : i32, i32
  }
  func.func @transform_1(%arg0: i32) -> (i32, i32) {
    %c0_i32 = arith.constant 0 : i32
    %c0_i32_0 = arith.constant 0 : i32
    %c0_i32_1 = arith.constant 0 : i32
    return %c0_i32, %c0_i32_0 : i32, i32
  }
  func.func @transform_2(%arg0: i32) -> (i32, i32) {
    %c0_i32 = arith.constant 0 : i32
    %c0_i32_0 = arith.constant 0 : i32
    return %arg0, %c0_i32 : i32, i32
  }
  func.func @transform_3(%arg0: i32) -> (i32, i32, i32) {
    %c0_i32 = arith.constant 0 : i32
    %c0_i32_0 = arith.constant 0 : i32
    %c0_i32_1 = arith.constant 0 : i32
    return %arg0, %c0_i32, %c0_i32_0 : i32, i32, i32
  }
  func.func @transform_4(%arg0: i32) -> (i32, i32, i32) {
    %c0_i32 = arith.constant 0 : i32
    %c0_i32_0 = arith.constant 0 : i32
    %c0_i32_1 = arith.constant 0 : i32
    return %arg0, %c0_i32, %c0_i32_0 : i32, i32, i32
  }
}

module attributes {stable_mosaic.version = 11 : i64} {
  func.func @kernel(%arg0: i32, %arg1: memref<16x128xbf16, #tpu.memory_space<vmem>>, %arg2: memref<16x128xbf16, #tpu.memory_space<vmem>>, %arg3: memref<2x1x128xf32, #tpu.memory_space<vmem>>, %arg4: memref<2x1x128xf32, #tpu.memory_space<vmem>>, %arg5: memref<2x1x128xf32, #tpu.memory_space<vmem>>, %arg6: memref<2x1x128xf32, #tpu.memory_space<vmem>>, %arg7: memref<2x128xf32, #tpu.memory_space<vmem>>, %arg8: memref<2x128xf32, #tpu.memory_space<vmem>>, %arg9: memref<16x128xbf16, #tpu.memory_space<vmem>>) attributes {dimension_semantics = [#tpu.dimension_semantics<parallel>], iteration_bounds = array<i64: 2>, scalar_prefetch = 0 : i64, scratch_operands = 0 : i64, tpu.core_type = #tpu.core_type<tc>, window_params = [{transform_indices = @transform_0, window_bounds = array<i64: 16, 128>}, {transform_indices = @transform_1, window_bounds = array<i64: 16, 128>}, {pipeline_mode = #tpu.pipeline_mode<synchronous>, transform_indices = @transform_2, window_bounds = array<i64: 2, 1, 128>}, {pipeline_mode = #tpu.pipeline_mode<synchronous>, transform_indices = @transform_3, window_bounds = array<i64: 2, 1, 128>}, {pipeline_mode = #tpu.pipeline_mode<synchronous>, transform_indices = @transform_4, window_bounds = array<i64: 2, 1, 128>}, {pipeline_mode = #tpu.pipeline_mode<synchronous>, transform_indices = @transform_5, window_bounds = array<i64: 2, 1, 128>}, {pipeline_mode = #tpu.pipeline_mode<synchronous>, transform_indices = @transform_6, window_bounds = array<i64: 2, 128>}, {pipeline_mode = #tpu.pipeline_mode<synchronous>, transform_indices = @transform_7, window_bounds = array<i64: 2, 128>}, {transform_indices = @transform_8, window_bounds = array<i64: 16, 128>}]} {
    %c0 = arith.constant 0 : index
    %c0_0 = arith.constant 0 : index
    %c0_1 = arith.constant 0 : index
    %0 = vector.load %arg3[%c0, %c0_0, %c0_1] : memref<2x1x128xf32, #tpu.memory_space<vmem>>, vector<2x1x128xf32>
    %cst = arith.constant dense<0.000000e+00> : vector<1x128xf32>
    %1 = vector.multi_reduction <add>, %0, %cst [0] : vector<2x1x128xf32> to vector<1x128xf32>
    %cst_2 = arith.constant 3.125000e-02 : f32
    %2 = vector.broadcast %cst_2 : f32 to vector<1x128xf32>
    %3 = arith.mulf %1, %2 : vector<1x128xf32>
    %c0_3 = arith.constant 0 : index
    %c0_4 = arith.constant 0 : index
    %c0_5 = arith.constant 0 : index
    %4 = vector.load %arg4[%c0_3, %c0_4, %c0_5] : memref<2x1x128xf32, #tpu.memory_space<vmem>>, vector<2x1x128xf32>
    %cst_6 = arith.constant dense<0.000000e+00> : vector<1x128xf32>
    %5 = vector.multi_reduction <add>, %4, %cst_6 [0] : vector<2x1x128xf32> to vector<1x128xf32>
    %cst_7 = arith.constant 3.125000e-02 : f32
    %6 = vector.broadcast %cst_7 : f32 to vector<1x128xf32>
    %7 = arith.mulf %5, %6 : vector<1x128xf32>
    %8 = arith.mulf %3, %3 : vector<1x128xf32>
    %9 = arith.subf %7, %8 : vector<1x128xf32>
    %cst_8 = arith.constant 0.000000e+00 : f32
    %10 = vector.broadcast %cst_8 : f32 to vector<1x128xf32>
    %11 = arith.maximumf %9, %10 : vector<1x128xf32>
    %c0_9 = arith.constant 0 : index
    %c0_10 = arith.constant 0 : index
    %12 = vector.load %arg7[%c0_9, %c0_10] : memref<2x128xf32, #tpu.memory_space<vmem>>, vector<1x128xf32>
    %cst_11 = arith.constant 9.99999974E-6 : f32
    %13 = vector.broadcast %cst_11 : f32 to vector<1x128xf32>
    %14 = arith.addf %11, %13 : vector<1x128xf32>
    %15 = math.rsqrt %14 : vector<1x128xf32>
    %16 = arith.mulf %12, %15 : vector<1x128xf32>
    %c1 = arith.constant 1 : index
    %c0_12 = arith.constant 0 : index
    %17 = vector.load %arg7[%c1, %c0_12] : memref<2x128xf32, #tpu.memory_space<vmem>>, vector<1x128xf32>
    %18 = arith.mulf %3, %16 : vector<1x128xf32>
    %19 = arith.subf %17, %18 : vector<1x128xf32>
    %c0_13 = arith.constant 0 : index
    %c0_14 = arith.constant 0 : index
    %c0_15 = arith.constant 0 : index
    %20 = vector.load %arg5[%c0_13, %c0_14, %c0_15] : memref<2x1x128xf32, #tpu.memory_space<vmem>>, vector<2x1x128xf32>
    %cst_16 = arith.constant dense<0.000000e+00> : vector<1x128xf32>
    %21 = vector.multi_reduction <add>, %20, %cst_16 [0] : vector<2x1x128xf32> to vector<1x128xf32>
    %cst_17 = arith.constant 3.125000e-02 : f32
    %22 = vector.broadcast %cst_17 : f32 to vector<1x128xf32>
    %23 = arith.mulf %21, %22 : vector<1x128xf32>
    %c0_18 = arith.constant 0 : index
    %c0_19 = arith.constant 0 : index
    %c0_20 = arith.constant 0 : index
    %24 = vector.load %arg6[%c0_18, %c0_19, %c0_20] : memref<2x1x128xf32, #tpu.memory_space<vmem>>, vector<2x1x128xf32>
    %cst_21 = arith.constant dense<0.000000e+00> : vector<1x128xf32>
    %25 = vector.multi_reduction <add>, %24, %cst_21 [0] : vector<2x1x128xf32> to vector<1x128xf32>
    %cst_22 = arith.constant 3.125000e-02 : f32
    %26 = vector.broadcast %cst_22 : f32 to vector<1x128xf32>
    %27 = arith.mulf %25, %26 : vector<1x128xf32>
    %28 = arith.mulf %23, %23 : vector<1x128xf32>
    %29 = arith.subf %27, %28 : vector<1x128xf32>
    %cst_23 = arith.constant 0.000000e+00 : f32
    %30 = vector.broadcast %cst_23 : f32 to vector<1x128xf32>
    %31 = arith.maximumf %29, %30 : vector<1x128xf32>
    %c0_24 = arith.constant 0 : index
    %c0_25 = arith.constant 0 : index
    %32 = vector.load %arg8[%c0_24, %c0_25] : memref<2x128xf32, #tpu.memory_space<vmem>>, vector<1x128xf32>
    %cst_26 = arith.constant 9.99999974E-6 : f32
    %33 = vector.broadcast %cst_26 : f32 to vector<1x128xf32>
    %34 = arith.addf %31, %33 : vector<1x128xf32>
    %35 = math.rsqrt %34 : vector<1x128xf32>
    %36 = arith.mulf %32, %35 : vector<1x128xf32>
    %c1_27 = arith.constant 1 : index
    %c0_28 = arith.constant 0 : index
    %37 = vector.load %arg8[%c1_27, %c0_28] : memref<2x128xf32, #tpu.memory_space<vmem>>, vector<1x128xf32>
    %38 = arith.mulf %23, %36 : vector<1x128xf32>
    %39 = arith.subf %37, %38 : vector<1x128xf32>
    %40 = arith.addf %19, %39 : vector<1x128xf32>
    %c0_29 = arith.constant 0 : index
    %c0_30 = arith.constant 0 : index
    %41 = vector.load %arg1[%c0_29, %c0_30] : memref<16x128xbf16, #tpu.memory_space<vmem>>, vector<16x128xbf16>
    %42 = arith.extf %41 : vector<16x128xbf16> to vector<16x128xf32>
    %43 = vector.broadcast %16 : vector<1x128xf32> to vector<16x128xf32>
    %44 = arith.mulf %42, %43 : vector<16x128xf32>
    %c0_31 = arith.constant 0 : index
    %c0_32 = arith.constant 0 : index
    %45 = vector.load %arg2[%c0_31, %c0_32] : memref<16x128xbf16, #tpu.memory_space<vmem>>, vector<16x128xbf16>
    %46 = arith.extf %45 : vector<16x128xbf16> to vector<16x128xf32>
    %47 = vector.broadcast %36 : vector<1x128xf32> to vector<16x128xf32>
    %48 = arith.mulf %46, %47 : vector<16x128xf32>
    %49 = arith.addf %44, %48 : vector<16x128xf32>
    %50 = vector.broadcast %40 : vector<1x128xf32> to vector<16x128xf32>
    %51 = arith.addf %49, %50 : vector<16x128xf32>
    %cst_33 = arith.constant 0.000000e+00 : f32
    %52 = vector.broadcast %cst_33 : f32 to vector<16x128xf32>
    %53 = arith.maximumf %51, %52 : vector<16x128xf32>
    %54 = arith.truncf %53 : vector<16x128xf32> to vector<16x128xbf16>
    %c0_34 = arith.constant 0 : index
    %c0_35 = arith.constant 0 : index
    %55 = vector.load %arg9[%c0_34, %c0_35] : memref<16x128xbf16, #tpu.memory_space<vmem>>, vector<16x128xbf16>
    tpu.vector_store %arg9[%c0_34, %c0_35], %54 {strides = array<i32>} : memref<16x128xbf16, #tpu.memory_space<vmem>>, vector<16x128xbf16>,
    return
  }
  func.func @transform_0(%arg0: i32) -> (i32, i32) {
    %c0_i32 = arith.constant 0 : i32
    %c0_i32_0 = arith.constant 0 : i32
    return %arg0, %c0_i32 : i32, i32
  }
  func.func @transform_1(%arg0: i32) -> (i32, i32) {
    %c0_i32 = arith.constant 0 : i32
    %c0_i32_0 = arith.constant 0 : i32
    return %arg0, %c0_i32 : i32, i32
  }
  func.func @transform_2(%arg0: i32) -> (i32, i32, i32) {
    %c0_i32 = arith.constant 0 : i32
    %c0_i32_0 = arith.constant 0 : i32
    %c0_i32_1 = arith.constant 0 : i32
    %c0_i32_2 = arith.constant 0 : i32
    return %c0_i32, %c0_i32_0, %c0_i32_1 : i32, i32, i32
  }
  func.func @transform_3(%arg0: i32) -> (i32, i32, i32) {
    %c0_i32 = arith.constant 0 : i32
    %c0_i32_0 = arith.constant 0 : i32
    %c0_i32_1 = arith.constant 0 : i32
    %c0_i32_2 = arith.constant 0 : i32
    return %c0_i32, %c0_i32_0, %c0_i32_1 : i32, i32, i32
  }
  func.func @transform_4(%arg0: i32) -> (i32, i32, i32) {
    %c0_i32 = arith.constant 0 : i32
    %c0_i32_0 = arith.constant 0 : i32
    %c0_i32_1 = arith.constant 0 : i32
    %c0_i32_2 = arith.constant 0 : i32
    return %c0_i32, %c0_i32_0, %c0_i32_1 : i32, i32, i32
  }
  func.func @transform_5(%arg0: i32) -> (i32, i32, i32) {
    %c0_i32 = arith.constant 0 : i32
    %c0_i32_0 = arith.constant 0 : i32
    %c0_i32_1 = arith.constant 0 : i32
    %c0_i32_2 = arith.constant 0 : i32
    return %c0_i32, %c0_i32_0, %c0_i32_1 : i32, i32, i32
  }
  func.func @transform_6(%arg0: i32) -> (i32, i32) {
    %c0_i32 = arith.constant 0 : i32
    %c0_i32_0 = arith.constant 0 : i32
    %c0_i32_1 = arith.constant 0 : i32
    return %c0_i32, %c0_i32_0 : i32, i32
  }
  func.func @transform_7(%arg0: i32) -> (i32, i32) {
    %c0_i32 = arith.constant 0 : i32
    %c0_i32_0 = arith.constant 0 : i32
    %c0_i32_1 = arith.constant 0 : i32
    return %c0_i32, %c0_i32_0 : i32, i32
  }
  func.func @transform_8(%arg0: i32) -> (i32, i32) {
    %c0_i32 = arith.constant 0 : i32
    %c0_i32_0 = arith.constant 0 : i32
    return %arg0, %c0_i32 : i32, i32
  }
}

module attributes {stable_mosaic.version = 11 : i64} {
  func.func @kernel(%arg0: i32, %arg1: memref<8x128xbf16, #tpu.memory_space<vmem>>, %arg2: memref<128x128xbf16, #tpu.memory_space<vmem>>, %arg3: memref<8x128xbf16, #tpu.memory_space<vmem>>, %arg4: memref<1x1x128xf32, #tpu.memory_space<vmem>>, %arg5: memref<1x1x128xf32, #tpu.memory_space<vmem>>) attributes {dimension_semantics = [#tpu.dimension_semantics<parallel>], iteration_bounds = array<i64: 1>, scalar_prefetch = 0 : i64, scratch_operands = 0 : i64, tpu.core_type = #tpu.core_type<tc>, window_params = [{transform_indices = @transform_0, window_bounds = array<i64: 8, 128>}, {pipeline_mode = #tpu.pipeline_mode<synchronous>, transform_indices = @transform_1, window_bounds = array<i64: 128, 128>}, {transform_indices = @transform_2, window_bounds = array<i64: 8, 128>}, {transform_indices = @transform_3, window_bounds = array<i64: 1, 1, 128>}, {transform_indices = @transform_4, window_bounds = array<i64: 1, 1, 128>}]} {
    %c0 = arith.constant 0 : index
    %c0_0 = arith.constant 0 : index
    %0 = vector.load %arg1[%c0, %c0_0] : memref<8x128xbf16, #tpu.memory_space<vmem>>, vector<8x128xbf16>
    %c0_1 = arith.constant 0 : index
    %c0_2 = arith.constant 0 : index
    %1 = vector.load %arg2[%c0_1, %c0_2] : memref<128x128xbf16, #tpu.memory_space<vmem>>, vector<128x128xbf16>
    %cst = arith.constant dense<0.000000e+00> : vector<8x128xf32>
    %2 = tpu.matmul %0, %1, %cst {dimension_numbers = #tpu.dot_dimension_numbers<[1], [0], [0], [1], [0, 0, 1, 1], [], []>} : vector<8x128xbf16>, vector<128x128xbf16>, vector<8x128xf32> -> vector<8x128xf32>
    %3 = arith.truncf %2 : vector<8x128xf32> to vector<8x128xbf16>
    %c0_3 = arith.constant 0 : index
    %c0_4 = arith.constant 0 : index
    %4 = vector.load %arg3[%c0_3, %c0_4] : memref<8x128xbf16, #tpu.memory_space<vmem>>, vector<8x128xbf16>
    tpu.vector_store %arg3[%c0_3, %c0_4], %3 {strides = array<i32>} : memref<8x128xbf16, #tpu.memory_space<vmem>>, vector<8x128xbf16>,
    %cst_5 = arith.constant dense<0.000000e+00> : vector<128xf32>
    %5 = vector.multi_reduction <add>, %2, %cst_5 [0] : vector<8x128xf32> to vector<128xf32>
    %6 = vector.shape_cast %5 : vector<128xf32> to vector<1x128xf32>
    %7 = vector.shape_cast %6 : vector<1x128xf32> to vector<1x1x128xf32>
    %c0_6 = arith.constant 0 : index
    %c0_7 = arith.constant 0 : index
    %c0_8 = arith.constant 0 : index
    %8 = vector.load %arg4[%c0_6, %c0_7, %c0_8] : memref<1x1x128xf32, #tpu.memory_space<vmem>>, vector<1x1x128xf32>
    tpu.vector_store %arg4[%c0_6, %c0_7, %c0_8], %7 {strides = array<i32>} : memref<1x1x128xf32, #tpu.memory_space<vmem>>, vector<1x1x128xf32>,
    %9 = arith.mulf %2, %2 : vector<8x128xf32>
    %cst_9 = arith.constant dense<0.000000e+00> : vector<128xf32>
    %10 = vector.multi_reduction <add>, %9, %cst_9 [0] : vector<8x128xf32> to vector<128xf32>
    %11 = vector.shape_cast %10 : vector<128xf32> to vector<1x128xf32>
    %12 = vector.shape_cast %11 : vector<1x128xf32> to vector<1x1x128xf32>
    %c0_10 = arith.constant 0 : index
    %c0_11 = arith.constant 0 : index
    %c0_12 = arith.constant 0 : index
    %13 = vector.load %arg5[%c0_10, %c0_11, %c0_12] : memref<1x1x128xf32, #tpu.memory_space<vmem>>, vector<1x1x128xf32>
    tpu.vector_store %arg5[%c0_10, %c0_11, %c0_12], %12 {strides = array<i32>} : memref<1x1x128xf32, #tpu.memory_space<vmem>>, vector<1x1x128xf32>,
    return
  }
  func.func @transform_0(%arg0: i32) -> (i32, i32) {
    %c0_i32 = arith.constant 0 : i32
    %c0_i32_0 = arith.constant 0 : i32
    return %arg0, %c0_i32 : i32, i32
  }
  func.func @transform_1(%arg0: i32) -> (i32, i32) {
    %c0_i32 = arith.constant 0 : i32
    %c0_i32_0 = arith.constant 0 : i32
    %c0_i32_1 = arith.constant 0 : i32
    return %c0_i32, %c0_i32_0 : i32, i32
  }
  func.func @transform_2(%arg0: i32) -> (i32, i32) {
    %c0_i32 = arith.constant 0 : i32
    %c0_i32_0 = arith.constant 0 : i32
    return %arg0, %c0_i32 : i32, i32
  }
  func.func @transform_3(%arg0: i32) -> (i32, i32, i32) {
    %c0_i32 = arith.constant 0 : i32
    %c0_i32_0 = arith.constant 0 : i32
    %c0_i32_1 = arith.constant 0 : i32
    return %arg0, %c0_i32, %c0_i32_0 : i32, i32, i32
  }
  func.func @transform_4(%arg0: i32) -> (i32, i32, i32) {
    %c0_i32 = arith.constant 0 : i32
    %c0_i32_0 = arith.constant 0 : i32
    %c0_i32_1 = arith.constant 0 : i32
    return %arg0, %c0_i32, %c0_i32_0 : i32, i32, i32
  }
}

module attributes {stable_mosaic.version = 11 : i64} {
  func.func @kernel(%arg0: i32, %arg1: memref<8x1152xbf16, #tpu.memory_space<vmem>>, %arg2: memref<1152x128xbf16, #tpu.memory_space<vmem>>, %arg3: memref<8x128xbf16, #tpu.memory_space<vmem>>, %arg4: memref<1x1x128xf32, #tpu.memory_space<vmem>>, %arg5: memref<1x1x128xf32, #tpu.memory_space<vmem>>) attributes {dimension_semantics = [#tpu.dimension_semantics<parallel>], iteration_bounds = array<i64: 1>, scalar_prefetch = 0 : i64, scratch_operands = 0 : i64, tpu.core_type = #tpu.core_type<tc>, window_params = [{transform_indices = @transform_0, window_bounds = array<i64: 8, 1152>}, {pipeline_mode = #tpu.pipeline_mode<synchronous>, transform_indices = @transform_1, window_bounds = array<i64: 1152, 128>}, {transform_indices = @transform_2, window_bounds = array<i64: 8, 128>}, {transform_indices = @transform_3, window_bounds = array<i64: 1, 1, 128>}, {transform_indices = @transform_4, window_bounds = array<i64: 1, 1, 128>}]} {
    %c0 = arith.constant 0 : index
    %c0_0 = arith.constant 0 : index
    %0 = vector.load %arg1[%c0, %c0_0] : memref<8x1152xbf16, #tpu.memory_space<vmem>>, vector<8x1152xbf16>
    %c0_1 = arith.constant 0 : index
    %c0_2 = arith.constant 0 : index
    %1 = vector.load %arg2[%c0_1, %c0_2] : memref<1152x128xbf16, #tpu.memory_space<vmem>>, vector<1152x128xbf16>
    %cst = arith.constant dense<0.000000e+00> : vector<8x128xf32>
    %2 = tpu.matmul %0, %1, %cst {dimension_numbers = #tpu.dot_dimension_numbers<[1], [0], [0], [1], [0, 0, 1, 1], [], []>} : vector<8x1152xbf16>, vector<1152x128xbf16>, vector<8x128xf32> -> vector<8x128xf32>
    %3 = arith.truncf %2 : vector<8x128xf32> to vector<8x128xbf16>
    %c0_3 = arith.constant 0 : index
    %c0_4 = arith.constant 0 : index
    %4 = vector.load %arg3[%c0_3, %c0_4] : memref<8x128xbf16, #tpu.memory_space<vmem>>, vector<8x128xbf16>
    tpu.vector_store %arg3[%c0_3, %c0_4], %3 {strides = array<i32>} : memref<8x128xbf16, #tpu.memory_space<vmem>>, vector<8x128xbf16>,
    %cst_5 = arith.constant dense<0.000000e+00> : vector<128xf32>
    %5 = vector.multi_reduction <add>, %2, %cst_5 [0] : vector<8x128xf32> to vector<128xf32>
    %6 = vector.shape_cast %5 : vector<128xf32> to vector<1x128xf32>
    %7 = vector.shape_cast %6 : vector<1x128xf32> to vector<1x1x128xf32>
    %c0_6 = arith.constant 0 : index
    %c0_7 = arith.constant 0 : index
    %c0_8 = arith.constant 0 : index
    %8 = vector.load %arg4[%c0_6, %c0_7, %c0_8] : memref<1x1x128xf32, #tpu.memory_space<vmem>>, vector<1x1x128xf32>
    tpu.vector_store %arg4[%c0_6, %c0_7, %c0_8], %7 {strides = array<i32>} : memref<1x1x128xf32, #tpu.memory_space<vmem>>, vector<1x1x128xf32>,
    %9 = arith.mulf %2, %2 : vector<8x128xf32>
    %cst_9 = arith.constant dense<0.000000e+00> : vector<128xf32>
    %10 = vector.multi_reduction <add>, %9, %cst_9 [0] : vector<8x128xf32> to vector<128xf32>
    %11 = vector.shape_cast %10 : vector<128xf32> to vector<1x128xf32>
    %12 = vector.shape_cast %11 : vector<1x128xf32> to vector<1x1x128xf32>
    %c0_10 = arith.constant 0 : index
    %c0_11 = arith.constant 0 : index
    %c0_12 = arith.constant 0 : index
    %13 = vector.load %arg5[%c0_10, %c0_11, %c0_12] : memref<1x1x128xf32, #tpu.memory_space<vmem>>, vector<1x1x128xf32>
    tpu.vector_store %arg5[%c0_10, %c0_11, %c0_12], %12 {strides = array<i32>} : memref<1x1x128xf32, #tpu.memory_space<vmem>>, vector<1x1x128xf32>,
    return
  }
  func.func @transform_0(%arg0: i32) -> (i32, i32) {
    %c0_i32 = arith.constant 0 : i32
    %c0_i32_0 = arith.constant 0 : i32
    return %arg0, %c0_i32 : i32, i32
  }
  func.func @transform_1(%arg0: i32) -> (i32, i32) {
    %c0_i32 = arith.constant 0 : i32
    %c0_i32_0 = arith.constant 0 : i32
    %c0_i32_1 = arith.constant 0 : i32
    return %c0_i32, %c0_i32_0 : i32, i32
  }
  func.func @transform_2(%arg0: i32) -> (i32, i32) {
    %c0_i32 = arith.constant 0 : i32
    %c0_i32_0 = arith.constant 0 : i32
    return %arg0, %c0_i32 : i32, i32
  }
  func.func @transform_3(%arg0: i32) -> (i32, i32, i32) {
    %c0_i32 = arith.constant 0 : i32
    %c0_i32_0 = arith.constant 0 : i32
    %c0_i32_1 = arith.constant 0 : i32
    return %arg0, %c0_i32, %c0_i32_0 : i32, i32, i32
  }
  func.func @transform_4(%arg0: i32) -> (i32, i32, i32) {
    %c0_i32 = arith.constant 0 : i32
    %c0_i32_0 = arith.constant 0 : i32
    %c0_i32_1 = arith.constant 0 : i32
    return %arg0, %c0_i32, %c0_i32_0 : i32, i32, i32
  }
}

module attributes {stable_mosaic.version = 11 : i64} {
  func.func @kernel(%arg0: i32, %arg1: memref<8x128xbf16, #tpu.memory_space<vmem>>, %arg2: memref<1x1x128xf32, #tpu.memory_space<vmem>>, %arg3: memref<1x1x128xf32, #tpu.memory_space<vmem>>, %arg4: memref<2x128xf32, #tpu.memory_space<vmem>>, %arg5: memref<8x128xbf16, #tpu.memory_space<vmem>>) attributes {dimension_semantics = [#tpu.dimension_semantics<parallel>], iteration_bounds = array<i64: 1>, scalar_prefetch = 0 : i64, scratch_operands = 0 : i64, tpu.core_type = #tpu.core_type<tc>, window_params = [{transform_indices = @transform_0, window_bounds = array<i64: 8, 128>}, {pipeline_mode = #tpu.pipeline_mode<synchronous>, transform_indices = @transform_1, window_bounds = array<i64: 1, 1, 128>}, {pipeline_mode = #tpu.pipeline_mode<synchronous>, transform_indices = @transform_2, window_bounds = array<i64: 1, 1, 128>}, {pipeline_mode = #tpu.pipeline_mode<synchronous>, transform_indices = @transform_3, window_bounds = array<i64: 2, 128>}, {transform_indices = @transform_4, window_bounds = array<i64: 8, 128>}]} {
    %c0 = arith.constant 0 : index
    %c0_0 = arith.constant 0 : index
    %c0_1 = arith.constant 0 : index
    %0 = vector.load %arg2[%c0, %c0_0, %c0_1] : memref<1x1x128xf32, #tpu.memory_space<vmem>>, vector<1x1x128xf32>
    %cst = arith.constant dense<0.000000e+00> : vector<1x128xf32>
    %1 = vector.multi_reduction <add>, %0, %cst [0] : vector<1x1x128xf32> to vector<1x128xf32>
    %cst_2 = arith.constant 1.250000e-01 : f32
    %2 = vector.broadcast %cst_2 : f32 to vector<1x128xf32>
    %3 = arith.mulf %1, %2 : vector<1x128xf32>
    %c0_3 = arith.constant 0 : index
    %c0_4 = arith.constant 0 : index
    %c0_5 = arith.constant 0 : index
    %4 = vector.load %arg3[%c0_3, %c0_4, %c0_5] : memref<1x1x128xf32, #tpu.memory_space<vmem>>, vector<1x1x128xf32>
    %cst_6 = arith.constant dense<0.000000e+00> : vector<1x128xf32>
    %5 = vector.multi_reduction <add>, %4, %cst_6 [0] : vector<1x1x128xf32> to vector<1x128xf32>
    %cst_7 = arith.constant 1.250000e-01 : f32
    %6 = vector.broadcast %cst_7 : f32 to vector<1x128xf32>
    %7 = arith.mulf %5, %6 : vector<1x128xf32>
    %8 = arith.mulf %3, %3 : vector<1x128xf32>
    %9 = arith.subf %7, %8 : vector<1x128xf32>
    %cst_8 = arith.constant 0.000000e+00 : f32
    %10 = vector.broadcast %cst_8 : f32 to vector<1x128xf32>
    %11 = arith.maximumf %9, %10 : vector<1x128xf32>
    %c0_9 = arith.constant 0 : index
    %c0_10 = arith.constant 0 : index
    %12 = vector.load %arg4[%c0_9, %c0_10] : memref<2x128xf32, #tpu.memory_space<vmem>>, vector<1x128xf32>
    %cst_11 = arith.constant 9.99999974E-6 : f32
    %13 = vector.broadcast %cst_11 : f32 to vector<1x128xf32>
    %14 = arith.addf %11, %13 : vector<1x128xf32>
    %15 = math.rsqrt %14 : vector<1x128xf32>
    %16 = arith.mulf %12, %15 : vector<1x128xf32>
    %c1 = arith.constant 1 : index
    %c0_12 = arith.constant 0 : index
    %17 = vector.load %arg4[%c1, %c0_12] : memref<2x128xf32, #tpu.memory_space<vmem>>, vector<1x128xf32>
    %18 = arith.mulf %3, %16 : vector<1x128xf32>
    %19 = arith.subf %17, %18 : vector<1x128xf32>
    %c0_13 = arith.constant 0 : index
    %c0_14 = arith.constant 0 : index
    %20 = vector.load %arg1[%c0_13, %c0_14] : memref<8x128xbf16, #tpu.memory_space<vmem>>, vector<8x128xbf16>
    %21 = arith.extf %20 : vector<8x128xbf16> to vector<8x128xf32>
    %22 = vector.broadcast %16 : vector<1x128xf32> to vector<8x128xf32>
    %23 = arith.mulf %21, %22 : vector<8x128xf32>
    %24 = vector.broadcast %19 : vector<1x128xf32> to vector<8x128xf32>
    %25 = arith.addf %23, %24 : vector<8x128xf32>
    %cst_15 = arith.constant 0.000000e+00 : f32
    %26 = vector.broadcast %cst_15 : f32 to vector<8x128xf32>
    %27 = arith.maximumf %25, %26 : vector<8x128xf32>
    %28 = arith.truncf %27 : vector<8x128xf32> to vector<8x128xbf16>
    %c0_16 = arith.constant 0 : index
    %c0_17 = arith.constant 0 : index
    %29 = vector.load %arg5[%c0_16, %c0_17] : memref<8x128xbf16, #tpu.memory_space<vmem>>, vector<8x128xbf16>
    tpu.vector_store %arg5[%c0_16, %c0_17], %28 {strides = array<i32>} : memref<8x128xbf16, #tpu.memory_space<vmem>>, vector<8x128xbf16>,
    return
  }
  func.func @transform_0(%arg0: i32) -> (i32, i32) {
    %c0_i32 = arith.constant 0 : i32
    %c0_i32_0 = arith.constant 0 : i32
    return %arg0, %c0_i32 : i32, i32
  }
  func.func @transform_1(%arg0: i32) -> (i32, i32, i32) {
    %c0_i32 = arith.constant 0 : i32
    %c0_i32_0 = arith.constant 0 : i32
    %c0_i32_1 = arith.constant 0 : i32
    %c0_i32_2 = arith.constant 0 : i32
    return %c0_i32, %c0_i32_0, %c0_i32_1 : i32, i32, i32
  }
  func.func @transform_2(%arg0: i32) -> (i32, i32, i32) {
    %c0_i32 = arith.constant 0 : i32
    %c0_i32_0 = arith.constant 0 : i32
    %c0_i32_1 = arith.constant 0 : i32
    %c0_i32_2 = arith.constant 0 : i32
    return %c0_i32, %c0_i32_0, %c0_i32_1 : i32, i32, i32
  }
  func.func @transform_3(%arg0: i32) -> (i32, i32) {
    %c0_i32 = arith.constant 0 : i32
    %c0_i32_0 = arith.constant 0 : i32
    %c0_i32_1 = arith.constant 0 : i32
    return %c0_i32, %c0_i32_0 : i32, i32
  }
  func.func @transform_4(%arg0: i32) -> (i32, i32) {
    %c0_i32 = arith.constant 0 : i32
    %c0_i32_0 = arith.constant 0 : i32
    return %arg0, %c0_i32 : i32, i32
  }
}

module attributes {stable_mosaic.version = 11 : i64} {
  func.func @kernel(%arg0: i32, %arg1: memref<8x256xbf16, #tpu.memory_space<vmem>>, %arg2: memref<256x128xbf16, #tpu.memory_space<vmem>>, %arg3: memref<8x128xbf16, #tpu.memory_space<vmem>>, %arg4: memref<1x1x128xf32, #tpu.memory_space<vmem>>, %arg5: memref<1x1x128xf32, #tpu.memory_space<vmem>>) attributes {dimension_semantics = [#tpu.dimension_semantics<parallel>], iteration_bounds = array<i64: 1>, scalar_prefetch = 0 : i64, scratch_operands = 0 : i64, tpu.core_type = #tpu.core_type<tc>, window_params = [{transform_indices = @transform_0, window_bounds = array<i64: 8, 256>}, {pipeline_mode = #tpu.pipeline_mode<synchronous>, transform_indices = @transform_1, window_bounds = array<i64: 256, 128>}, {transform_indices = @transform_2, window_bounds = array<i64: 8, 128>}, {transform_indices = @transform_3, window_bounds = array<i64: 1, 1, 128>}, {transform_indices = @transform_4, window_bounds = array<i64: 1, 1, 128>}]} {
    %c0 = arith.constant 0 : index
    %c0_0 = arith.constant 0 : index
    %0 = vector.load %arg1[%c0, %c0_0] : memref<8x256xbf16, #tpu.memory_space<vmem>>, vector<8x256xbf16>
    %c0_1 = arith.constant 0 : index
    %c0_2 = arith.constant 0 : index
    %1 = vector.load %arg2[%c0_1, %c0_2] : memref<256x128xbf16, #tpu.memory_space<vmem>>, vector<256x128xbf16>
    %cst = arith.constant dense<0.000000e+00> : vector<8x128xf32>
    %2 = tpu.matmul %0, %1, %cst {dimension_numbers = #tpu.dot_dimension_numbers<[1], [0], [0], [1], [0, 0, 1, 1], [], []>} : vector<8x256xbf16>, vector<256x128xbf16>, vector<8x128xf32> -> vector<8x128xf32>
    %3 = arith.truncf %2 : vector<8x128xf32> to vector<8x128xbf16>
    %c0_3 = arith.constant 0 : index
    %c0_4 = arith.constant 0 : index
    %4 = vector.load %arg3[%c0_3, %c0_4] : memref<8x128xbf16, #tpu.memory_space<vmem>>, vector<8x128xbf16>
    tpu.vector_store %arg3[%c0_3, %c0_4], %3 {strides = array<i32>} : memref<8x128xbf16, #tpu.memory_space<vmem>>, vector<8x128xbf16>,
    %cst_5 = arith.constant dense<0.000000e+00> : vector<128xf32>
    %5 = vector.multi_reduction <add>, %2, %cst_5 [0] : vector<8x128xf32> to vector<128xf32>
    %6 = vector.shape_cast %5 : vector<128xf32> to vector<1x128xf32>
    %7 = vector.shape_cast %6 : vector<1x128xf32> to vector<1x1x128xf32>
    %c0_6 = arith.constant 0 : index
    %c0_7 = arith.constant 0 : index
    %c0_8 = arith.constant 0 : index
    %8 = vector.load %arg4[%c0_6, %c0_7, %c0_8] : memref<1x1x128xf32, #tpu.memory_space<vmem>>, vector<1x1x128xf32>
    tpu.vector_store %arg4[%c0_6, %c0_7, %c0_8], %7 {strides = array<i32>} : memref<1x1x128xf32, #tpu.memory_space<vmem>>, vector<1x1x128xf32>,
    %9 = arith.mulf %2, %2 : vector<8x128xf32>
    %cst_9 = arith.constant dense<0.000000e+00> : vector<128xf32>
    %10 = vector.multi_reduction <add>, %9, %cst_9 [0] : vector<8x128xf32> to vector<128xf32>
    %11 = vector.shape_cast %10 : vector<128xf32> to vector<1x128xf32>
    %12 = vector.shape_cast %11 : vector<1x128xf32> to vector<1x1x128xf32>
    %c0_10 = arith.constant 0 : index
    %c0_11 = arith.constant 0 : index
    %c0_12 = arith.constant 0 : index
    %13 = vector.load %arg5[%c0_10, %c0_11, %c0_12] : memref<1x1x128xf32, #tpu.memory_space<vmem>>, vector<1x1x128xf32>
    tpu.vector_store %arg5[%c0_10, %c0_11, %c0_12], %12 {strides = array<i32>} : memref<1x1x128xf32, #tpu.memory_space<vmem>>, vector<1x1x128xf32>,
    return
  }
  func.func @transform_0(%arg0: i32) -> (i32, i32) {
    %c0_i32 = arith.constant 0 : i32
    %c0_i32_0 = arith.constant 0 : i32
    return %arg0, %c0_i32 : i32, i32
  }
  func.func @transform_1(%arg0: i32) -> (i32, i32) {
    %c0_i32 = arith.constant 0 : i32
    %c0_i32_0 = arith.constant 0 : i32
    %c0_i32_1 = arith.constant 0 : i32
    return %c0_i32, %c0_i32_0 : i32, i32
  }
  func.func @transform_2(%arg0: i32) -> (i32, i32) {
    %c0_i32 = arith.constant 0 : i32
    %c0_i32_0 = arith.constant 0 : i32
    return %arg0, %c0_i32 : i32, i32
  }
  func.func @transform_3(%arg0: i32) -> (i32, i32, i32) {
    %c0_i32 = arith.constant 0 : i32
    %c0_i32_0 = arith.constant 0 : i32
    %c0_i32_1 = arith.constant 0 : i32
    return %arg0, %c0_i32, %c0_i32_0 : i32, i32, i32
  }
  func.func @transform_4(%arg0: i32) -> (i32, i32, i32) {
    %c0_i32 = arith.constant 0 : i32
    %c0_i32_0 = arith.constant 0 : i32
    %c0_i32_1 = arith.constant 0 : i32
    return %arg0, %c0_i32, %c0_i32_0 : i32, i32, i32
  }
}

module attributes {stable_mosaic.version = 11 : i64} {
  func.func @kernel(%arg0: i32, %arg1: memref<8x128xbf16, #tpu.memory_space<vmem>>, %arg2: memref<8x128xbf16, #tpu.memory_space<vmem>>, %arg3: memref<1x1x128xf32, #tpu.memory_space<vmem>>, %arg4: memref<1x1x128xf32, #tpu.memory_space<vmem>>, %arg5: memref<1x1x128xf32, #tpu.memory_space<vmem>>, %arg6: memref<1x1x128xf32, #tpu.memory_space<vmem>>, %arg7: memref<2x128xf32, #tpu.memory_space<vmem>>, %arg8: memref<2x128xf32, #tpu.memory_space<vmem>>, %arg9: memref<8x128xbf16, #tpu.memory_space<vmem>>) attributes {dimension_semantics = [#tpu.dimension_semantics<parallel>], iteration_bounds = array<i64: 1>, scalar_prefetch = 0 : i64, scratch_operands = 0 : i64, tpu.core_type = #tpu.core_type<tc>, window_params = [{transform_indices = @transform_0, window_bounds = array<i64: 8, 128>}, {transform_indices = @transform_1, window_bounds = array<i64: 8, 128>}, {pipeline_mode = #tpu.pipeline_mode<synchronous>, transform_indices = @transform_2, window_bounds = array<i64: 1, 1, 128>}, {pipeline_mode = #tpu.pipeline_mode<synchronous>, transform_indices = @transform_3, window_bounds = array<i64: 1, 1, 128>}, {pipeline_mode = #tpu.pipeline_mode<synchronous>, transform_indices = @transform_4, window_bounds = array<i64: 1, 1, 128>}, {pipeline_mode = #tpu.pipeline_mode<synchronous>, transform_indices = @transform_5, window_bounds = array<i64: 1, 1, 128>}, {pipeline_mode = #tpu.pipeline_mode<synchronous>, transform_indices = @transform_6, window_bounds = array<i64: 2, 128>}, {pipeline_mode = #tpu.pipeline_mode<synchronous>, transform_indices = @transform_7, window_bounds = array<i64: 2, 128>}, {transform_indices = @transform_8, window_bounds = array<i64: 8, 128>}]} {
    %c0 = arith.constant 0 : index
    %c0_0 = arith.constant 0 : index
    %c0_1 = arith.constant 0 : index
    %0 = vector.load %arg3[%c0, %c0_0, %c0_1] : memref<1x1x128xf32, #tpu.memory_space<vmem>>, vector<1x1x128xf32>
    %cst = arith.constant dense<0.000000e+00> : vector<1x128xf32>
    %1 = vector.multi_reduction <add>, %0, %cst [0] : vector<1x1x128xf32> to vector<1x128xf32>
    %cst_2 = arith.constant 1.250000e-01 : f32
    %2 = vector.broadcast %cst_2 : f32 to vector<1x128xf32>
    %3 = arith.mulf %1, %2 : vector<1x128xf32>
    %c0_3 = arith.constant 0 : index
    %c0_4 = arith.constant 0 : index
    %c0_5 = arith.constant 0 : index
    %4 = vector.load %arg4[%c0_3, %c0_4, %c0_5] : memref<1x1x128xf32, #tpu.memory_space<vmem>>, vector<1x1x128xf32>
    %cst_6 = arith.constant dense<0.000000e+00> : vector<1x128xf32>
    %5 = vector.multi_reduction <add>, %4, %cst_6 [0] : vector<1x1x128xf32> to vector<1x128xf32>
    %cst_7 = arith.constant 1.250000e-01 : f32
    %6 = vector.broadcast %cst_7 : f32 to vector<1x128xf32>
    %7 = arith.mulf %5, %6 : vector<1x128xf32>
    %8 = arith.mulf %3, %3 : vector<1x128xf32>
    %9 = arith.subf %7, %8 : vector<1x128xf32>
    %cst_8 = arith.constant 0.000000e+00 : f32
    %10 = vector.broadcast %cst_8 : f32 to vector<1x128xf32>
    %11 = arith.maximumf %9, %10 : vector<1x128xf32>
    %c0_9 = arith.constant 0 : index
    %c0_10 = arith.constant 0 : index
    %12 = vector.load %arg7[%c0_9, %c0_10] : memref<2x128xf32, #tpu.memory_space<vmem>>, vector<1x128xf32>
    %cst_11 = arith.constant 9.99999974E-6 : f32
    %13 = vector.broadcast %cst_11 : f32 to vector<1x128xf32>
    %14 = arith.addf %11, %13 : vector<1x128xf32>
    %15 = math.rsqrt %14 : vector<1x128xf32>
    %16 = arith.mulf %12, %15 : vector<1x128xf32>
    %c1 = arith.constant 1 : index
    %c0_12 = arith.constant 0 : index
    %17 = vector.load %arg7[%c1, %c0_12] : memref<2x128xf32, #tpu.memory_space<vmem>>, vector<1x128xf32>
    %18 = arith.mulf %3, %16 : vector<1x128xf32>
    %19 = arith.subf %17, %18 : vector<1x128xf32>
    %c0_13 = arith.constant 0 : index
    %c0_14 = arith.constant 0 : index
    %c0_15 = arith.constant 0 : index
    %20 = vector.load %arg5[%c0_13, %c0_14, %c0_15] : memref<1x1x128xf32, #tpu.memory_space<vmem>>, vector<1x1x128xf32>
    %cst_16 = arith.constant dense<0.000000e+00> : vector<1x128xf32>
    %21 = vector.multi_reduction <add>, %20, %cst_16 [0] : vector<1x1x128xf32> to vector<1x128xf32>
    %cst_17 = arith.constant 1.250000e-01 : f32
    %22 = vector.broadcast %cst_17 : f32 to vector<1x128xf32>
    %23 = arith.mulf %21, %22 : vector<1x128xf32>
    %c0_18 = arith.constant 0 : index
    %c0_19 = arith.constant 0 : index
    %c0_20 = arith.constant 0 : index
    %24 = vector.load %arg6[%c0_18, %c0_19, %c0_20] : memref<1x1x128xf32, #tpu.memory_space<vmem>>, vector<1x1x128xf32>
    %cst_21 = arith.constant dense<0.000000e+00> : vector<1x128xf32>
    %25 = vector.multi_reduction <add>, %24, %cst_21 [0] : vector<1x1x128xf32> to vector<1x128xf32>
    %cst_22 = arith.constant 1.250000e-01 : f32
    %26 = vector.broadcast %cst_22 : f32 to vector<1x128xf32>
    %27 = arith.mulf %25, %26 : vector<1x128xf32>
    %28 = arith.mulf %23, %23 : vector<1x128xf32>
    %29 = arith.subf %27, %28 : vector<1x128xf32>
    %cst_23 = arith.constant 0.000000e+00 : f32
    %30 = vector.broadcast %cst_23 : f32 to vector<1x128xf32>
    %31 = arith.maximumf %29, %30 : vector<1x128xf32>
    %c0_24 = arith.constant 0 : index
    %c0_25 = arith.constant 0 : index
    %32 = vector.load %arg8[%c0_24, %c0_25] : memref<2x128xf32, #tpu.memory_space<vmem>>, vector<1x128xf32>
    %cst_26 = arith.constant 9.99999974E-6 : f32
    %33 = vector.broadcast %cst_26 : f32 to vector<1x128xf32>
    %34 = arith.addf %31, %33 : vector<1x128xf32>
    %35 = math.rsqrt %34 : vector<1x128xf32>
    %36 = arith.mulf %32, %35 : vector<1x128xf32>
    %c1_27 = arith.constant 1 : index
    %c0_28 = arith.constant 0 : index
    %37 = vector.load %arg8[%c1_27, %c0_28] : memref<2x128xf32, #tpu.memory_space<vmem>>, vector<1x128xf32>
    %38 = arith.mulf %23, %36 : vector<1x128xf32>
    %39 = arith.subf %37, %38 : vector<1x128xf32>
    %40 = arith.addf %19, %39 : vector<1x128xf32>
    %c0_29 = arith.constant 0 : index
    %c0_30 = arith.constant 0 : index
    %41 = vector.load %arg1[%c0_29, %c0_30] : memref<8x128xbf16, #tpu.memory_space<vmem>>, vector<8x128xbf16>
    %42 = arith.extf %41 : vector<8x128xbf16> to vector<8x128xf32>
    %43 = vector.broadcast %16 : vector<1x128xf32> to vector<8x128xf32>
    %44 = arith.mulf %42, %43 : vector<8x128xf32>
    %c0_31 = arith.constant 0 : index
    %c0_32 = arith.constant 0 : index
    %45 = vector.load %arg2[%c0_31, %c0_32] : memref<8x128xbf16, #tpu.memory_space<vmem>>, vector<8x128xbf16>
    %46 = arith.extf %45 : vector<8x128xbf16> to vector<8x128xf32>
    %47 = vector.broadcast %36 : vector<1x128xf32> to vector<8x128xf32>
    %48 = arith.mulf %46, %47 : vector<8x128xf32>
    %49 = arith.addf %44, %48 : vector<8x128xf32>
    %50 = vector.broadcast %40 : vector<1x128xf32> to vector<8x128xf32>
    %51 = arith.addf %49, %50 : vector<8x128xf32>
    %cst_33 = arith.constant 0.000000e+00 : f32
    %52 = vector.broadcast %cst_33 : f32 to vector<8x128xf32>
    %53 = arith.maximumf %51, %52 : vector<8x128xf32>
    %54 = arith.truncf %53 : vector<8x128xf32> to vector<8x128xbf16>
    %c0_34 = arith.constant 0 : index
    %c0_35 = arith.constant 0 : index
    %55 = vector.load %arg9[%c0_34, %c0_35] : memref<8x128xbf16, #tpu.memory_space<vmem>>, vector<8x128xbf16>
    tpu.vector_store %arg9[%c0_34, %c0_35], %54 {strides = array<i32>} : memref<8x128xbf16, #tpu.memory_space<vmem>>, vector<8x128xbf16>,
    return
  }
  func.func @transform_0(%arg0: i32) -> (i32, i32) {
    %c0_i32 = arith.constant 0 : i32
    %c0_i32_0 = arith.constant 0 : i32
    return %arg0, %c0_i32 : i32, i32
  }
  func.func @transform_1(%arg0: i32) -> (i32, i32) {
    %c0_i32 = arith.constant 0 : i32
    %c0_i32_0 = arith.constant 0 : i32
    return %arg0, %c0_i32 : i32, i32
  }
  func.func @transform_2(%arg0: i32) -> (i32, i32, i32) {
    %c0_i32 = arith.constant 0 : i32
    %c0_i32_0 = arith.constant 0 : i32
    %c0_i32_1 = arith.constant 0 : i32
    %c0_i32_2 = arith.constant 0 : i32
    return %c0_i32, %c0_i32_0, %c0_i32_1 : i32, i32, i32
  }
  func.func @transform_3(%arg0: i32) -> (i32, i32, i32) {
    %c0_i32 = arith.constant 0 : i32
    %c0_i32_0 = arith.constant 0 : i32
    %c0_i32_1 = arith.constant 0 : i32
    %c0_i32_2 = arith.constant 0 : i32
    return %c0_i32, %c0_i32_0, %c0_i32_1 : i32, i32, i32
  }
  func.func @transform_4(%arg0: i32) -> (i32, i32, i32) {
    %c0_i32 = arith.constant 0 : i32
    %c0_i32_0 = arith.constant 0 : i32
    %c0_i32_1 = arith.constant 0 : i32
    %c0_i32_2 = arith.constant 0 : i32
    return %c0_i32, %c0_i32_0, %c0_i32_1 : i32, i32, i32
  }
  func.func @transform_5(%arg0: i32) -> (i32, i32, i32) {
    %c0_i32 = arith.constant 0 : i32
    %c0_i32_0 = arith.constant 0 : i32
    %c0_i32_1 = arith.constant 0 : i32
    %c0_i32_2 = arith.constant 0 : i32
    return %c0_i32, %c0_i32_0, %c0_i32_1 : i32, i32, i32
  }
  func.func @transform_6(%arg0: i32) -> (i32, i32) {
    %c0_i32 = arith.constant 0 : i32
    %c0_i32_0 = arith.constant 0 : i32
    %c0_i32_1 = arith.constant 0 : i32
    return %c0_i32, %c0_i32_0 : i32, i32
  }
  func.func @transform_7(%arg0: i32) -> (i32, i32) {
    %c0_i32 = arith.constant 0 : i32
    %c0_i32_0 = arith.constant 0 : i32
    %c0_i32_1 = arith.constant 0 : i32
    return %c0_i32, %c0_i32_0 : i32, i32
  }
  func.func @transform_8(%arg0: i32) -> (i32, i32) {
    %c0_i32 = arith.constant 0 : i32
    %c0_i32_0 = arith.constant 0 : i32
    return %arg0, %c0_i32 : i32, i32
  }
}

</mosaic_0001>

<bundles_post_ra>
// kernel: _lambda_.44
= control target key start
LH: loop header
LB: loop body
LE: loop exit
PB: predicated region body
PF: predicated region fallthrough
CT: control target
= control target key end

     0   :  { %s900_s15 = smov 0   ;;  %s1129_s0 = inlined_call_operand.vmem [shape: bf16[512,128], index: 0, kind: input, shape index: {}]   ;;  %s1130_s1 = inlined_call_operand.vmem [shape: f32[2,1,128], index: 1, kind: input, shape index: {}]   ;;  %s1131_s2 = inlined_call_operand.vmem [shape: f32[2,1,128], index: 2, kind: input, shape index: {}]   ;;  %s1132_s3 = inlined_call_operand.vmem [shape: f32[2,128], index: 3, kind: input, shape index: {}]   ;;  %s1133_s4 = inlined_call_operand.vmem [shape: bf16[512,128], index: 4, kind: output, shape index: {}]  }
   0x1 LB: > { %s608_s16 = sadd.s32 4294967295, %s873_s15   ;;  %p612_p0 = scmp.ge.s32.totalorder %s873_s15, 1  ;;  %s873_s15 = sphi %s900_s15, %s14_s15  }
   0x2   : > { %p163_p1 = scmp.lt.s32.totalorder %s873_s15, 3 }
   0x4   : > { %p164_p2 = pnand %p612_p0, %p163_p1 }
   0x5   : > { %s613_s17 = sshll.u32 (!%p164_p2), %s608_s16, 5  ;;  %v201_v0 = vld [vmem:[%s1130_s1] sm:$0x1] (!%p164_p2)  ;;  %v202_v1 = vld [vmem:[%s1130_s1 + $0x1] sm:$0x1] (!%p164_p2)  ;;  %vm203_vm0 = vcmask (!%p164_p2), 1040384   ;;  %v288_v16 = vlaneseq (!%p164_p2) }
   0x6   : > { %167 = sbr.rel (%p164_p2) target bundleno = 68 (0x44), region = 36  ;;  %v204_v2 = vsel (!%p164_p2), %vm203_vm0, %v201_v0, 0.0  ;;  %v205_v3 = vsel (!%p164_p2), %vm203_vm0, %v202_v1, 0.0  ;;  %v208_v4 = vld [vmem:[%s1131_s2] sm:$0x1] (!%p164_p2)  ;;  %p190_p3 = scmp.lt.s32.totalorder (!%p164_p2), %s613_s17, 63 }
   0x7   : > { %v206_v5 = vadd.f32 (!%p164_p2), %v205_v3, %v204_v2  ;;  %v209_v6 = vld [vmem:[%s1131_s2 + $0x1] sm:$0x1] (!%p164_p2)  ;;  %v210_v7 = vsel (!%p164_p2), %vm203_vm0, %v208_v4, 0.0  ;;  %v930_v17 = vshrl.u32 (!%p164_p2), %v288_v16, 7  ;;  %v217_v36 = vld [vmem:[%s1132_s3] sm:$0x1] (!%p164_p2) }
   0x8   : > { %v211_v8 = vsel (!%p164_p2), %vm203_vm0, %v209_v6, 0.0  ;;  %v221_v60 = vld [vmem:[%s1132_s3 + $0x1] sm:$0x1] (!%p164_p2) }
   0x9   : > { %v207_v9 = vmul.f32 (!%p164_p2), 0.001953125, %v206_v5  ;;  %v212_v10 = vadd.f32 (!%p164_p2), %v211_v8, %v210_v7  ;;  %v290_v26 = vsub.s32 (!%p164_p2), 0, %v930_v17 }
   0xb   : > { %v213_v11 = vmul.f32 (!%p164_p2), 0.001953125, %v212_v10  ;;  %v214_v12 = vmul.f32 (!%p164_p2), %v207_v9, %v207_v9 }
   0xd   : > { %s1135_s17 = smov (!%p190_p3, %s613_s17), 63  ;;  %v215_v13 = vsub.f32 %v213_v11, %v214_v12 }
   0xe   : > { %s614_s26 = sshll.u32 %s1135_s17, 2 }
   0xf   : > { %v216_v14 = vmax.f32 %v215_v13, 0.0  ;;  %s928_s29 = scalar_lea.vmem %s1129_s0, %s614_s26  ;;  %s1030_s10 = scalar_lea.vmem %s1133_s4, %s614_s26 }
  0x10   : > { %v684_v18 = vld [vmem:[%s928_s29] sm:$0xff]   ;;  %v827_v19 = vld [vmem:[%s928_s29 + $0x8] sm:$0xff]   ;;  %v828_v20 = vld [vmem:[%s928_s29 + $0x10] sm:$0xff]  }
  0x11   : > { %v218_v15 = vadd.f32 1e-05, %v216_v14  ;;  %v829_v21 = vld [vmem:[%s928_s29 + $0x18] sm:$0xff]   ;;  %v937_v22 = vld [vmem:[%s928_s29 + $0x20] sm:$0xff]   ;;  %v940_v23 = vld [vmem:[%s928_s29 + $0x28] sm:$0xff]   ;;  %v685_v24 = vunpack.c.l.bf16 %v684_v18  ;;  %v686_v25 = vunpack.c.h.bf16 %v684_v18  ;;  %v689_v27 = vunpack.c.l.bf16 %v827_v19 }
  0x12   : > { %v832_v28 = vld [vmem:[%s928_s29 + $0x30] sm:$0xff]   ;;  %v945_v29 = vld [vmem:[%s928_s29 + $0x38] sm:$0xff]   ;;  %v690_v30 = vunpack.c.h.bf16 %v827_v19  ;;  %v693_v31 = vunpack.c.l.bf16 %v828_v20  ;;  %v694_v32 = vunpack.c.h.bf16 %v828_v20  ;;  %v697_v33 = vunpack.c.l.bf16 %v829_v21  ;;  %v948_v34 = vld [vmem:[%s928_s29 + $0x40] sm:$0xff]  }
  0x13   : > { %865 = vrsqrt.f32 %v218_v15  ;;  %v951_v35 = vld [vmem:[%s928_s29 + $0x48] sm:$0xff]   ;;  %v698_v37 = vunpack.c.h.bf16 %v829_v21  ;;  %v701_v38 = vunpack.c.l.bf16 %v937_v22  ;;  %v702_v39 = vunpack.c.h.bf16 %v937_v22  ;;  %v960_v41 = vld [vmem:[%s928_s29 + $0x50] sm:$0xff]   ;;  %v965_v46 = vld [vmem:[%s928_s29 + $0x58] sm:$0xff]  }
  0x14   : > { %v705_v40 = vunpack.c.l.bf16 %v940_v23  ;;  %v706_v42 = vunpack.c.h.bf16 %v940_v23  ;;  %v709_v43 = vunpack.c.l.bf16 %v832_v28  ;;  %v710_v44 = vunpack.c.h.bf16 %v832_v28  ;;  %v968_v47 = vld [vmem:[%s928_s29 + $0x60] sm:$0xff]   ;;  %v975_v53 = vld [vmem:[%s928_s29 + $0x68] sm:$0xff]   ;;  %v981_v58 = vld [vmem:[%s928_s29 + $0x70] sm:$0xff]  }
  0x15   : > { %v713_v45 = vunpack.c.l.bf16 %v945_v29  ;;  %v714_v49 = vunpack.c.h.bf16 %v945_v29  ;;  %v717_v50 = vunpack.c.l.bf16 %v948_v34  ;;  %v718_v51 = vunpack.c.h.bf16 %v948_v34  ;;  %v984_v59 = vld [vmem:[%s928_s29 + $0x78] sm:$0xff]  }
  0x16   : > { %v721_v52 = vunpack.c.l.bf16 %v951_v35  ;;  %v722_v55 = vunpack.c.h.bf16 %v951_v35  ;;  %v725_v56 = vunpack.c.l.bf16 %v960_v41  ;;  %v726_v57 = vunpack.c.h.bf16 %v960_v41 }
  0x17   : > { %v729_v61 = vunpack.c.l.bf16 %v965_v46  ;;  %v730_v62 = vunpack.c.h.bf16 %v965_v46  ;;  %v733_v63 = vunpack.c.l.bf16 %v968_v47  ;;  %v734_v0 = vunpack.c.h.bf16 %v968_v47 }
  0x18   : > { %v737_v3 = vunpack.c.l.bf16 %v975_v53  ;;  %v738_v4 = vunpack.c.h.bf16 %v975_v53  ;;  %v741_v5 = vunpack.c.l.bf16 %v981_v58  ;;  %v742_v6 = vunpack.c.h.bf16 %v981_v58 }
  0x19   : > { %v745_v7 = vunpack.c.l.bf16 %v984_v59  ;;  %v746_v8 = vunpack.c.h.bf16 %v984_v59 }
  0x1d   : > { %v866_v48 = vpop.eup %865 }
  0x1e   : > { %v220_v54 = vmul.f32 %v866_v48, %v217_v36 }
  0x20   : > { %v222_v1 = vmul.f32 %v220_v54, %v207_v9  ;;  %v993_v2 = vrot.slane %v220_v54, %v290_v26 }
  0x22   : > { %v223_v10 = vsub.f32 %v221_v60, %v222_v1  ;;  %v292_v11 = vmul.f32 %v685_v24, %v993_v2  ;;  %v293_v12 = vmul.f32 %v686_v25, %v993_v2  ;;  %v294_v9 = vmul.f32 %v689_v27, %v993_v2 }
  0x23   : > { %v295_v13 = vmul.f32 %v690_v30, %v993_v2  ;;  %v296_v14 = vmul.f32 %v693_v31, %v993_v2  ;;  %v297_v15 = vmul.f32 %v694_v32, %v993_v2  ;;  %v298_v16 = vmul.f32 %v697_v33, %v993_v2 }
  0x24   : > { %v1008_v17 = vrot.slane %v223_v10, %v290_v26  ;;  %v299_v18 = vmul.f32 %v698_v37, %v993_v2  ;;  %v300_v19 = vmul.f32 %v701_v38, %v993_v2  ;;  %v301_v20 = vmul.f32 %v702_v39, %v993_v2 }
  0x25   : > { %v302_v21 = vmul.f32 %v705_v40, %v993_v2  ;;  %v303_v22 = vmul.f32 %v706_v42, %v993_v2  ;;  %v304_v23 = vmul.f32 %v709_v43, %v993_v2  ;;  %v305_v24 = vmul.f32 %v710_v44, %v993_v2 }
  0x26   : > { %v328_v25 = vadd.f32 %v1008_v17, %v292_v11  ;;  %v329_v26 = vadd.f32 %v1008_v17, %v293_v12  ;;  %v330_v27 = vadd.f32 %v1008_v17, %v294_v9  ;;  %v331_v28 = vadd.f32 %v1008_v17, %v295_v13 }
  0x27   : > { %v332_v30 = vadd.f32 %v1008_v17, %v296_v14  ;;  %v333_v31 = vadd.f32 %v1008_v17, %v297_v15  ;;  %v334_v32 = vadd.f32 %v1008_v17, %v298_v16  ;;  %v335_v33 = vadd.f32 %v1008_v17, %v299_v18 }
  0x28   : > { %v360_v36 = vmax.f32 %v328_v25, 0.0  ;;  %v361_v37 = vmax.f32 %v329_v26, 0.0  ;;  %v362_v38 = vmax.f32 %v330_v27, 0.0  ;;  %v363_v39 = vmax.f32 %v331_v28, 0.0 }
  0x29   : > { %v364_v40 = vmax.f32 %v332_v30, 0.0  ;;  %v365_v42 = vmax.f32 %v333_v31, 0.0  ;;  %v366_v43 = vmax.f32 %v334_v32, 0.0  ;;  %v367_v44 = vmax.f32 %v335_v33, 0.0 }
  0x2a   : > { %v750_v48 = vpack.c.bf16 %v361_v37, %v360_v36  ;;  %v755_v54 = vpack.c.bf16 %v363_v39, %v362_v38  ;;  %v336_v60 = vadd.f32 %v1008_v17, %v300_v19  ;;  %v337_v1 = vadd.f32 %v1008_v17, %v301_v20 }
  0x2b   : > { %v760_v10 = vpack.c.bf16 %v365_v42, %v364_v40  ;;  %v765_v11 = vpack.c.bf16 %v367_v44, %v366_v43  ;;  %v338_v12 = vadd.f32 %v1008_v17, %v302_v21  ;;  %v339_v9 = vadd.f32 %v1008_v17, %v303_v22 }
  0x2c   : > { %751 = vst [vmem:[%s1030_s10] sm:$0xff] %v750_v48   ;;  %842 = vst [vmem:[%s1030_s10 + $0x8] sm:$0xff] %v755_v54   ;;  %v368_v13 = vmax.f32 %v336_v60, 0.0  ;;  %v369_v14 = vmax.f32 %v337_v1, 0.0  ;;  %v340_v15 = vadd.f32 %v1008_v17, %v304_v23  ;;  %v341_v16 = vadd.f32 %v1008_v17, %v305_v24 }
  0x2d   : > { %843 = vst [vmem:[%s1030_s10 + $0x10] sm:$0xff] %v760_v10   ;;  %844 = vst [vmem:[%s1030_s10 + $0x18] sm:$0xff] %v765_v11   ;;  %v370_v18 = vmax.f32 %v338_v12, 0.0  ;;  %v371_v19 = vmax.f32 %v339_v9, 0.0  ;;  %v306_v20 = vmul.f32 %v713_v45, %v993_v2  ;;  %v307_v21 = vmul.f32 %v714_v49, %v993_v2 }
  0x2e   : > { %v770_v22 = vpack.c.bf16 %v369_v14, %v368_v13  ;;  %v372_v25 = vmax.f32 %v340_v15, 0.0  ;;  %v373_v26 = vmax.f32 %v341_v16, 0.0  ;;  %v308_v23 = vmul.f32 %v717_v50, %v993_v2 }
  0x2f   : > { %v775_v24 = vpack.c.bf16 %v371_v19, %v370_v18  ;;  %v342_v27 = vadd.f32 %v1008_v17, %v306_v20  ;;  %v343_v28 = vadd.f32 %v1008_v17, %v307_v21  ;;  %v309_v45 = vmul.f32 %v718_v51, %v993_v2 }
  0x30   : > { %845 = vst [vmem:[%s1030_s10 + $0x20] sm:$0xff] %v770_v22   ;;  %v780_v29 = vpack.c.bf16 %v373_v26, %v372_v25  ;;  %v344_v49 = vadd.f32 %v1008_v17, %v308_v23  ;;  %v310_v30 = vmul.f32 %v721_v52, %v993_v2  ;;  %v311_v50 = vmul.f32 %v722_v55, %v993_v2 }
  0x31   : > { %846 = vst [vmem:[%s1030_s10 + $0x28] sm:$0xff] %v775_v24   ;;  %v374_v31 = vmax.f32 %v342_v27, 0.0  ;;  %v375_v32 = vmax.f32 %v343_v28, 0.0  ;;  %v345_v33 = vadd.f32 %v1008_v17, %v309_v45  ;;  %v312_v34 = vmul.f32 %v725_v56, %v993_v2 }
  0x32   : > { %847 = vst [vmem:[%s1030_s10 + $0x30] sm:$0xff] %v780_v29   ;;  %v376_v51 = vmax.f32 %v344_v49, 0.0  ;;  %v346_v36 = vadd.f32 %v1008_v17, %v310_v30  ;;  %v347_v52 = vadd.f32 %v1008_v17, %v311_v50  ;;  %v313_v35 = vmul.f32 %v726_v57, %v993_v2 }
  0x33   : > { %v785_v55 = vpack.c.bf16 %v375_v32, %v374_v31  ;;  %v377_v37 = vmax.f32 %v345_v33, 0.0  ;;  %v348_v38 = vadd.f32 %v1008_v17, %v312_v34  ;;  %v314_v39 = vmul.f32 %v729_v61, %v993_v2 }
  0x34   : > { %v378_v56 = vmax.f32 %v346_v36, 0.0  ;;  %v379_v40 = vmax.f32 %v347_v52, 0.0  ;;  %v349_v42 = vadd.f32 %v1008_v17, %v313_v35  ;;  %v315_v43 = vmul.f32 %v730_v62, %v993_v2 }
  0x35   : > { %848 = vst [vmem:[%s1030_s10 + $0x38] sm:$0xff] %v785_v55   ;;  %v790_v41 = vpack.c.bf16 %v377_v37, %v376_v51  ;;  %v380_v57 = vmax.f32 %v348_v38, 0.0  ;;  %v350_v44 = vadd.f32 %v1008_v17, %v314_v39  ;;  %v316_v48 = vmul.f32 %v733_v63, %v993_v2 }
  0x36   : > { %v795_v54 = vpack.c.bf16 %v379_v40, %v378_v56  ;;  %v381_v61 = vmax.f32 %v349_v42, 0.0  ;;  %v351_v60 = vadd.f32 %v1008_v17, %v315_v43  ;;  %v317_v46 = vmul.f32 %v734_v0, %v993_v2 }
  0x37   : > { %849 = vst [vmem:[%s1030_s10 + $0x40] sm:$0xff] %v790_v41   ;;  %v382_v62 = vmax.f32 %v350_v44, 0.0  ;;  %v352_v1 = vadd.f32 %v1008_v17, %v316_v48  ;;  %v318_v10 = vmul.f32 %v737_v3, %v993_v2  ;;  %v319_v63 = vmul.f32 %v738_v4, %v993_v2 }
  0x38   : > { %850 = vst [vmem:[%s1030_s10 + $0x48] sm:$0xff] %v795_v54   ;;  %v800_v11 = vpack.c.bf16 %v381_v61, %v380_v57  ;;  %v383_v12 = vmax.f32 %v351_v60, 0.0  ;;  %v353_v47 = vadd.f32 %v1008_v17, %v317_v46  ;;  %v320_v0 = vmul.f32 %v741_v5, %v993_v2 }
  0x39   : > { %v384_v9 = vmax.f32 %v352_v1, 0.0  ;;  %v354_v13 = vadd.f32 %v1008_v17, %v318_v10  ;;  %v355_v14 = vadd.f32 %v1008_v17, %v319_v63  ;;  %v321_v53 = vmul.f32 %v742_v6, %v993_v2 }
  0x3a   : > { %851 = vst [vmem:[%s1030_s10 + $0x50] sm:$0xff] %v800_v11   ;;  %v805_v3 = vpack.c.bf16 %v383_v12, %v382_v62  ;;  %v385_v4 = vmax.f32 %v353_v47, 0.0  ;;  %v356_v15 = vadd.f32 %v1008_v17, %v320_v0  ;;  %v322_v5 = vmul.f32 %v745_v7, %v993_v2 }
  0x3b   : > { %v386_v16 = vmax.f32 %v354_v13, 0.0  ;;  %v387_v18 = vmax.f32 %v355_v14, 0.0  ;;  %v357_v19 = vadd.f32 %v1008_v17, %v321_v53  ;;  %v323_v58 = vmul.f32 %v746_v8, %v993_v2 }
  0x3c   : > { %852 = vst [vmem:[%s1030_s10 + $0x58] sm:$0xff] %v805_v3   ;;  %v810_v6 = vpack.c.bf16 %v385_v4, %v384_v9  ;;  %v388_v20 = vmax.f32 %v356_v15, 0.0  ;;  %v358_v21 = vadd.f32 %v1008_v17, %v322_v5 }
  0x3d   : > { %v815_v22 = vpack.c.bf16 %v387_v18, %v386_v16  ;;  %v389_v25 = vmax.f32 %v357_v19, 0.0  ;;  %v359_v26 = vadd.f32 %v1008_v17, %v323_v58 }
  0x3e   : > { %853 = vst [vmem:[%s1030_s10 + $0x60] sm:$0xff] %v810_v6   ;;  %v390_v7 = vmax.f32 %v358_v21, 0.0 }
  0x3f   : > { %854 = vst [vmem:[%s1030_s10 + $0x68] sm:$0xff] %v815_v22   ;;  %v820_v23 = vpack.c.bf16 %v389_v25, %v388_v20  ;;  %v391_v24 = vmax.f32 %v359_v26, 0.0 }
  0x41   : > { %855 = vst [vmem:[%s1030_s10 + $0x70] sm:$0xff] %v820_v23   ;;  %v825_v27 = vpack.c.bf16 %v391_v24, %v390_v7 }
  0x43   : > { %856 = vst [vmem:[%s1030_s10 + $0x78] sm:$0xff] %v825_v27  }
  0x44 PF: > { %s14_s15 = sadd.s32 1, %s873_s15  }
  0x45   : > { %p11_p4 = scmp.ge.s32.totalorder %s14_s15, 4  }
  0x47   :  { %13 = sbr.rel (!%p11_p4) target bundleno = 1 (0x1), region = 66 }

// kernel: _lambda_.43
= control target key start
LH: loop header
LB: loop body
LE: loop exit
PB: predicated region body
PF: predicated region fallthrough
CT: control target
= control target key end

     0   :  { %s1530_s15 = smov 0   ;;  %s1746_s0 = inlined_call_operand.vmem [shape: bf16[512,256], index: 0, kind: input, shape index: {}]   ;;  %s1747_s1 = inlined_call_operand.vmem [shape: bf16[256,128], index: 1, kind: input, shape index: {}]   ;;  %s1748_s2 = inlined_call_operand.vmem [shape: bf16[512,128], index: 2, kind: output, shape index: {0}]   ;;  %s1749_s3 = inlined_call_operand.vmem [shape: f32[2,1,128], index: 3, kind: output, shape index: {1}]   ;;  %s1750_s4 = inlined_call_operand.vmem [shape: f32[2,1,128], index: 4, kind: output, shape index: {2}]  }
   0x1 LB: > { %s1536_s16 = sadd.s32 4294967295, %s1503_s15   ;;  %p1081_p0 = scmp.ge.s32.totalorder %s1503_s15, 1  ;;  %s1503_s15 = sphi %s1530_s15, %s15_s15  }
   0x2   : > { %p169_p1 = scmp.lt.s32.totalorder %s1503_s15, 3 }
   0x4   : > { %p170_p2 = pnand %p1081_p0, %p169_p1 }
   0x5   : > { %v1433_v0 = vld [vmem:[%s1747_s1 + $0x40] sm:$0xff] (!%p170_p2)   ;;  %s1082_s19 = sshll.u32 (!%p170_p2), %s1536_s16, 5  ;;  %v1435_v2 = vld [vmem:[%s1747_s1 + $0x48] sm:$0xff] (!%p170_p2)   ;;  %v1437_v4 = vld [vmem:[%s1747_s1 + $0x50] sm:$0xff] (!%p170_p2)   ;;  %p215_p4 = scmp.lt.s32.totalorder (!%p170_p2), %s1536_s16, 1 }
   0x6   : > { %173 = sbr.rel (%p170_p2) target bundleno = 360 (0x168), region = 28  ;;  %v1434_v1 = vld [vmem:[%s1747_s1] sm:$0xff] (!%p170_p2)   ;;  %1297 = vmatprep.subr.bf16.mxu0 (!%p170_p2), %v1433_v0  ;;  %1409 = vmatprep.subr.bf16.mxu1 (!%p170_p2), %v1433_v0  ;;  %v1436_v3 = vld [vmem:[%s1747_s1 + $0x8] sm:$0xff] (!%p170_p2)   ;;  %p203_p3 = scmp.lt.s32.totalorder (!%p170_p2), %s1082_s19, 63  ;;  %v1438_v5 = vld [vmem:[%s1747_s1 + $0x10] sm:$0xff] (!%p170_p2)  }
   0x7   : > { %1298 = vmatpush3.bf16.msra.mxu0 (!%p170_p2), %v1434_v1  ;;  %1417 = vmatpush3.bf16.msra.mxu1 (!%p170_p2), %v1434_v1  ;;  %v1439_v6 = vld [vmem:[%s1747_s1 + $0x58] sm:$0xff] (!%p170_p2)   ;;  %v1441_v8 = vld [vmem:[%s1747_s1 + $0x60] sm:$0xff] (!%p170_p2)   ;;  %v1443_v10 = vld [vmem:[%s1747_s1 + $0x68] sm:$0xff] (!%p170_p2)  }
   0x8   : > { %1299 = vmatprep.subr.bf16.mxu0 (!%p170_p2), %v1435_v2  ;;  %1410 = vmatprep.subr.bf16.mxu1 (!%p170_p2), %v1435_v2  ;;  %v1440_v7 = vld [vmem:[%s1747_s1 + $0x18] sm:$0xff] (!%p170_p2)   ;;  %v1442_v9 = vld [vmem:[%s1747_s1 + $0x20] sm:$0xff] (!%p170_p2)   ;;  %v1444_v12 = vld [vmem:[%s1747_s1 + $0x28] sm:$0xff] (!%p170_p2)  }
   0x9   : > { %v1445_v13 = vld [vmem:[%s1747_s1 + $0x70] sm:$0xff] (!%p170_p2)   ;;  %v1447_v16 = vld [vmem:[%s1747_s1 + $0x78] sm:$0xff] (!%p170_p2)  }
   0xa   : > { %v1446_v15 = vld [vmem:[%s1747_s1 + $0x30] sm:$0xff] (!%p170_p2)   ;;  %v1448_v17 = vld [vmem:[%s1747_s1 + $0x38] sm:$0xff] (!%p170_p2)  }
   0xb   : > { %1300 = vmatpush3.bf16.msra.mxu0 (!%p170_p2), %v1436_v3  ;;  %1418 = vmatpush3.bf16.msra.mxu1 (!%p170_p2), %v1436_v3 }
   0xc   : > { %1301 = vmatprep.subr.bf16.mxu0 (!%p170_p2), %v1437_v4  ;;  %1411 = vmatprep.subr.bf16.mxu1 (!%p170_p2), %v1437_v4 }
   0xd   : > { %s1752_s19 = smov (!%p203_p3, %s1082_s19), 63  ;;  %s1754_s16 = smov (!%p215_p4, %s1536_s16), 1 }
   0xe   : > { %s1169_s8 = sshll.u32 %s1752_s19, 3  ;;  %s1086_s5 = sshll.u32 %s1752_s19, 2 }
   0xf   : > { %1302 = vmatpush3.bf16.msra.mxu0 %v1438_v5  ;;  %1419 = vmatpush3.bf16.msra.mxu1 %v1438_v5  ;;  %s1574_s13 = scalar_lea.vmem %s1746_s0, %s1169_s8  ;;  %s1635_s8 = scalar_lea.vmem %s1748_s2, %s1086_s5 }
  0x10   : > { %1303 = vmatprep.subr.bf16.mxu0 %v1439_v6  ;;  %1412 = vmatprep.subr.bf16.mxu1 %v1439_v6  ;;  %v1451_v11 = vld [vmem:[%s1574_s13 + $0x4] ss:$8 sps:$4 sm:$0xff]   ;;  %v1449_v18 = vld [vmem:[%s1574_s13] ss:$8 sps:$4 sm:$0xff]   ;;  %v1452_v19 = vld [vmem:[%s1574_s13 + $0x14] ss:$8 sps:$4 sm:$0xff]   ;;  %s217_s10 = scalar_lea.vmem %s1749_s3, %s1754_s16 }
  0x11   : > { %574 = vmatprep.mubr.bf16.mxu0 %v1451_v11  ;;  %v1463_v14 = vld [vmem:[%s1574_s13 + $0x84] ss:$8 sps:$4 sm:$0xff]   ;;  %v1461_v20 = vld [vmem:[%s1574_s13 + $0x80] ss:$8 sps:$4 sm:$0xff]   ;;  %v1467_v21 = vld [vmem:[%s1574_s13 + $0x94] ss:$8 sps:$4 sm:$0xff]  }
  0x12   : > { %638 = vmatprep.mubr.bf16.mxu1 %v1463_v14  ;;  %v1454_v22 = vld [vmem:[%s1574_s13 + $0x10] ss:$8 sps:$4 sm:$0xff]   ;;  %v1455_v23 = vld [vmem:[%s1574_s13 + $0x24] ss:$8 sps:$4 sm:$0xff]   ;;  %v1457_v26 = vld [vmem:[%s1574_s13 + $0x20] ss:$8 sps:$4 sm:$0xff]  }
  0x13   : > { %1304 = vmatpush3.bf16.msra.mxu0 %v1440_v7  ;;  %1420 = vmatpush3.bf16.msra.mxu1 %v1440_v7  ;;  %v1469_v24 = vld [vmem:[%s1574_s13 + $0x90] ss:$8 sps:$4 sm:$0xff]   ;;  %v1473_v25 = vld [vmem:[%s1574_s13 + $0xa4] ss:$8 sps:$4 sm:$0xff]   ;;  %v1458_v27 = vld [vmem:[%s1574_s13 + $0x34] ss:$8 sps:$4 sm:$0xff]  }
  0x14   : > { %1305 = vmatprep.subr.bf16.mxu0 %v1441_v8  ;;  %1413 = vmatprep.subr.bf16.mxu1 %v1441_v8  ;;  %v1475_v28 = vld [vmem:[%s1574_s13 + $0xa0] ss:$8 sps:$4 sm:$0xff]   ;;  %v1479_v29 = vld [vmem:[%s1574_s13 + $0xb4] ss:$8 sps:$4 sm:$0xff]   ;;  %v1460_v30 = vld [vmem:[%s1574_s13 + $0x30] ss:$8 sps:$4 sm:$0xff]  }
  0x15   : > { %v1464_v31 = vld [vmem:[%s1574_s13 + $0x44] ss:$8 sps:$4 sm:$0xff]   ;;  %v1481_v32 = vld [vmem:[%s1574_s13 + $0xb0] ss:$8 sps:$4 sm:$0xff]   ;;  %v1466_v34 = vld [vmem:[%s1574_s13 + $0x40] ss:$8 sps:$4 sm:$0xff]  }
  0x16   : > { %v1485_v33 = vld [vmem:[%s1574_s13 + $0xc4] ss:$8 sps:$4 sm:$0xff]   ;;  %v1470_v35 = vld [vmem:[%s1574_s13 + $0x54] ss:$8 sps:$4 sm:$0xff]   ;;  %v1487_v36 = vld [vmem:[%s1574_s13 + $0xc0] ss:$8 sps:$4 sm:$0xff]  }
  0x17   : > { %1306 = vmatpush3.bf16.msra.mxu0 %v1442_v9  ;;  %1421 = vmatpush3.bf16.msra.mxu1 %v1442_v9  ;;  %v1488_v37 = vld [vmem:[%s1574_s13 + $0xd4] ss:$8 sps:$4 sm:$0xff]   ;;  %v1472_v38 = vld [vmem:[%s1574_s13 + $0x50] ss:$8 sps:$4 sm:$0xff]   ;;  %v1476_v39 = vld [vmem:[%s1574_s13 + $0x64] ss:$8 sps:$4 sm:$0xff]  }
  0x18   : > { %1307 = vmatprep.subr.bf16.mxu0 %v1443_v10  ;;  %1414 = vmatprep.subr.bf16.mxu1 %v1443_v10  ;;  %v1490_v40 = vld [vmem:[%s1574_s13 + $0xd0] ss:$8 sps:$4 sm:$0xff]   ;;  %v1491_v41 = vld [vmem:[%s1574_s13 + $0xe4] ss:$8 sps:$4 sm:$0xff]   ;;  %v1478_v42 = vld [vmem:[%s1574_s13 + $0x60] ss:$8 sps:$4 sm:$0xff]  }
  0x19   : > { %v1482_v43 = vld [vmem:[%s1574_s13 + $0x74] ss:$8 sps:$4 sm:$0xff]   ;;  %v1493_v44 = vld [vmem:[%s1574_s13 + $0xe0] ss:$8 sps:$4 sm:$0xff]   ;;  %v1484_v46 = vld [vmem:[%s1574_s13 + $0x70] ss:$8 sps:$4 sm:$0xff]  }
  0x1a   : > { %v1494_v45 = vld [vmem:[%s1574_s13 + $0xf4] ss:$8 sps:$4 sm:$0xff]   ;;  %v1496_v47 = vld [vmem:[%s1574_s13 + $0xf0] ss:$8 sps:$4 sm:$0xff]   ;;  %s220_s13 = scalar_lea.vmem %s1750_s4, %s1754_s16 }
  0x1b   : > { %1308 = vmatpush3.bf16.msra.mxu0 %v1444_v12  ;;  %1422 = vmatpush3.bf16.msra.mxu1 %v1444_v12 }
  0x1c   : > { %1309 = vmatprep.subr.bf16.mxu0 %v1445_v13  ;;  %1415 = vmatprep.subr.bf16.mxu1 %v1445_v13 }
  0x1f   : > { %1310 = vmatpush3.bf16.msra.mxu0 %v1446_v15  ;;  %1423 = vmatpush3.bf16.msra.mxu1 %v1446_v15 }
  0x20   : > { %1311 = vmatprep.subr.bf16.mxu0 %v1447_v16  ;;  %1416 = vmatprep.subr.bf16.mxu1 %v1447_v16 }
  0x23   : > { %1312 = vmatpush3.bf16.msra.mxu0 %v1448_v17  ;;  %1424 = vmatpush3.bf16.msra.mxu1 %v1448_v17 }
  0x26   : > { %575 = vmatmul.mubr.bf16.vlgmr.msra.gmra.mrb[0].mxu0 %v1449_v18  ;;  %639 = vmatmul.mubr.bf16.vlgmr.msra.gmra.mrb[0].mxu1 %v1461_v20 }
  0x27   : > { %582 = vmatprep.mubr.bf16.mxu0 %v1452_v19  ;;  %646 = vmatprep.mubr.bf16.mxu1 %v1467_v21 }
  0x2e   : > { %583 = vmatmul.mubr.bf16.gmra.mrb[4].mxu0 %v1454_v22  ;;  %647 = vmatmul.mubr.bf16.gmra.mrb[4].mxu1 %v1469_v24 }
  0x2f   : > { %590 = vmatprep.mubr.bf16.mxu0 %v1455_v23  ;;  %654 = vmatprep.mubr.bf16.mxu1 %v1473_v25 }
  0x36   : > { %591 = vmatmul.mubr.bf16.gmra.mrb[8].mxu0 %v1457_v26  ;;  %655 = vmatmul.mubr.bf16.gmra.mrb[8].mxu1 %v1475_v28 }
  0x37   : > { %598 = vmatprep.mubr.bf16.mxu0 %v1458_v27  ;;  %662 = vmatprep.mubr.bf16.mxu1 %v1479_v29 }
  0x3e   : > { %599 = vmatmul.mubr.bf16.gmra.mrb[12].mxu0 %v1460_v30  ;;  %663 = vmatmul.mubr.bf16.gmra.mrb[12].mxu1 %v1481_v32 }
  0x3f   : > { %606 = vmatprep.mubr.bf16.mxu0 %v1464_v31  ;;  %670 = vmatprep.mubr.bf16.mxu1 %v1485_v33 }
  0x46   : > { %607 = vmatmul.mubr.bf16.gmra.mrb[16].mxu0 %v1466_v34  ;;  %671 = vmatmul.mubr.bf16.gmra.mrb[16].mxu1 %v1487_v36 }
  0x47   : > { %614 = vmatprep.mubr.bf16.mxu0 %v1470_v35  ;;  %678 = vmatprep.mubr.bf16.mxu1 %v1488_v37 }
  0x4e   : > { %615 = vmatmul.mubr.bf16.gmra.mrb[20].mxu0 %v1472_v38  ;;  %679 = vmatmul.mubr.bf16.gmra.mrb[20].mxu1 %v1490_v40 }
  0x4f   : > { %622 = vmatprep.mubr.bf16.mxu0 %v1476_v39  ;;  %686 = vmatprep.mubr.bf16.mxu1 %v1491_v41 }
  0x56   : > { %623 = vmatmul.mubr.bf16.gmra.mrb[24].mxu0 %v1478_v42  ;;  %687 = vmatmul.mubr.bf16.gmra.mrb[24].mxu1 %v1493_v44 }
  0x57   : > { %630 = vmatprep.mubr.bf16.mxu0 %v1482_v43  ;;  %694 = vmatprep.mubr.bf16.mxu1 %v1494_v45 }
  0x5e   : > { %631 = vmatmul.mubr.bf16.gmra.mrb[28].mxu0 %v1484_v46  ;;  %695 = vmatmul.mubr.bf16.gmra.mrb[28].mxu1 %v1496_v47 }
  0xf9   : > { %v1313_v48 = vpop.f32.mrb[0].mxu0  ;;  %v1361_v50 = vpop.f32.mrb[0].mxu1 }
  0xfa   : > { %v1314_v49 = vpop.f32.mrb[1].mxu0  ;;  %v1362_v53 = vpop.f32.mrb[1].mxu1 }
  0xfb   : > { %v1315_v51 = vadd.f32 %v1314_v49, %v1313_v48  ;;  %v1316_v52 = vpop.f32.mrb[2].mxu0  ;;  %v1630_v55 = vadd.f32 %v1362_v53, %v1361_v50  ;;  %v1364_v56 = vpop.f32.mrb[2].mxu1 }
  0xfc   : > { %v1317_v54 = vpop.f32.mrb[3].mxu0  ;;  %v1365_v58 = vpop.f32.mrb[3].mxu1 }
  0xfd   : > { %v1318_v57 = vadd.f32 %v1317_v54, %v1316_v52  ;;  %v1637_v59 = vadd.f32 %v1365_v58, %v1364_v56  ;;  %v901_v60 = vmul.f32 %v1315_v51, %v1315_v51 }
  0xff   : > { %v1205_v61 = vpack.c.bf16 %v1318_v57, %v1315_v51  ;;  %v863_v62 = vadd.f32 %v1318_v57, %v1315_v51  ;;  %v902_v63 = vmul.f32 %v1318_v57, %v1318_v57  ;;  %v1245_v0 = vpack.c.bf16 %v1637_v59, %v1630_v55 }
 0x101   : > { %1206 = vst [vmem:[%s1635_s8] sm:$0xff] %v1205_v61   ;;  %v933_v1 = vadd.f32 %v902_v63, %v901_v60  ;;  %v1319_v2 = vpop.f32.mrb[4].mxu0  ;;  %1289 = vst [vmem:[%s1635_s8 + $0x40] sm:$0xff] %v1245_v0   ;;  %v1367_v4 = vpop.f32.mrb[4].mxu1 }
 0x102   : > { %v1320_v3 = vpop.f32.mrb[5].mxu0  ;;  %v1368_v7 = vpop.f32.mrb[5].mxu1 }
 0x103   : > { %v1321_v5 = vadd.f32 %v1320_v3, %v1319_v2  ;;  %v1322_v6 = vpop.f32.mrb[6].mxu0  ;;  %v1643_v9 = vadd.f32 %v1368_v7, %v1367_v4  ;;  %v1370_v10 = vpop.f32.mrb[6].mxu1 }
 0x104   : > { %v1323_v8 = vpop.f32.mrb[7].mxu0  ;;  %v1371_v14 = vpop.f32.mrb[7].mxu1 }
 0x105   : > { %v864_v11 = vadd.f32 %v1321_v5, %v863_v62  ;;  %v903_v12 = vmul.f32 %v1321_v5, %v1321_v5  ;;  %v1324_v13 = vadd.f32 %v1323_v8, %v1322_v6  ;;  %v1645_v15 = vadd.f32 %v1371_v14, %v1370_v10 }
 0x107   : > { %v934_v16 = vadd.f32 %v933_v1, %v903_v12  ;;  %v1210_v17 = vpack.c.bf16 %v1324_v13, %v1321_v5  ;;  %v865_v18 = vadd.f32 %v1324_v13, %v864_v11  ;;  %v904_v19 = vmul.f32 %v1324_v13, %v1324_v13 }
 0x108   : > { %v1250_v20 = vpack.c.bf16 %v1645_v15, %v1643_v9 }
 0x109   : > { %1282 = vst [vmem:[%s1635_s8 + $0x8] sm:$0xff] %v1210_v17   ;;  %v935_v21 = vadd.f32 %v934_v16, %v904_v19  ;;  %v1325_v22 = vpop.f32.mrb[8].mxu0  ;;  %v1373_v24 = vpop.f32.mrb[8].mxu1 }
 0x10a   : > { %v1326_v23 = vpop.f32.mrb[9].mxu0  ;;  %1290 = vst [vmem:[%s1635_s8 + $0x48] sm:$0xff] %v1250_v20   ;;  %v1374_v27 = vpop.f32.mrb[9].mxu1 }
 0x10b   : > { %v1327_v25 = vadd.f32 %v1326_v23, %v1325_v22  ;;  %v1328_v26 = vpop.f32.mrb[10].mxu0  ;;  %v1651_v29 = vadd.f32 %v1374_v27, %v1373_v24  ;;  %v1376_v30 = vpop.f32.mrb[10].mxu1 }
 0x10c   : > { %v1329_v28 = vpop.f32.mrb[11].mxu0  ;;  %v1377_v34 = vpop.f32.mrb[11].mxu1 }
 0x10d   : > { %v866_v31 = vadd.f32 %v1327_v25, %v865_v18  ;;  %v905_v32 = vmul.f32 %v1327_v25, %v1327_v25  ;;  %v1330_v33 = vadd.f32 %v1329_v28, %v1328_v26  ;;  %v1653_v35 = vadd.f32 %v1377_v34, %v1376_v30 }
 0x10f   : > { %v936_v36 = vadd.f32 %v935_v21, %v905_v32  ;;  %v1215_v37 = vpack.c.bf16 %v1330_v33, %v1327_v25  ;;  %v867_v38 = vadd.f32 %v1330_v33, %v866_v31  ;;  %v906_v39 = vmul.f32 %v1330_v33, %v1330_v33 }
 0x110   : > { %v1255_v40 = vpack.c.bf16 %v1653_v35, %v1651_v29 }
 0x111   : > { %1283 = vst [vmem:[%s1635_s8 + $0x10] sm:$0xff] %v1215_v37   ;;  %v937_v41 = vadd.f32 %v936_v36, %v906_v39  ;;  %v1331_v42 = vpop.f32.mrb[12].mxu0  ;;  %v1379_v44 = vpop.f32.mrb[12].mxu1 }
 0x112   : > { %v1332_v43 = vpop.f32.mrb[13].mxu0  ;;  %1291 = vst [vmem:[%s1635_s8 + $0x50] sm:$0xff] %v1255_v40   ;;  %v1380_v47 = vpop.f32.mrb[13].mxu1 }
 0x113   : > { %v1333_v45 = vadd.f32 %v1332_v43, %v1331_v42  ;;  %v1334_v46 = vpop.f32.mrb[14].mxu0  ;;  %v1659_v49 = vadd.f32 %v1380_v47, %v1379_v44  ;;  %v1382_v50 = vpop.f32.mrb[14].mxu1 }
 0x114   : > { %v1335_v48 = vpop.f32.mrb[15].mxu0  ;;  %v1383_v54 = vpop.f32.mrb[15].mxu1 }
 0x115   : > { %v868_v51 = vadd.f32 %v1333_v45, %v867_v38  ;;  %v907_v52 = vmul.f32 %v1333_v45, %v1333_v45  ;;  %v1336_v53 = vadd.f32 %v1335_v48, %v1334_v46  ;;  %v1661_v56 = vadd.f32 %v1383_v54, %v1382_v50 }
 0x117   : > { %v938_v57 = vadd.f32 %v937_v41, %v907_v52  ;;  %v1220_v58 = vpack.c.bf16 %v1336_v53, %v1333_v45  ;;  %v869_v60 = vadd.f32 %v1336_v53, %v868_v51  ;;  %v908_v61 = vmul.f32 %v1336_v53, %v1336_v53 }
 0x118   : > { %v1260_v62 = vpack.c.bf16 %v1661_v56, %v1659_v49 }
 0x119   : > { %1284 = vst [vmem:[%s1635_s8 + $0x18] sm:$0xff] %v1220_v58   ;;  %v939_v63 = vadd.f32 %v938_v57, %v908_v61  ;;  %v1337_v0 = vpop.f32.mrb[16].mxu0  ;;  %v1385_v2 = vpop.f32.mrb[16].mxu1 }
 0x11a   : > { %v1338_v1 = vpop.f32.mrb[17].mxu0  ;;  %1292 = vst [vmem:[%s1635_s8 + $0x58] sm:$0xff] %v1260_v62   ;;  %v1386_v5 = vpop.f32.mrb[17].mxu1 }
 0x11b   : > { %v1339_v3 = vadd.f32 %v1338_v1, %v1337_v0  ;;  %v1340_v4 = vpop.f32.mrb[18].mxu0  ;;  %v1667_v7 = vadd.f32 %v1386_v5, %v1385_v2  ;;  %v1388_v8 = vpop.f32.mrb[18].mxu1 }
 0x11c   : > { %v1341_v6 = vpop.f32.mrb[19].mxu0  ;;  %v1389_v13 = vpop.f32.mrb[19].mxu1 }
 0x11d   : > { %v870_v10 = vadd.f32 %v1339_v3, %v869_v60  ;;  %v909_v11 = vmul.f32 %v1339_v3, %v1339_v3  ;;  %v1342_v12 = vadd.f32 %v1341_v6, %v1340_v4  ;;  %v1669_v14 = vadd.f32 %v1389_v13, %v1388_v8 }
 0x11f   : > { %v940_v16 = vadd.f32 %v939_v63, %v909_v11  ;;  %v1225_v17 = vpack.c.bf16 %v1342_v12, %v1339_v3  ;;  %v871_v18 = vadd.f32 %v1342_v12, %v870_v10  ;;  %v910_v19 = vmul.f32 %v1342_v12, %v1342_v12 }
 0x120   : > { %v1265_v20 = vpack.c.bf16 %v1669_v14, %v1667_v7 }
 0x121   : > { %1285 = vst [vmem:[%s1635_s8 + $0x20] sm:$0xff] %v1225_v17   ;;  %v941_v21 = vadd.f32 %v940_v16, %v910_v19  ;;  %v1343_v22 = vpop.f32.mrb[20].mxu0  ;;  %v1391_v24 = vpop.f32.mrb[20].mxu1 }
 0x122   : > { %v1344_v23 = vpop.f32.mrb[21].mxu0  ;;  %1293 = vst [vmem:[%s1635_s8 + $0x60] sm:$0xff] %v1265_v20   ;;  %v1392_v27 = vpop.f32.mrb[21].mxu1 }
 0x123   : > { %v1345_v25 = vadd.f32 %v1344_v23, %v1343_v22  ;;  %v1346_v26 = vpop.f32.mrb[22].mxu0  ;;  %v1675_v30 = vadd.f32 %v1392_v27, %v1391_v24  ;;  %v1394_v31 = vpop.f32.mrb[22].mxu1  ;;  %v917_v27 = vmul.f32 %v1630_v55, %v1630_v55 }
 0x124   : > { %v1347_v28 = vpop.f32.mrb[23].mxu0  ;;  %v1395_v36 = vpop.f32.mrb[23].mxu1 }
 0x125   : > { %v872_v32 = vadd.f32 %v1345_v25, %v871_v18  ;;  %v911_v33 = vmul.f32 %v1345_v25, %v1345_v25  ;;  %v1348_v34 = vadd.f32 %v1347_v28, %v1346_v26  ;;  %v1677_v37 = vadd.f32 %v1395_v36, %v1394_v31 }
 0x126   : > { %v919_v36 = vmul.f32 %v1643_v9, %v1643_v9 }
 0x127   : > { %v942_v38 = vadd.f32 %v941_v21, %v911_v33  ;;  %v1230_v39 = vpack.c.bf16 %v1348_v34, %v1345_v25  ;;  %v873_v40 = vadd.f32 %v1348_v34, %v872_v32  ;;  %v912_v41 = vmul.f32 %v1348_v34, %v1348_v34 }
 0x128   : > { %v1270_v42 = vpack.c.bf16 %v1677_v37, %v1675_v30  ;;  %v918_v32 = vmul.f32 %v1637_v59, %v1637_v59 }
 0x129   : > { %1286 = vst [vmem:[%s1635_s8 + $0x28] sm:$0xff] %v1230_v39   ;;  %v943_v43 = vadd.f32 %v942_v38, %v912_v41  ;;  %v1349_v44 = vpop.f32.mrb[24].mxu0  ;;  %v1397_v46 = vpop.f32.mrb[24].mxu1 }
 0x12a   : > { %v1350_v45 = vpop.f32.mrb[25].mxu0  ;;  %1294 = vst [vmem:[%s1635_s8 + $0x68] sm:$0xff] %v1270_v42   ;;  %v1398_v50 = vpop.f32.mrb[25].mxu1  ;;  %v921_v42 = vmul.f32 %v1651_v29, %v1651_v29 }
 0x12b   : > { %v1351_v47 = vadd.f32 %v1350_v45, %v1349_v44  ;;  %v1352_v48 = vpop.f32.mrb[26].mxu0  ;;  %v1683_v52 = vadd.f32 %v1398_v50, %v1397_v46  ;;  %v1400_v53 = vpop.f32.mrb[26].mxu1 }
 0x12c   : > { %v1353_v51 = vpop.f32.mrb[27].mxu0  ;;  %v1401_v60 = vpop.f32.mrb[27].mxu1 }
 0x12d   : > { %v874_v54 = vadd.f32 %v1351_v47, %v873_v40  ;;  %v913_v57 = vmul.f32 %v1351_v47, %v1351_v47  ;;  %v1354_v58 = vadd.f32 %v1353_v51, %v1352_v48  ;;  %v1685_v61 = vadd.f32 %v1401_v60, %v1400_v53 }
 0x12e   : > { %v920_v40 = vmul.f32 %v1645_v15, %v1645_v15  ;;  %v925_v53 = vmul.f32 %v1667_v7, %v1667_v7 }
 0x12f   : > { %v944_v62 = vadd.f32 %v943_v43, %v913_v57  ;;  %v1235_v63 = vpack.c.bf16 %v1354_v58, %v1351_v47  ;;  %v875_v0 = vadd.f32 %v1354_v58, %v874_v54  ;;  %v914_v1 = vmul.f32 %v1354_v58, %v1354_v58 }
 0x130   : > { %v1275_v2 = vpack.c.bf16 %v1685_v61, %v1683_v52  ;;  %v926_v58 = vmul.f32 %v1669_v14, %v1669_v14 }
 0x131   : > { %1287 = vst [vmem:[%s1635_s8 + $0x30] sm:$0xff] %v1235_v63   ;;  %v945_v3 = vadd.f32 %v944_v62, %v914_v1  ;;  %v1355_v4 = vpop.f32.mrb[28].mxu0  ;;  %v1403_v6 = vpop.f32.mrb[28].mxu1  ;;  %v927_v62 = vmul.f32 %v1675_v30, %v1675_v30 }
 0x132   : > { %v1356_v5 = vpop.f32.mrb[29].mxu0  ;;  %1295 = vst [vmem:[%s1635_s8 + $0x70] sm:$0xff] %v1275_v2   ;;  %v1404_v11 = vpop.f32.mrb[29].mxu1  ;;  %v929_v2 = vmul.f32 %v1683_v52, %v1683_v52 }
 0x133   : > { %v1357_v8 = vadd.f32 %v1356_v5, %v1355_v4  ;;  %v1358_v10 = vpop.f32.mrb[30].mxu0  ;;  %v1405_v13 = vadd.f32 %v1404_v11, %v1403_v6  ;;  %v1406_v16 = vpop.f32.mrb[30].mxu1 }
 0x134   : > { %v1359_v12 = vpop.f32.mrb[31].mxu0  ;;  %v1407_v20 = vpop.f32.mrb[31].mxu1 }
 0x135   : > { %v876_v17 = vadd.f32 %v1357_v8, %v875_v0  ;;  %v915_v18 = vmul.f32 %v1357_v8, %v1357_v8  ;;  %v1360_v19 = vadd.f32 %v1359_v12, %v1358_v10  ;;  %v1408_v21 = vadd.f32 %v1407_v20, %v1406_v16 }
 0x136   : > { %v931_v4 = vmul.f32 %v1405_v13, %v1405_v13 }
 0x137   : > { %v946_v22 = vadd.f32 %v945_v3, %v915_v18  ;;  %v1240_v23 = vpack.c.bf16 %v1360_v19, %v1357_v8  ;;  %v877_v24 = vadd.f32 %v1360_v19, %v876_v17  ;;  %v916_v25 = vmul.f32 %v1360_v19, %v1360_v19 }
 0x138   : > { %v1280_v26 = vpack.c.bf16 %v1408_v21, %v1405_v13  ;;  %v932_v11 = vmul.f32 %v1408_v21, %v1408_v21 }
 0x139   : > { %1288 = vst [vmem:[%s1635_s8 + $0x38] sm:$0xff] %v1240_v23   ;;  %v878_v28 = vadd.f32 %v1630_v55, %v877_v24  ;;  %v947_v31 = vadd.f32 %v946_v22, %v916_v25 }
 0x13a   : > { %1296 = vst [vmem:[%s1635_s8 + $0x78] sm:$0xff] %v1280_v26  }
 0x13b   : > { %v879_v33 = vadd.f32 %v1637_v59, %v878_v28  ;;  %v948_v34 = vadd.f32 %v947_v31, %v917_v27  ;;  %v922_v59 = vmul.f32 %v1653_v35, %v1653_v35 }
 0x13d   : > { %v880_v38 = vadd.f32 %v1643_v9, %v879_v33  ;;  %v949_v39 = vadd.f32 %v948_v34, %v918_v32  ;;  %v923_v9 = vmul.f32 %v1659_v49, %v1659_v49 }
 0x13f   : > { %v881_v41 = vadd.f32 %v1645_v15, %v880_v38  ;;  %v950_v55 = vadd.f32 %v949_v39, %v919_v36  ;;  %v924_v15 = vmul.f32 %v1661_v56, %v1661_v56 }
 0x141   : > { %v951_v43 = vadd.f32 %v950_v55, %v920_v40  ;;  %v882_v44 = vadd.f32 %v1651_v29, %v881_v41 }
 0x143   : > { %v883_v45 = vadd.f32 %v1653_v35, %v882_v44  ;;  %v952_v46 = vadd.f32 %v951_v43, %v921_v42 }
 0x145   : > { %v884_v47 = vadd.f32 %v1659_v49, %v883_v45  ;;  %v953_v48 = vadd.f32 %v952_v46, %v922_v59 }
 0x147   : > { %v885_v50 = vadd.f32 %v1661_v56, %v884_v47  ;;  %v954_v51 = vadd.f32 %v953_v48, %v923_v9 }
 0x149   : > { %v886_v29 = vadd.f32 %v1667_v7, %v885_v50  ;;  %v955_v54 = vadd.f32 %v954_v51, %v924_v15  ;;  %v928_v7 = vmul.f32 %v1677_v37, %v1677_v37 }
 0x14b   : > { %v956_v35 = vadd.f32 %v955_v54, %v925_v53  ;;  %v887_v57 = vadd.f32 %v1669_v14, %v886_v29 }
 0x14d   : > { %v957_v49 = vadd.f32 %v956_v35, %v926_v58  ;;  %v888_v60 = vadd.f32 %v1675_v30, %v887_v57  ;;  %v930_v30 = vmul.f32 %v1685_v61, %v1685_v61 }
 0x14f   : > { %v958_v56 = vadd.f32 %v957_v49, %v927_v62  ;;  %v889_v63 = vadd.f32 %v1677_v37, %v888_v60 }
 0x151   : > { %v959_v0 = vadd.f32 %v958_v56, %v928_v7  ;;  %v890_v1 = vadd.f32 %v1683_v52, %v889_v63 }
 0x153   : > { %v960_v14 = vadd.f32 %v959_v0, %v929_v2  ;;  %v891_v3 = vadd.f32 %v1685_v61, %v890_v1 }
 0x155   : > { %v961_v5 = vadd.f32 %v960_v14, %v930_v30  ;;  %v892_v6 = vadd.f32 %v1405_v13, %v891_v3 }
 0x157   : > { %v962_v8 = vadd.f32 %v961_v5, %v931_v4  ;;  %v893_v10 = vadd.f32 %v1408_v21, %v892_v6 }
 0x159   : > { %v894_v37 = vrot.slane %v893_v10, 4  ;;  %v963_v12 = vadd.f32 %v962_v8, %v932_v11 }
 0x15b   : > { %v895_v16 = vadd.f32 %v894_v37, %v893_v10  ;;  %v964_v17 = vrot.slane %v963_v12, 4 }
 0x15d   : > { %v896_v18 = vrot.slane %v895_v16, 2  ;;  %v965_v52 = vadd.f32 %v964_v17, %v963_v12 }
 0x15f   : > { %v897_v19 = vadd.f32 %v896_v18, %v895_v16  ;;  %v966_v20 = vrot.slane %v965_v52, 2 }
 0x161   : > { %v898_v22 = vrot.slane %v897_v19, 1  ;;  %v967_v23 = vadd.f32 %v966_v20, %v965_v52 }
 0x163   : > { %v899_v61 = vadd.f32 %v898_v22, %v897_v19  ;;  %v968_v13 = vrot.slane %v967_v23, 1 }
 0x165   : > { %900 = vst [vmem:[%s217_s10] sm:$0x1] %v899_v61  ;;  %v969_v21 = vadd.f32 %v968_v13, %v967_v23 }
 0x167   : > { %970 = vst [vmem:[%s220_s13] sm:$0x1] %v969_v21 }
 0x168 PF: > { %s15_s15 = sadd.s32 1, %s1503_s15  }
 0x169   : > { %p12_p5 = scmp.ge.s32.totalorder %s15_s15, 4  }
 0x16b   :  { %14 = sbr.rel (!%p12_p5) target bundleno = 1 (0x1), region = 82 }

// kernel: _lambda_.48
= control target key start
LH: loop header
LB: loop body
LE: loop exit
PB: predicated region body
PF: predicated region fallthrough
CT: control target
= control target key end

     0   :  { %s729_s15 = smov 0   ;;  %s794_s0 = inlined_call_operand.vmem [shape: bf16[128,128], index: 0, kind: input, shape index: {}]   ;;  %s795_s1 = inlined_call_operand.vmem [shape: bf16[128,128], index: 1, kind: input, shape index: {}]   ;;  %s796_s2 = inlined_call_operand.vmem [shape: bf16[128,128], index: 2, kind: output, shape index: {0}]   ;;  %s797_s3 = inlined_call_operand.vmem [shape: f32[2,1,128], index: 3, kind: output, shape index: {1}]   ;;  %s798_s4 = inlined_call_operand.vmem [shape: f32[2,1,128], index: 4, kind: output, shape index: {2}]  }
   0x1 LB: > { %s735_s16 = sadd.s32 4294967295, %s702_s15   ;;  %p566_p0 = scmp.ge.s32.totalorder %s702_s15, 1  ;;  %s702_s15 = sphi %s729_s15, %s15_s15  }
   0x2   : > { %p168_p1 = scmp.lt.s32.totalorder %s702_s15, 3 }
   0x4   : > { %p169_p2 = pnand %p566_p0, %p168_p1 }
   0x5   : > { %v684_v0 = vld [vmem:[%s795_s1] sm:$0xff] (!%p169_p2)   ;;  %s567_s19 = sshll.u32 (!%p169_p2), %s735_s16, 3  ;;  %v685_v1 = vld [vmem:[%s795_s1 + $0x8] sm:$0xff] (!%p169_p2)   ;;  %v686_v2 = vld [vmem:[%s795_s1 + $0x10] sm:$0xff] (!%p169_p2)   ;;  %p212_p4 = scmp.lt.s32.totalorder (!%p169_p2), %s735_s16, 1 }
   0x6   : > { %172 = sbr.rel (%p169_p2) target bundleno = 282 (0x11a), region = 28  ;;  %p201_p3 = scmp.lt.s32.totalorder (!%p169_p2), %s567_s19, 15  ;;  %636 = vmatprep.subr.bf16.mxu0 (!%p169_p2), %v684_v0  ;;  %660 = vmatprep.subr.bf16.mxu1 (!%p169_p2), %v684_v0  ;;  %v687_v3 = vld [vmem:[%s795_s1 + $0x18] sm:$0xff] (!%p169_p2)   ;;  %v688_v6 = vld [vmem:[%s795_s1 + $0x20] sm:$0xff] (!%p169_p2)   ;;  %v689_v7 = vld [vmem:[%s795_s1 + $0x28] sm:$0xff] (!%p169_p2)  }
   0x7   : > { %637 = vmatpush3.bf16.msra.mxu0 (!%p169_p2), %v684_v0  ;;  %668 = vmatpush3.bf16.msra.mxu1 (!%p169_p2), %v684_v0  ;;  %v690_v8 = vld [vmem:[%s795_s1 + $0x30] sm:$0xff] (!%p169_p2)   ;;  %v691_v9 = vld [vmem:[%s795_s1 + $0x38] sm:$0xff] (!%p169_p2)  }
   0x8   : > { %638 = vmatprep.subr.bf16.mxu0 (!%p169_p2), %v685_v1  ;;  %661 = vmatprep.subr.bf16.mxu1 (!%p169_p2), %v685_v1 }
   0xb   : > { %639 = vmatpush3.bf16.msra.mxu0 (!%p169_p2), %v685_v1  ;;  %669 = vmatpush3.bf16.msra.mxu1 (!%p169_p2), %v685_v1 }
   0xc   : > { %640 = vmatprep.subr.bf16.mxu0 (!%p169_p2), %v686_v2  ;;  %662 = vmatprep.subr.bf16.mxu1 (!%p169_p2), %v686_v2 }
   0xd   : > { %s800_s19 = smov (!%p201_p3, %s567_s19), 15  ;;  %s802_s16 = smov (!%p212_p4, %s735_s16), 1 }
   0xe   : > { %s568_s24 = sshll.u32 %s800_s19, 2  ;;  %s214_s19 = scalar_lea.vmem %s797_s3, %s802_s16 }
   0xf   : > { %s757_s27 = scalar_lea.vmem %s794_s0, %s568_s24  ;;  %641 = vmatpush3.bf16.msra.mxu0 %v686_v2  ;;  %670 = vmatpush3.bf16.msra.mxu1 %v686_v2  ;;  %s210_s14 = scalar_lea.vmem %s796_s2, %s568_s24 }
  0x10   : > { %v692_v4 = vld [vmem:[%s757_s27] sm:$0xff]   ;;  %v694_v5 = vld [vmem:[%s757_s27 + $0x10] sm:$0xff]   ;;  %642 = vmatprep.subr.bf16.mxu0 %v687_v3  ;;  %663 = vmatprep.subr.bf16.mxu1 %v687_v3  ;;  %v693_v10 = vld [vmem:[%s757_s27 + $0x8] sm:$0xff]   ;;  %s217_s22 = scalar_lea.vmem %s798_s4, %s802_s16 }
  0x11   : > { %652 = vmatprep.mubr.bf16.mxu0 %v692_v4  ;;  %656 = vmatprep.mubr.bf16.mxu1 %v694_v5  ;;  %v695_v11 = vld [vmem:[%s757_s27 + $0x18] sm:$0xff]  }
  0x13   : > { %643 = vmatpush3.bf16.msra.mxu0 %v687_v3  ;;  %671 = vmatpush3.bf16.msra.mxu1 %v687_v3 }
  0x14   : > { %644 = vmatprep.subr.bf16.mxu0 %v688_v6  ;;  %664 = vmatprep.subr.bf16.mxu1 %v688_v6 }
  0x17   : > { %645 = vmatpush3.bf16.msra.mxu0 %v688_v6  ;;  %672 = vmatpush3.bf16.msra.mxu1 %v688_v6 }
  0x18   : > { %646 = vmatprep.subr.bf16.mxu0 %v689_v7  ;;  %665 = vmatprep.subr.bf16.mxu1 %v689_v7 }
  0x1b   : > { %647 = vmatpush3.bf16.msra.mxu0 %v689_v7  ;;  %673 = vmatpush3.bf16.msra.mxu1 %v689_v7 }
  0x1c   : > { %648 = vmatprep.subr.bf16.mxu0 %v690_v8  ;;  %666 = vmatprep.subr.bf16.mxu1 %v690_v8 }
  0x1f   : > { %649 = vmatpush3.bf16.msra.mxu0 %v690_v8  ;;  %674 = vmatpush3.bf16.msra.mxu1 %v690_v8 }
  0x20   : > { %650 = vmatprep.subr.bf16.mxu0 %v691_v9  ;;  %667 = vmatprep.subr.bf16.mxu1 %v691_v9 }
  0x23   : > { %651 = vmatpush3.bf16.msra.mxu0 %v691_v9  ;;  %675 = vmatpush3.bf16.msra.mxu1 %v691_v9 }
  0x26   : > { %653 = vmatmul.mubr.bf16.vlgmr.msra.gmra.mrb[0].mxu0 %v693_v10  ;;  %657 = vmatmul.mubr.bf16.vlgmr.msra.gmra.mrb[0].mxu1 %v695_v11 }
  0xf9   : > { %v654_v12 = vpop.f32.mrb[0].mxu0  ;;  %v658_v13 = vpop.f32.mrb[0].mxu1 }
  0xfa   : > { %v349_v14 = vpop.f32.mrb[1].mxu0  ;;  %v365_v15 = vpop.f32.mrb[1].mxu1  ;;  %v436_v27 = vmul.f32 %v654_v12, %v654_v12  ;;  %v440_v39 = vmul.f32 %v658_v13, %v658_v13 }
  0xfb   : > { %v655_v16 = vpop.f32.mrb[2].mxu0  ;;  %v659_v17 = vpop.f32.mrb[2].mxu1  ;;  %v434_v18 = vmul.f32 %v349_v14, %v349_v14  ;;  %v438_v33 = vmul.f32 %v365_v15, %v365_v15 }
  0xfc   : > { %v609_v19 = vpack.c.bf16 %v655_v16, %v654_v12  ;;  %v352_v20 = vpop.f32.mrb[3].mxu0  ;;  %v619_v21 = vpack.c.bf16 %v659_v17, %v658_v13  ;;  %v368_v22 = vpop.f32.mrb[3].mxu1  ;;  %v437_v30 = vmul.f32 %v655_v16, %v655_v16  ;;  %v441_v42 = vmul.f32 %v659_v17, %v659_v17 }
  0xfd   : > { %v604_v23 = vpack.c.bf16 %v352_v20, %v349_v14  ;;  %v420_v24 = vadd.f32 %v352_v20, %v349_v14  ;;  %v435_v25 = vmul.f32 %v352_v20, %v352_v20  ;;  %v614_v26 = vpack.c.bf16 %v368_v22, %v365_v15 }
  0xfe   : > { %621 = vst [vmem:[%s210_s14 + $0x8] sm:$0xff] %v609_v19   ;;  %623 = vst [vmem:[%s210_s14 + $0x18] sm:$0xff] %v619_v21   ;;  %v439_v38 = vmul.f32 %v368_v22, %v368_v22 }
  0xff   : > { %605 = vst [vmem:[%s210_s14] sm:$0xff] %v604_v23   ;;  %v421_v28 = vadd.f32 %v654_v12, %v420_v24  ;;  %v442_v29 = vadd.f32 %v435_v25, %v434_v18  ;;  %622 = vst [vmem:[%s210_s14 + $0x10] sm:$0xff] %v614_v26  }
 0x101   : > { %v443_v31 = vadd.f32 %v442_v29, %v436_v27  ;;  %v422_v32 = vadd.f32 %v655_v16, %v421_v28 }
 0x103   : > { %v423_v34 = vadd.f32 %v422_v32, %v365_v15  ;;  %v444_v35 = vadd.f32 %v443_v31, %v437_v30 }
 0x105   : > { %v445_v36 = vadd.f32 %v444_v35, %v438_v33  ;;  %v424_v37 = vadd.f32 %v423_v34, %v368_v22 }
 0x107   : > { %v425_v40 = vadd.f32 %v658_v13, %v424_v37  ;;  %v446_v41 = vadd.f32 %v445_v36, %v439_v38 }
 0x109   : > { %v426_v43 = vadd.f32 %v659_v17, %v425_v40  ;;  %v447_v44 = vadd.f32 %v446_v41, %v440_v39 }
 0x10b   : > { %v427_v45 = vrot.slane %v426_v43, 4  ;;  %v448_v46 = vadd.f32 %v447_v44, %v441_v42 }
 0x10d   : > { %v428_v47 = vadd.f32 %v427_v45, %v426_v43  ;;  %v449_v48 = vrot.slane %v448_v46, 4 }
 0x10f   : > { %v429_v49 = vrot.slane %v428_v47, 2  ;;  %v450_v50 = vadd.f32 %v449_v48, %v448_v46 }
 0x111   : > { %v430_v51 = vadd.f32 %v429_v49, %v428_v47  ;;  %v451_v52 = vrot.slane %v450_v50, 2 }
 0x113   : > { %v431_v53 = vrot.slane %v430_v51, 1  ;;  %v452_v54 = vadd.f32 %v451_v52, %v450_v50 }
 0x115   : > { %v432_v55 = vadd.f32 %v431_v53, %v430_v51  ;;  %v453_v56 = vrot.slane %v452_v54, 1 }
 0x117   : > { %433 = vst [vmem:[%s214_s19] sm:$0x1] %v432_v55  ;;  %v454_v57 = vadd.f32 %v453_v56, %v452_v54 }
 0x119   : > { %455 = vst [vmem:[%s217_s22] sm:$0x1] %v454_v57 }
 0x11a PF: > { %s15_s15 = sadd.s32 1, %s702_s15  }
 0x11b   : > { %p12_p5 = scmp.ge.s32.totalorder %s15_s15, 4  }
 0x11d   :  { %14 = sbr.rel (!%p12_p5) target bundleno = 1 (0x1), region = 82 }

// kernel: _lambda_.46
= control target key start
LH: loop header
LB: loop body
LE: loop exit
PB: predicated region body
PF: predicated region fallthrough
CT: control target
= control target key end

     0   :  { %s480_s15 = smov 0   ;;  %s522_s0 = inlined_call_operand.vmem [shape: bf16[128,128], index: 0, kind: input, shape index: {}]   ;;  %s523_s1 = inlined_call_operand.vmem [shape: f32[2,1,128], index: 1, kind: input, shape index: {}]   ;;  %s524_s2 = inlined_call_operand.vmem [shape: f32[2,1,128], index: 2, kind: input, shape index: {}]   ;;  %s525_s3 = inlined_call_operand.vmem [shape: f32[2,128], index: 3, kind: input, shape index: {}]   ;;  %s526_s4 = inlined_call_operand.vmem [shape: bf16[128,128], index: 4, kind: output, shape index: {}]  }
   0x1 LB: > { %s368_s16 = sadd.s32 4294967295, %s453_s15   ;;  %p372_p0 = scmp.ge.s32.totalorder %s453_s15, 1  ;;  %s453_s15 = sphi %s480_s15, %s14_s15  }
   0x2   : > { %p163_p1 = scmp.lt.s32.totalorder %s453_s15, 3 }
   0x4   : > { %p164_p2 = pnand %p372_p0, %p163_p1 }
   0x5   : > { %v201_v0 = vld [vmem:[%s523_s1] sm:$0x1] (!%p164_p2)  ;;  %v202_v1 = vld [vmem:[%s523_s1 + $0x1] sm:$0x1] (!%p164_p2)  ;;  %vm203_vm0 = vcmask (!%p164_p2), 1040384   ;;  %s373_s25 = sshll.u32 (!%p164_p2), %s368_s16, 3  ;;  %v240_v16 = vlaneseq (!%p164_p2) }
   0x6   : > { %167 = sbr.rel (%p164_p2) target bundleno = 46 (0x2e), region = 36  ;;  %v204_v2 = vsel (!%p164_p2), %vm203_vm0, %v201_v0, 0.0  ;;  %v205_v3 = vsel (!%p164_p2), %vm203_vm0, %v202_v1, 0.0  ;;  %v208_v4 = vld [vmem:[%s524_s2] sm:$0x1] (!%p164_p2)  ;;  %p190_p3 = scmp.lt.s32.totalorder (!%p164_p2), %s373_s25, 15 }
   0x7   : > { %v206_v5 = vadd.f32 (!%p164_p2), %v205_v3, %v204_v2  ;;  %v209_v6 = vld [vmem:[%s524_s2 + $0x1] sm:$0x1] (!%p164_p2)  ;;  %v210_v7 = vsel (!%p164_p2), %vm203_vm0, %v208_v4, 0.0  ;;  %v241_v17 = vshrl.u32 (!%p164_p2), %v240_v16, 7  ;;  %v217_v18 = vld [vmem:[%s525_s3] sm:$0x1] (!%p164_p2) }
   0x8   : > { %v211_v8 = vsel (!%p164_p2), %vm203_vm0, %v209_v6, 0.0  ;;  %v221_v29 = vld [vmem:[%s525_s3 + $0x1] sm:$0x1] (!%p164_p2) }
   0x9   : > { %v207_v9 = vmul.f32 (!%p164_p2), 0.0078125, %v206_v5  ;;  %v212_v10 = vadd.f32 (!%p164_p2), %v211_v8, %v210_v7  ;;  %v242_v21 = vsub.s32 (!%p164_p2), 0, %v241_v17 }
   0xb   : > { %v213_v11 = vmul.f32 (!%p164_p2), 0.0078125, %v212_v10  ;;  %v214_v12 = vmul.f32 (!%p164_p2), %v207_v9, %v207_v9 }
   0xd   : > { %v215_v13 = vsub.f32 %v213_v11, %v214_v12  ;;  %s528_s25 = smov (!%p190_p3, %s373_s25), 15 }
   0xe   : > { %s374_s26 = sshll.u32 %s528_s25, 2 }
   0xf   : > { %v216_v14 = vmax.f32 %v215_v13, 0.0  ;;  %s193_s29 = scalar_lea.vmem %s522_s0, %s374_s26  ;;  %s199_s10 = scalar_lea.vmem %s526_s4, %s374_s26 }
  0x10   : > { %v396_v19 = vld [vmem:[%s193_s29] sm:$0xff]   ;;  %v431_v20 = vld [vmem:[%s193_s29 + $0x8] sm:$0xff]   ;;  %v432_v22 = vld [vmem:[%s193_s29 + $0x10] sm:$0xff]  }
  0x11   : > { %v218_v15 = vadd.f32 1e-05, %v216_v14  ;;  %v433_v23 = vld [vmem:[%s193_s29 + $0x18] sm:$0xff]   ;;  %v397_v26 = vunpack.c.l.bf16 %v396_v19  ;;  %v398_v27 = vunpack.c.h.bf16 %v396_v19  ;;  %v401_v28 = vunpack.c.l.bf16 %v431_v20 }
  0x12   : > { %v402_v30 = vunpack.c.h.bf16 %v431_v20  ;;  %v405_v31 = vunpack.c.l.bf16 %v432_v22  ;;  %v406_v32 = vunpack.c.h.bf16 %v432_v22  ;;  %v409_v33 = vunpack.c.l.bf16 %v433_v23 }
  0x13   : > { %445 = vrsqrt.f32 %v218_v15  ;;  %v410_v36 = vunpack.c.h.bf16 %v433_v23 }
  0x1d   : > { %v446_v24 = vpop.eup %445 }
  0x1e   : > { %v220_v25 = vmul.f32 %v446_v24, %v217_v18 }
  0x20   : > { %v222_v34 = vmul.f32 %v220_v25, %v207_v9  ;;  %v243_v35 = vrot.slane %v220_v25, %v242_v21 }
  0x22   : > { %v223_v37 = vsub.f32 %v221_v29, %v222_v34  ;;  %v244_v38 = vmul.f32 %v397_v26, %v243_v35  ;;  %v245_v39 = vmul.f32 %v398_v27, %v243_v35  ;;  %v246_v40 = vmul.f32 %v401_v28, %v243_v35 }
  0x23   : > { %v247_v41 = vmul.f32 %v402_v30, %v243_v35  ;;  %v248_v42 = vmul.f32 %v405_v31, %v243_v35  ;;  %v249_v43 = vmul.f32 %v406_v32, %v243_v35  ;;  %v250_v44 = vmul.f32 %v409_v33, %v243_v35 }
  0x24   : > { %v255_v45 = vrot.slane %v223_v37, %v242_v21  ;;  %v251_v46 = vmul.f32 %v410_v36, %v243_v35 }
  0x26   : > { %v256_v47 = vadd.f32 %v255_v45, %v244_v38  ;;  %v257_v48 = vadd.f32 %v255_v45, %v245_v39  ;;  %v258_v49 = vadd.f32 %v255_v45, %v246_v40  ;;  %v259_v50 = vadd.f32 %v255_v45, %v247_v41 }
  0x27   : > { %v260_v51 = vadd.f32 %v255_v45, %v248_v42  ;;  %v261_v52 = vadd.f32 %v255_v45, %v249_v43  ;;  %v262_v53 = vadd.f32 %v255_v45, %v250_v44  ;;  %v263_v54 = vadd.f32 %v255_v45, %v251_v46 }
  0x28   : > { %v264_v55 = vmax.f32 %v256_v47, 0.0  ;;  %v265_v56 = vmax.f32 %v257_v48, 0.0  ;;  %v266_v57 = vmax.f32 %v258_v49, 0.0  ;;  %v267_v58 = vmax.f32 %v259_v50, 0.0 }
  0x29   : > { %v268_v59 = vmax.f32 %v260_v51, 0.0  ;;  %v269_v60 = vmax.f32 %v261_v52, 0.0  ;;  %v270_v61 = vmax.f32 %v262_v53, 0.0  ;;  %v271_v62 = vmax.f32 %v263_v54, 0.0 }
  0x2a   : > { %v414_v63 = vpack.c.bf16 %v265_v56, %v264_v55  ;;  %v419_v0 = vpack.c.bf16 %v267_v58, %v266_v57 }
  0x2b   : > { %v424_v1 = vpack.c.bf16 %v269_v60, %v268_v59  ;;  %v429_v2 = vpack.c.bf16 %v271_v62, %v270_v61 }
  0x2c   : > { %415 = vst [vmem:[%s199_s10] sm:$0xff] %v414_v63   ;;  %434 = vst [vmem:[%s199_s10 + $0x8] sm:$0xff] %v419_v0  }
  0x2d   : > { %435 = vst [vmem:[%s199_s10 + $0x10] sm:$0xff] %v424_v1   ;;  %436 = vst [vmem:[%s199_s10 + $0x18] sm:$0xff] %v429_v2  }
  0x2e PF: > { %s14_s15 = sadd.s32 1, %s453_s15  }
  0x2f   : > { %p11_p4 = scmp.ge.s32.totalorder %s14_s15, 4  }
  0x31   :  { %13 = sbr.rel (!%p11_p4) target bundleno = 1 (0x1), region = 66 }

// kernel: _lambda_.45
= control target key start
LH: loop header
LB: loop body
LE: loop exit
PB: predicated region body
PF: predicated region fallthrough
CT: control target
= control target key end

     0   :  { %s2065_s15 = smov 0   ;;  %s2354_s0 = inlined_call_operand.vmem [shape: bf16[128,1152], index: 0, kind: input, shape index: {}]   ;;  %s2355_s1 = inlined_call_operand.vmem [shape: bf16[1152,128], index: 1, kind: input, shape index: {}]   ;;  %s2356_s2 = inlined_call_operand.vmem [shape: bf16[128,128], index: 2, kind: output, shape index: {0}]   ;;  %s2357_s3 = inlined_call_operand.vmem [shape: f32[2,1,128], index: 3, kind: output, shape index: {1}]   ;;  %s2358_s4 = inlined_call_operand.vmem [shape: f32[2,1,128], index: 4, kind: output, shape index: {2}]  }
   0x1 LB: > { %s2071_s16 = sadd.s32 4294967295, %s2038_s15   ;;  %p1533_p0 = scmp.ge.s32.totalorder %s2038_s15, 1  ;;  %s2038_s15 = sphi %s2065_s15, %s15_s15  }
   0x2   : > { %p169_p1 = scmp.lt.s32.totalorder %s2038_s15, 3 }
   0x4   : > { %p170_p2 = pnand %p1533_p0, %p169_p1 }
   0x5   : > { %v1908_v0 = vld [vmem:[%s2355_s1 + $0x40] sm:$0xff] (!%p170_p2)   ;;  %v1912_v4 = vld [vmem:[%s2355_s1 + $0x48] sm:$0xff] (!%p170_p2)   ;;  %v1916_v8 = vld [vmem:[%s2355_s1 + $0x50] sm:$0xff] (!%p170_p2)   ;;  %s1534_s23 = sshll.u32 (!%p170_p2), %s2071_s16, 3  ;;  %p215_p4 = scmp.lt.s32.totalorder (!%p170_p2), %s2071_s16, 1 }
   0x6   : > { %173 = sbr.rel (%p170_p2) target bundleno = 350 (0x15e), region = 28  ;;  %v1909_v1 = vld [vmem:[%s2355_s1 + $0xc0] sm:$0xff] (!%p170_p2)   ;;  %1687 = vmatprep.subr.bf16.mxu0 (!%p170_p2), %v1908_v0  ;;  %v1913_v5 = vld [vmem:[%s2355_s1 + $0xc8] sm:$0xff] (!%p170_p2)   ;;  %v1917_v9 = vld [vmem:[%s2355_s1 + $0xd0] sm:$0xff] (!%p170_p2)   ;;  %p203_p3 = scmp.lt.s32.totalorder (!%p170_p2), %s1534_s23, 15 }
   0x7   : > { %v1910_v2 = vld [vmem:[%s2355_s1] sm:$0xff] (!%p170_p2)   ;;  %1727 = vmatprep.subr.bf16.mxu1 (!%p170_p2), %v1909_v1  ;;  %v1914_v6 = vld [vmem:[%s2355_s1 + $0x8] sm:$0xff] (!%p170_p2)   ;;  %v1918_v10 = vld [vmem:[%s2355_s1 + $0x10] sm:$0xff] (!%p170_p2)  }
   0x8   : > { %v1911_v3 = vld [vmem:[%s2355_s1 + $0x80] sm:$0xff] (!%p170_p2)   ;;  %1688 = vmatpush3.bf16.msra.mxu0 (!%p170_p2), %v1910_v2  ;;  %v1915_v7 = vld [vmem:[%s2355_s1 + $0x88] sm:$0xff] (!%p170_p2)   ;;  %v1919_v11 = vld [vmem:[%s2355_s1 + $0x90] sm:$0xff] (!%p170_p2)  }
   0x9   : > { %1728 = vmatpush3.bf16.msra.mxu1 (!%p170_p2), %v1911_v3  ;;  %1689 = vmatprep.subr.bf16.mxu0 (!%p170_p2), %v1912_v4  ;;  %v1920_v12 = vld [vmem:[%s2355_s1 + $0x58] sm:$0xff] (!%p170_p2)   ;;  %v1924_v16 = vld [vmem:[%s2355_s1 + $0x60] sm:$0xff] (!%p170_p2)   ;;  %v1928_v20 = vld [vmem:[%s2355_s1 + $0x68] sm:$0xff] (!%p170_p2)  }
   0xa   : > { %1729 = vmatprep.subr.bf16.mxu1 (!%p170_p2), %v1913_v5  ;;  %v1921_v13 = vld [vmem:[%s2355_s1 + $0xd8] sm:$0xff] (!%p170_p2)   ;;  %v1925_v17 = vld [vmem:[%s2355_s1 + $0xe0] sm:$0xff] (!%p170_p2)   ;;  %v1929_v21 = vld [vmem:[%s2355_s1 + $0xe8] sm:$0xff] (!%p170_p2)  }
   0xb   : > { %v1922_v14 = vld [vmem:[%s2355_s1 + $0x18] sm:$0xff] (!%p170_p2)   ;;  %v1926_v18 = vld [vmem:[%s2355_s1 + $0x20] sm:$0xff] (!%p170_p2)   ;;  %v1930_v22 = vld [vmem:[%s2355_s1 + $0x28] sm:$0xff] (!%p170_p2)  }
   0xc   : > { %1690 = vmatpush3.bf16.msra.mxu0 (!%p170_p2), %v1914_v6  ;;  %v1923_v15 = vld [vmem:[%s2355_s1 + $0x98] sm:$0xff] (!%p170_p2)   ;;  %v1927_v19 = vld [vmem:[%s2355_s1 + $0xa0] sm:$0xff] (!%p170_p2)   ;;  %v1931_v23 = vld [vmem:[%s2355_s1 + $0xa8] sm:$0xff] (!%p170_p2)  }
   0xd   : > { %1730 = vmatpush3.bf16.msra.mxu1 %v1915_v7  ;;  %1691 = vmatprep.subr.bf16.mxu0 %v1916_v8  ;;  %s2360_s23 = smov (!%p203_p3, %s1534_s23), 15  ;;  %v1932_v24 = vld [vmem:[%s2355_s1 + $0x70] sm:$0xff]   ;;  %v1936_v28 = vld [vmem:[%s2355_s1 + $0x78] sm:$0xff]   ;;  %v1946_v36 = vld [vmem:[%s2355_s1 + $0x140] sm:$0xff]   ;;  %s2362_s16 = smov (!%p215_p4, %s2071_s16), 1 }
   0xe   : > { %1731 = vmatprep.subr.bf16.mxu1 %v1917_v9  ;;  %v1933_v25 = vld [vmem:[%s2355_s1 + $0xf0] sm:$0xff]   ;;  %s1899_s22 = smul.u32 36, %s2360_s23  ;;  %v1937_v29 = vld [vmem:[%s2355_s1 + $0xf8] sm:$0xff]   ;;  %v1947_v37 = vld [vmem:[%s2355_s1 + $0x1c0] sm:$0xff]   ;;  %s217_s9 = scalar_lea.vmem %s2357_s3, %s2362_s16 }
   0xf   : > { %v1934_v26 = vld [vmem:[%s2355_s1 + $0x30] sm:$0xff]   ;;  %v1938_v30 = vld [vmem:[%s2355_s1 + $0x38] sm:$0xff]   ;;  %v1948_v38 = vld [vmem:[%s2355_s1 + $0x100] sm:$0xff]   ;;  %s220_s12 = scalar_lea.vmem %s2358_s4, %s2362_s16 }
  0x10   : > { %1692 = vmatpush3.bf16.msra.mxu0 %v1918_v10  ;;  %v1935_v27 = vld [vmem:[%s2355_s1 + $0xb0] sm:$0xff]   ;;  %s2172_s8 = scalar_lea.vmem %s2354_s0, %s1899_s22  ;;  %v1939_v31 = vld [vmem:[%s2355_s1 + $0xb8] sm:$0xff]   ;;  %v1949_v39 = vld [vmem:[%s2355_s1 + $0x180] sm:$0xff]  }
  0x11   : > { %1732 = vmatpush3.bf16.msra.mxu1 %v1919_v11  ;;  %1693 = vmatprep.subr.bf16.mxu0 %v1920_v12  ;;  %v1940_v32 = vld [vmem:[%s2172_s8] ss:$36 sps:$4 sm:$0xff]   ;;  %v1943_v34 = vld [vmem:[%s2172_s8 + $0x8] ss:$36 sps:$4 sm:$0xff]   ;;  %v1956_v45 = vld [vmem:[%s2172_s8 + $0x54] ss:$36 sps:$4 sm:$0xff]  }
  0x12   : > { %1733 = vmatprep.subr.bf16.mxu1 %v1921_v13  ;;  %v1942_v33 = vld [vmem:[%s2172_s8 + $0x4] ss:$36 sps:$4 sm:$0xff]   ;;  %v1945_v35 = vld [vmem:[%s2172_s8 + $0xc] ss:$36 sps:$4 sm:$0xff]   ;;  %v1964_v52 = vld [vmem:[%s2355_s1 + $0x158] sm:$0xff]  }
  0x13   : > { %1054 = vmatprep.mubr.bf16.mxu0 %v1942_v33  ;;  %1119 = vmatprep.mubr.bf16.mxu1 %v1945_v35  ;;  %v1950_v40 = vld [vmem:[%s2355_s1 + $0x148] sm:$0xff]   ;;  %v1959_v47 = vld [vmem:[%s2172_s8 + $0x50] ss:$36 sps:$4 sm:$0xff]   ;;  %v1965_v53 = vld [vmem:[%s2355_s1 + $0x1d8] sm:$0xff]  }
  0x14   : > { %1694 = vmatpush3.bf16.msra.mxu0 %v1922_v14  ;;  %v1951_v41 = vld [vmem:[%s2355_s1 + $0x1c8] sm:$0xff]   ;;  %v1960_v48 = vld [vmem:[%s2355_s1 + $0x150] sm:$0xff]   ;;  %v1966_v54 = vld [vmem:[%s2355_s1 + $0x118] sm:$0xff]  }
  0x15   : > { %1734 = vmatpush3.bf16.msra.mxu1 %v1923_v15  ;;  %1695 = vmatprep.subr.bf16.mxu0 %v1924_v16  ;;  %v1952_v42 = vld [vmem:[%s2355_s1 + $0x108] sm:$0xff]   ;;  %v1961_v49 = vld [vmem:[%s2355_s1 + $0x1d0] sm:$0xff]   ;;  %v1967_v55 = vld [vmem:[%s2355_s1 + $0x198] sm:$0xff]  }
  0x16   : > { %1735 = vmatprep.subr.bf16.mxu1 %v1925_v17  ;;  %v1953_v43 = vld [vmem:[%s2355_s1 + $0x188] sm:$0xff]   ;;  %v1962_v50 = vld [vmem:[%s2355_s1 + $0x110] sm:$0xff]   ;;  %v1970_v57 = vld [vmem:[%s2172_s8 + $0x9c] ss:$36 sps:$4 sm:$0xff]  }
  0x17   : > { %v1954_v44 = vld [vmem:[%s2172_s8 + $0x4c] ss:$36 sps:$4 sm:$0xff]   ;;  %v1968_v56 = vld [vmem:[%s2172_s8 + $0x94] ss:$36 sps:$4 sm:$0xff]   ;;  %v1974_v60 = vld [vmem:[%s2355_s1 + $0x160] sm:$0xff]  }
  0x18   : > { %1696 = vmatpush3.bf16.msra.mxu0 %v1926_v18  ;;  %v1958_v46 = vld [vmem:[%s2172_s8 + $0x48] ss:$36 sps:$4 sm:$0xff]   ;;  %v1963_v51 = vld [vmem:[%s2355_s1 + $0x190] sm:$0xff]   ;;  %v1973_v59 = vld [vmem:[%s2172_s8 + $0x98] ss:$36 sps:$4 sm:$0xff]  }
  0x19   : > { %1736 = vmatpush3.bf16.msra.mxu1 %v1927_v19  ;;  %1697 = vmatprep.subr.bf16.mxu0 %v1928_v20  ;;  %v1972_v58 = vld [vmem:[%s2172_s8 + $0x90] ss:$36 sps:$4 sm:$0xff]   ;;  %v1975_v61 = vld [vmem:[%s2355_s1 + $0x1e0] sm:$0xff]   ;;  %v1978_v0 = vld [vmem:[%s2355_s1 + $0x168] sm:$0xff]  }
  0x1a   : > { %1737 = vmatprep.subr.bf16.mxu1 %v1929_v21  ;;  %v1976_v62 = vld [vmem:[%s2355_s1 + $0x120] sm:$0xff]   ;;  %v1979_v1 = vld [vmem:[%s2355_s1 + $0x1e8] sm:$0xff]   ;;  %v1986_v6 = vld [vmem:[%s2172_s8 + $0xd8] ss:$36 sps:$4 sm:$0xff]  }
  0x1b   : > { %v1977_v63 = vld [vmem:[%s2355_s1 + $0x1a0] sm:$0xff]   ;;  %v1980_v2 = vld [vmem:[%s2355_s1 + $0x128] sm:$0xff]   ;;  %v1988_v8 = vld [vmem:[%s2355_s1 + $0x170] sm:$0xff]  }
  0x1c   : > { %1698 = vmatpush3.bf16.msra.mxu0 %v1930_v22  ;;  %v1981_v3 = vld [vmem:[%s2355_s1 + $0x1a8] sm:$0xff]   ;;  %v1982_v4 = vld [vmem:[%s2172_s8 + $0xdc] ss:$36 sps:$4 sm:$0xff]   ;;  %v1989_v9 = vld [vmem:[%s2355_s1 + $0x1f0] sm:$0xff]  }
  0x1d   : > { %1738 = vmatpush3.bf16.msra.mxu1 %v1931_v23  ;;  %1699 = vmatprep.subr.bf16.mxu0 %v1932_v24  ;;  %v1984_v5 = vld [vmem:[%s2172_s8 + $0xe4] ss:$36 sps:$4 sm:$0xff]   ;;  %v1990_v10 = vld [vmem:[%s2355_s1 + $0x130] sm:$0xff]   ;;  %v1992_v12 = vld [vmem:[%s2355_s1 + $0x178] sm:$0xff]  }
  0x1e   : > { %1739 = vmatprep.subr.bf16.mxu1 %v1933_v25  ;;  %v1987_v7 = vld [vmem:[%s2172_s8 + $0xe0] ss:$36 sps:$4 sm:$0xff]   ;;  %v1991_v11 = vld [vmem:[%s2355_s1 + $0x1b0] sm:$0xff]   ;;  %v1993_v13 = vld [vmem:[%s2355_s1 + $0x1f8] sm:$0xff]  }
  0x1f   : > { %v1994_v14 = vld [vmem:[%s2355_s1 + $0x138] sm:$0xff]   ;;  %v1996_v16 = vld [vmem:[%s2172_s8 + $0x10] ss:$36 sps:$4 sm:$0xff]   ;;  %v2002_v20 = vld [vmem:[%s2355_s1 + $0x200] sm:$0xff]  }
  0x20   : > { %1700 = vmatpush3.bf16.msra.mxu0 %v1934_v26  ;;  %v1995_v15 = vld [vmem:[%s2355_s1 + $0x1b8] sm:$0xff]   ;;  %v2003_v21 = vld [vmem:[%s2355_s1 + $0x208] sm:$0xff]   ;;  %v2009_v25 = vld [vmem:[%s2172_s8 + $0x60] ss:$36 sps:$4 sm:$0xff]  }
  0x21   : > { %1740 = vmatpush3.bf16.msra.mxu1 %v1935_v27  ;;  %1701 = vmatprep.subr.bf16.mxu0 %v1936_v28  ;;  %v1998_v17 = vld [vmem:[%s2172_s8 + $0x14] ss:$36 sps:$4 sm:$0xff]   ;;  %v2001_v19 = vld [vmem:[%s2172_s8 + $0x1c] ss:$36 sps:$4 sm:$0xff]   ;;  %v2006_v23 = vld [vmem:[%s2172_s8 + $0x64] ss:$36 sps:$4 sm:$0xff]  }
  0x22   : > { %1741 = vmatprep.subr.bf16.mxu1 %v1937_v29  ;;  %v1999_v18 = vld [vmem:[%s2172_s8 + $0x18] ss:$36 sps:$4 sm:$0xff]   ;;  %v2010_v26 = vld [vmem:[%s2355_s1 + $0x210] sm:$0xff]   ;;  %v2012_v27 = vld [vmem:[%s2172_s8 + $0xa4] ss:$36 sps:$4 sm:$0xff]  }
  0x23   : > { %v2004_v22 = vld [vmem:[%s2172_s8 + $0x5c] ss:$36 sps:$4 sm:$0xff]   ;;  %v2014_v28 = vld [vmem:[%s2172_s8 + $0xac] ss:$36 sps:$4 sm:$0xff]  }
  0x24   : > { %1702 = vmatpush3.bf16.msra.mxu0 %v1938_v30  ;;  %v2008_v24 = vld [vmem:[%s2172_s8 + $0x58] ss:$36 sps:$4 sm:$0xff]   ;;  %v2016_v30 = vld [vmem:[%s2172_s8 + $0xa0] ss:$36 sps:$4 sm:$0xff]   ;;  %v2020_v33 = vld [vmem:[%s2172_s8 + $0xec] ss:$36 sps:$4 sm:$0xff]  }
  0x25   : > { %1742 = vmatpush3.bf16.msra.mxu1 %v1939_v31  ;;  %1767 = vmatprep.subr.bf16.mxu0 %v1946_v36  ;;  %v2011_v29 = vld [vmem:[%s2355_s1 + $0x218] sm:$0xff]   ;;  %v2017_v31 = vld [vmem:[%s2172_s8 + $0xa8] ss:$36 sps:$4 sm:$0xff]  }
  0x26   : > { %1807 = vmatprep.subr.bf16.mxu1 %v1947_v37  ;;  %v2019_v35 = vld [vmem:[%s2355_s1 + $0x228] sm:$0xff]   ;;  %v2026_v37 = vld [vmem:[%s2355_s1 + $0x230] sm:$0xff]  }
  0x27   : > { %1055 = vmatmul.mubr.bf16.vlgmr.msra.gmra.mrb[0].mxu0 %v1940_v32  ;;  %v2018_v32 = vld [vmem:[%s2355_s1 + $0x220] sm:$0xff]   ;;  %v2024_v36 = vld [vmem:[%s2172_s8 + $0xe8] ss:$36 sps:$4 sm:$0xff]  }
  0x28   : > { %1120 = vmatmul.mubr.bf16.vlgmr.msra.gmra.mrb[0].mxu1 %v1943_v34  ;;  %1768 = vmatpush3.bf16.msra.mxu0 %v1948_v38  ;;  %v2022_v34 = vld [vmem:[%s2172_s8 + $0xf4] ss:$36 sps:$4 sm:$0xff]  }
  0x29   : > { %1808 = vmatpush3.bf16.msra.mxu1 %v1949_v39  ;;  %1769 = vmatprep.subr.bf16.mxu0 %v1950_v40  ;;  %v2025_v38 = vld [vmem:[%s2172_s8 + $0xf0] ss:$36 sps:$4 sm:$0xff]   ;;  %v2028_v39 = vld [vmem:[%s2172_s8 + $0x20] ss:$36 sps:$4 sm:$0xff]  }
  0x2a   : > { %1809 = vmatprep.subr.bf16.mxu1 %v1951_v41  ;;  %1062 = vmatprep.mubr.bf16.mxu0 %v1954_v44  ;;  %v2029_v40 = vld [vmem:[%s2172_s8 + $0xb0] ss:$36 sps:$4 sm:$0xff]   ;;  %v2027_v41 = vld [vmem:[%s2355_s1 + $0x238] sm:$0xff]  }
  0x2b   : > { %1127 = vmatprep.mubr.bf16.mxu1 %v1956_v45 }
  0x2c   : > { %1770 = vmatpush3.bf16.msra.mxu0 %v1952_v42  ;;  %v2030_v42 = vld [vmem:[%s2172_s8 + $0x68] ss:$36 sps:$4 sm:$0xff]  }
  0x2d   : > { %1810 = vmatpush3.bf16.msra.mxu1 %v1953_v43  ;;  %1771 = vmatprep.subr.bf16.mxu0 %v1960_v48  ;;  %v2031_v43 = vld [vmem:[%s2172_s8 + $0xf8] ss:$36 sps:$4 sm:$0xff]   ;;  %s1537_s8 = sshll.u32 %s2360_s23, 2 }
  0x2e   : > { %1811 = vmatprep.subr.bf16.mxu1 %v1961_v49  ;;  %s213_s6 = scalar_lea.vmem %s2356_s2, %s1537_s8 }
  0x2f   : > { %1063 = vmatmul.mubr.bf16.gmra.mrb[4].mxu0 %v1958_v46 }
  0x30   : > { %1128 = vmatmul.mubr.bf16.gmra.mrb[4].mxu1 %v1959_v47  ;;  %1772 = vmatpush3.bf16.msra.mxu0 %v1962_v50 }
  0x31   : > { %1812 = vmatpush3.bf16.msra.mxu1 %v1963_v51  ;;  %1773 = vmatprep.subr.bf16.mxu0 %v1964_v52 }
  0x32   : > { %1813 = vmatprep.subr.bf16.mxu1 %v1965_v53  ;;  %1070 = vmatprep.mubr.bf16.mxu0 %v1968_v56 }
  0x33   : > { %1135 = vmatprep.mubr.bf16.mxu1 %v1970_v57 }
  0x34   : > { %1774 = vmatpush3.bf16.msra.mxu0 %v1966_v54 }
  0x35   : > { %1814 = vmatpush3.bf16.msra.mxu1 %v1967_v55  ;;  %1775 = vmatprep.subr.bf16.mxu0 %v1974_v60 }
  0x36   : > { %1815 = vmatprep.subr.bf16.mxu1 %v1975_v61 }
  0x37   : > { %1071 = vmatmul.mubr.bf16.gmra.mrb[8].mxu0 %v1972_v58 }
  0x38   : > { %1136 = vmatmul.mubr.bf16.gmra.mrb[8].mxu1 %v1973_v59  ;;  %1776 = vmatpush3.bf16.msra.mxu0 %v1976_v62 }
  0x39   : > { %1816 = vmatpush3.bf16.msra.mxu1 %v1977_v63  ;;  %1777 = vmatprep.subr.bf16.mxu0 %v1978_v0 }
  0x3a   : > { %1817 = vmatprep.subr.bf16.mxu1 %v1979_v1  ;;  %1078 = vmatprep.mubr.bf16.mxu0 %v1982_v4 }
  0x3b   : > { %1143 = vmatprep.mubr.bf16.mxu1 %v1984_v5 }
  0x3c   : > { %1778 = vmatpush3.bf16.msra.mxu0 %v1980_v2 }
  0x3d   : > { %1818 = vmatpush3.bf16.msra.mxu1 %v1981_v3  ;;  %1779 = vmatprep.subr.bf16.mxu0 %v1988_v8 }
  0x3e   : > { %1819 = vmatprep.subr.bf16.mxu1 %v1989_v9 }
  0x3f   : > { %1079 = vmatmul.mubr.bf16.gmra.mrb[12].mxu0 %v1986_v6 }
  0x40   : > { %1144 = vmatmul.mubr.bf16.gmra.mrb[12].mxu1 %v1987_v7  ;;  %1780 = vmatpush3.bf16.msra.mxu0 %v1990_v10 }
  0x41   : > { %1820 = vmatpush3.bf16.msra.mxu1 %v1991_v11  ;;  %1781 = vmatprep.subr.bf16.mxu0 %v1992_v12 }
  0x42   : > { %1821 = vmatprep.subr.bf16.mxu1 %v1993_v13  ;;  %1184 = vmatprep.mubr.bf16.mxu0 %v1998_v17 }
  0x43   : > { %1249 = vmatprep.mubr.bf16.mxu1 %v2001_v19 }
  0x44   : > { %1782 = vmatpush3.bf16.msra.mxu0 %v1994_v14 }
  0x45   : > { %1822 = vmatpush3.bf16.msra.mxu1 %v1995_v15  ;;  %1859 = vmatprep.subr.bf16.mxu0 %v2002_v20 }
  0x46   : > { %1883 = vmatprep.subr.bf16.mxu1 %v2002_v20 }
  0x47   : > { %1185 = vmatmul.mubr.bf16.vlgmr.msra.gmra.mrb[16].mxu0 %v1996_v16 }
  0x48   : > { %1250 = vmatmul.mubr.bf16.vlgmr.msra.gmra.mrb[16].mxu1 %v1999_v18  ;;  %1860 = vmatpush3.bf16.msra.mxu0 %v2002_v20 }
  0x49   : > { %1891 = vmatpush3.bf16.msra.mxu1 %v2002_v20  ;;  %1861 = vmatprep.subr.bf16.mxu0 %v2003_v21 }
  0x4a   : > { %1884 = vmatprep.subr.bf16.mxu1 %v2003_v21  ;;  %1192 = vmatprep.mubr.bf16.mxu0 %v2004_v22 }
  0x4b   : > { %1257 = vmatprep.mubr.bf16.mxu1 %v2006_v23 }
  0x4c   : > { %1862 = vmatpush3.bf16.msra.mxu0 %v2003_v21 }
  0x4d   : > { %1892 = vmatpush3.bf16.msra.mxu1 %v2003_v21  ;;  %1863 = vmatprep.subr.bf16.mxu0 %v2010_v26 }
  0x4e   : > { %1885 = vmatprep.subr.bf16.mxu1 %v2010_v26 }
  0x4f   : > { %1193 = vmatmul.mubr.bf16.gmra.mrb[20].mxu0 %v2008_v24 }
  0x50   : > { %1258 = vmatmul.mubr.bf16.gmra.mrb[20].mxu1 %v2009_v25  ;;  %1200 = vmatprep.mubr.bf16.mxu0 %v2012_v27 }
  0x51   : > { %1864 = vmatpush3.bf16.msra.mxu0 %v2010_v26  ;;  %1265 = vmatprep.mubr.bf16.mxu1 %v2014_v28 }
  0x52   : > { %1893 = vmatpush3.bf16.msra.mxu1 %v2010_v26  ;;  %1865 = vmatprep.subr.bf16.mxu0 %v2011_v29 }
  0x53   : > { %1886 = vmatprep.subr.bf16.mxu1 %v2011_v29 }
  0x55   : > { %1866 = vmatpush3.bf16.msra.mxu0 %v2011_v29 }
  0x56   : > { %1894 = vmatpush3.bf16.msra.mxu1 %v2011_v29  ;;  %1867 = vmatprep.subr.bf16.mxu0 %v2018_v32 }
  0x57   : > { %1201 = vmatmul.mubr.bf16.gmra.mrb[24].mxu0 %v2016_v30  ;;  %1887 = vmatprep.subr.bf16.mxu1 %v2018_v32 }
  0x58   : > { %1266 = vmatmul.mubr.bf16.gmra.mrb[24].mxu1 %v2017_v31  ;;  %1208 = vmatprep.mubr.bf16.mxu0 %v2020_v33 }
  0x59   : > { %1868 = vmatpush3.bf16.msra.mxu0 %v2018_v32  ;;  %1273 = vmatprep.mubr.bf16.mxu1 %v2022_v34 }
  0x5a   : > { %1895 = vmatpush3.bf16.msra.mxu1 %v2018_v32  ;;  %1869 = vmatprep.subr.bf16.mxu0 %v2019_v35 }
  0x5b   : > { %1888 = vmatprep.subr.bf16.mxu1 %v2019_v35 }
  0x5d   : > { %1870 = vmatpush3.bf16.msra.mxu0 %v2019_v35 }
  0x5e   : > { %1896 = vmatpush3.bf16.msra.mxu1 %v2019_v35  ;;  %1871 = vmatprep.subr.bf16.mxu0 %v2026_v37 }
  0x5f   : > { %1209 = vmatmul.mubr.bf16.gmra.mrb[28].mxu0 %v2024_v36  ;;  %1889 = vmatprep.subr.bf16.mxu1 %v2026_v37 }
  0x60   : > { %1274 = vmatmul.mubr.bf16.gmra.mrb[28].mxu1 %v2025_v38  ;;  %1875 = vmatprep.mubr.bf16.mxu0 %v2028_v39 }
  0x61   : > { %1872 = vmatpush3.bf16.msra.mxu0 %v2026_v37  ;;  %1879 = vmatprep.mubr.bf16.mxu1 %v2029_v40 }
  0x62   : > { %1897 = vmatpush3.bf16.msra.mxu1 %v2026_v37  ;;  %1873 = vmatprep.subr.bf16.mxu0 %v2027_v41 }
  0x63   : > { %1890 = vmatprep.subr.bf16.mxu1 %v2027_v41 }
  0x65   : > { %1874 = vmatpush3.bf16.msra.mxu0 %v2027_v41 }
  0x66   : > { %1898 = vmatpush3.bf16.msra.mxu1 %v2027_v41 }
  0x68   : > { %1876 = vmatmul.mubr.bf16.vlgmr.msra.gmra.mrb[32].mxu0 %v2030_v42 }
  0x69   : > { %1880 = vmatmul.mubr.bf16.vlgmr.msra.gmra.mrb[32].mxu1 %v2031_v43 }
  0xfa   : > { %v1703_v44 = vpop.f32.mrb[0].mxu0 }
  0xfb   : > { %v1743_v45 = vpop.f32.mrb[0].mxu1  ;;  %v1704_v46 = vpop.f32.mrb[1].mxu0 }
  0xfc   : > { %v1705_v47 = vadd.f32 %v1704_v46, %v1703_v44  ;;  %v1744_v48 = vpop.f32.mrb[1].mxu1  ;;  %v1706_v49 = vpop.f32.mrb[2].mxu0 }
  0xfd   : > { %v1745_v50 = vadd.f32 %v1744_v48, %v1743_v45  ;;  %v1746_v51 = vpop.f32.mrb[2].mxu1  ;;  %v1707_v52 = vpop.f32.mrb[3].mxu0 }
  0xfe   : > { %v1708_v53 = vadd.f32 %v1707_v52, %v1706_v49  ;;  %v1747_v54 = vpop.f32.mrb[3].mxu1 }
  0xff   : > { %v1122_v55 = vadd.f32 %v1745_v50, %v1705_v47  ;;  %v1748_v56 = vadd.f32 %v1747_v54, %v1746_v51 }
 0x101   : > { %v1125_v57 = vadd.f32 %v1748_v56, %v1708_v53 }
 0x102   : > { %v1709_v58 = vpop.f32.mrb[4].mxu0 }
 0x103   : > { %v1749_v59 = vpop.f32.mrb[4].mxu1  ;;  %v1710_v60 = vpop.f32.mrb[5].mxu0 }
 0x104   : > { %v1711_v61 = vadd.f32 %v1710_v60, %v1709_v58  ;;  %v1750_v62 = vpop.f32.mrb[5].mxu1  ;;  %v1712_v63 = vpop.f32.mrb[6].mxu0 }
 0x105   : > { %v1751_v0 = vadd.f32 %v1750_v62, %v1749_v59  ;;  %v1752_v1 = vpop.f32.mrb[6].mxu1  ;;  %v1713_v2 = vpop.f32.mrb[7].mxu0 }
 0x106   : > { %v1714_v3 = vadd.f32 %v1713_v2, %v1712_v63  ;;  %v1753_v4 = vpop.f32.mrb[7].mxu1 }
 0x107   : > { %v1130_v5 = vadd.f32 %v1751_v0, %v1711_v61  ;;  %v1754_v6 = vadd.f32 %v1753_v4, %v1752_v1 }
 0x109   : > { %v1133_v7 = vadd.f32 %v1754_v6, %v1714_v3 }
 0x10a   : > { %v1715_v8 = vpop.f32.mrb[8].mxu0 }
 0x10b   : > { %v1755_v9 = vpop.f32.mrb[8].mxu1  ;;  %v1716_v10 = vpop.f32.mrb[9].mxu0 }
 0x10c   : > { %v1717_v11 = vadd.f32 %v1716_v10, %v1715_v8  ;;  %v1756_v12 = vpop.f32.mrb[9].mxu1  ;;  %v1718_v13 = vpop.f32.mrb[10].mxu0 }
 0x10d   : > { %v1757_v14 = vadd.f32 %v1756_v12, %v1755_v9  ;;  %v1758_v15 = vpop.f32.mrb[10].mxu1  ;;  %v1719_v16 = vpop.f32.mrb[11].mxu0 }
 0x10e   : > { %v1720_v17 = vadd.f32 %v1719_v16, %v1718_v13  ;;  %v1759_v18 = vpop.f32.mrb[11].mxu1 }
 0x10f   : > { %v1138_v19 = vadd.f32 %v1757_v14, %v1717_v11  ;;  %v1760_v20 = vadd.f32 %v1759_v18, %v1758_v15 }
 0x111   : > { %v1141_v21 = vadd.f32 %v1760_v20, %v1720_v17 }
 0x112   : > { %v1721_v22 = vpop.f32.mrb[12].mxu0 }
 0x113   : > { %v1761_v23 = vpop.f32.mrb[12].mxu1  ;;  %v1722_v24 = vpop.f32.mrb[13].mxu0 }
 0x114   : > { %v1762_v25 = vpop.f32.mrb[13].mxu1  ;;  %v1723_v26 = vadd.f32 %v1722_v24, %v1721_v22  ;;  %v1724_v28 = vpop.f32.mrb[14].mxu0 }
 0x115   : > { %v1763_v27 = vadd.f32 %v1762_v25, %v1761_v23  ;;  %v1764_v29 = vpop.f32.mrb[14].mxu1  ;;  %v1725_v30 = vpop.f32.mrb[15].mxu0 }
 0x116   : > { %v1765_v31 = vpop.f32.mrb[15].mxu1  ;;  %v1726_v33 = vadd.f32 %v1725_v30, %v1724_v28 }
 0x117   : > { %v1146_v32 = vadd.f32 %v1763_v27, %v1723_v26  ;;  %v1766_v34 = vadd.f32 %v1765_v31, %v1764_v29 }
 0x119   : > { %v1149_v35 = vadd.f32 %v1766_v34, %v1726_v33 }
 0x11a   : > { %v1783_v36 = vpop.f32.mrb[16].mxu0 }
 0x11b   : > { %v1784_v37 = vpop.f32.mrb[17].mxu0  ;;  %v1823_v40 = vpop.f32.mrb[16].mxu1 }
 0x11c   : > { %v1785_v38 = vadd.f32 %v1784_v37, %v1783_v36  ;;  %v1786_v39 = vpop.f32.mrb[18].mxu0  ;;  %v1824_v42 = vpop.f32.mrb[17].mxu1 }
 0x11d   : > { %v1787_v41 = vpop.f32.mrb[19].mxu0  ;;  %v1825_v45 = vadd.f32 %v1824_v42, %v1823_v40  ;;  %v1826_v46 = vpop.f32.mrb[18].mxu1 }
 0x11e   : > { %v1187_v43 = vadd.f32 %v1785_v38, %v1122_v55  ;;  %v1788_v44 = vadd.f32 %v1787_v41, %v1786_v39  ;;  %v1827_v47 = vpop.f32.mrb[19].mxu1 }
 0x11f   : > { %v1828_v49 = vadd.f32 %v1827_v47, %v1826_v46 }
 0x120   : > { %v1190_v48 = vadd.f32 %v1788_v44, %v1125_v57  ;;  %v1252_v50 = vadd.f32 %v1825_v45, %v1187_v43 }
 0x122   : > { %v1789_v51 = vpop.f32.mrb[20].mxu0  ;;  %v2336_v52 = vadd.f32 %v1828_v49, %v1190_v48 }
 0x123   : > { %v1790_v53 = vpop.f32.mrb[21].mxu0  ;;  %v1829_v58 = vpop.f32.mrb[20].mxu1 }
 0x124   : > { %v1791_v54 = vadd.f32 %v1790_v53, %v1789_v51  ;;  %v1792_v56 = vpop.f32.mrb[22].mxu0  ;;  %v1830_v60 = vpop.f32.mrb[21].mxu1 }
 0x125   : > { %v1793_v59 = vpop.f32.mrb[23].mxu0  ;;  %v1831_v63 = vadd.f32 %v1830_v60, %v1829_v58  ;;  %v1832_v55 = vpop.f32.mrb[22].mxu1 }
 0x126   : > { %v1195_v61 = vadd.f32 %v1791_v54, %v1130_v5  ;;  %v1794_v62 = vadd.f32 %v1793_v59, %v1792_v56  ;;  %v1833_v0 = vpop.f32.mrb[23].mxu1 }
 0x127   : > { %v1834_v2 = vadd.f32 %v1833_v0, %v1832_v55 }
 0x128   : > { %v1198_v1 = vadd.f32 %v1794_v62, %v1133_v7  ;;  %v1260_v3 = vadd.f32 %v1831_v63, %v1195_v61 }
 0x12a   : > { %v1795_v57 = vpop.f32.mrb[24].mxu0  ;;  %v1263_v4 = vadd.f32 %v1834_v2, %v1198_v1 }
 0x12b   : > { %v1796_v6 = vpop.f32.mrb[25].mxu0  ;;  %v1835_v10 = vpop.f32.mrb[24].mxu1 }
 0x12c   : > { %v1797_v8 = vadd.f32 %v1796_v6, %v1795_v57  ;;  %v1798_v9 = vpop.f32.mrb[26].mxu0  ;;  %v1836_v12 = vpop.f32.mrb[25].mxu1 }
 0x12d   : > { %v1799_v11 = vpop.f32.mrb[27].mxu0  ;;  %v1837_v15 = vadd.f32 %v1836_v12, %v1835_v10  ;;  %v1838_v16 = vpop.f32.mrb[26].mxu1 }
 0x12e   : > { %v1203_v13 = vadd.f32 %v1797_v8, %v1138_v19  ;;  %v1800_v14 = vadd.f32 %v1799_v11, %v1798_v9  ;;  %v1839_v5 = vpop.f32.mrb[27].mxu1 }
 0x12f   : > { %v1840_v18 = vadd.f32 %v1839_v5, %v1838_v16 }
 0x130   : > { %v1206_v17 = vadd.f32 %v1800_v14, %v1141_v21  ;;  %v1268_v20 = vadd.f32 %v1837_v15, %v1203_v13 }
 0x132   : > { %v1801_v22 = vpop.f32.mrb[28].mxu0  ;;  %v1271_v7 = vadd.f32 %v1840_v18, %v1206_v17 }
 0x133   : > { %v1802_v23 = vpop.f32.mrb[29].mxu0  ;;  %v1841_v26 = vpop.f32.mrb[28].mxu1 }
 0x134   : > { %v1803_v24 = vadd.f32 %v1802_v23, %v1801_v22  ;;  %v1804_v25 = vpop.f32.mrb[30].mxu0  ;;  %v1842_v28 = vpop.f32.mrb[29].mxu1 }
 0x135   : > { %v1805_v27 = vpop.f32.mrb[31].mxu0  ;;  %v1843_v31 = vadd.f32 %v1842_v28, %v1841_v26  ;;  %v1844_v19 = vpop.f32.mrb[30].mxu1 }
 0x136   : > { %v1211_v29 = vadd.f32 %v1803_v24, %v1146_v32  ;;  %v1806_v30 = vadd.f32 %v1805_v27, %v1804_v25  ;;  %v1845_v33 = vpop.f32.mrb[31].mxu1 }
 0x137   : > { %v1846_v36 = vadd.f32 %v1845_v33, %v1844_v19 }
 0x138   : > { %v1214_v34 = vadd.f32 %v1806_v30, %v1149_v35  ;;  %v1276_v37 = vadd.f32 %v1843_v31, %v1211_v29 }
 0x13a   : > { %v1279_v21 = vadd.f32 %v1846_v36, %v1214_v34 }
 0x13b   : > { %v1877_v38 = vpop.f32.mrb[32].mxu0 }
 0x13c   : > { %v1325_v39 = vadd.f32 %v1877_v38, %v1260_v3  ;;  %v1881_v40 = vpop.f32.mrb[32].mxu1  ;;  %v1316_v41 = vpop.f32.mrb[33].mxu0 }
 0x13d   : > { %v1341_v42 = vadd.f32 %v1881_v40, %v1276_v37  ;;  %v1317_v43 = vadd.f32 %v1316_v41, %v1252_v50  ;;  %v1332_v44 = vpop.f32.mrb[33].mxu1  ;;  %v1878_v45 = vpop.f32.mrb[34].mxu0 }
 0x13e   : > { %v1333_v46 = vadd.f32 %v1332_v44, %v1268_v20  ;;  %v1328_v47 = vadd.f32 %v1878_v45, %v1263_v4  ;;  %v1882_v32 = vpop.f32.mrb[34].mxu1  ;;  %v1319_v48 = vpop.f32.mrb[35].mxu0  ;;  %v1403_v63 = vmul.f32 %v1325_v39, %v1325_v39 }
 0x13f   : > { %v1344_v35 = vadd.f32 %v1882_v32, %v1279_v21  ;;  %v1320_v49 = vadd.f32 %v1319_v48, %v2336_v52  ;;  %v1335_v51 = vpop.f32.mrb[35].mxu1  ;;  %v1401_v50 = vmul.f32 %v1317_v43, %v1317_v43  ;;  %v1407_v10 = vmul.f32 %v1341_v42, %v1341_v42 }
 0x140   : > { %v1672_v53 = vpack.c.bf16 %v1328_v47, %v1325_v39  ;;  %v1336_v54 = vadd.f32 %v1335_v51, %v1271_v7  ;;  %v1404_v1 = vmul.f32 %v1328_v47, %v1328_v47  ;;  %v1405_v3 = vmul.f32 %v1333_v46, %v1333_v46 }
 0x141   : > { %v1682_v56 = vpack.c.bf16 %v1344_v35, %v1341_v42  ;;  %v1667_v58 = vpack.c.bf16 %v1320_v49, %v1317_v43  ;;  %v1387_v59 = vadd.f32 %v1320_v49, %v1317_v43  ;;  %v1402_v60 = vmul.f32 %v1320_v49, %v1320_v49 }
 0x142   : > { %1684 = vst [vmem:[%s213_s6 + $0x8] sm:$0xff] %v1672_v53   ;;  %v1677_v61 = vpack.c.bf16 %v1336_v54, %v1333_v46  ;;  %v1406_v6 = vmul.f32 %v1336_v54, %v1336_v54  ;;  %v1408_v13 = vmul.f32 %v1344_v35, %v1344_v35 }
 0x143   : > { %1686 = vst [vmem:[%s213_s6 + $0x18] sm:$0xff] %v1682_v56   ;;  %1668 = vst [vmem:[%s213_s6] sm:$0xff] %v1667_v58   ;;  %v1388_v62 = vadd.f32 %v1387_v59, %v1325_v39  ;;  %v1409_v55 = vadd.f32 %v1402_v60, %v1401_v50 }
 0x144   : > { %1685 = vst [vmem:[%s213_s6 + $0x10] sm:$0xff] %v1677_v61  }
 0x145   : > { %v1389_v0 = vadd.f32 %v1388_v62, %v1328_v47  ;;  %v1410_v52 = vadd.f32 %v1409_v55, %v1403_v63 }
 0x147   : > { %v1390_v2 = vadd.f32 %v1389_v0, %v1333_v46  ;;  %v1411_v57 = vadd.f32 %v1410_v52, %v1404_v1 }
 0x149   : > { %v1391_v4 = vadd.f32 %v1390_v2, %v1336_v54  ;;  %v1412_v8 = vadd.f32 %v1411_v57, %v1405_v3 }
 0x14b   : > { %v1392_v9 = vadd.f32 %v1391_v4, %v1341_v42  ;;  %v1413_v11 = vadd.f32 %v1412_v8, %v1406_v6 }
 0x14d   : > { %v1393_v12 = vadd.f32 %v1392_v9, %v1344_v35  ;;  %v1414_v14 = vadd.f32 %v1413_v11, %v1407_v10 }
 0x14f   : > { %v1394_v15 = vrot.slane %v1393_v12, 4  ;;  %v1415_v16 = vadd.f32 %v1414_v14, %v1408_v13 }
 0x151   : > { %v1395_v5 = vadd.f32 %v1394_v15, %v1393_v12  ;;  %v1416_v17 = vrot.slane %v1415_v16, 4 }
 0x153   : > { %v1396_v18 = vrot.slane %v1395_v5, 2  ;;  %v1417_v20 = vadd.f32 %v1416_v17, %v1415_v16 }
 0x155   : > { %v1397_v22 = vadd.f32 %v1396_v18, %v1395_v5  ;;  %v1418_v7 = vrot.slane %v1417_v20, 2 }
 0x157   : > { %v1398_v23 = vrot.slane %v1397_v22, 1  ;;  %v1419_v24 = vadd.f32 %v1418_v7, %v1417_v20 }
 0x159   : > { %v1399_v25 = vadd.f32 %v1398_v23, %v1397_v22  ;;  %v1420_v26 = vrot.slane %v1419_v24, 1 }
 0x15b   : > { %1400 = vst [vmem:[%s217_s9] sm:$0x1] %v1399_v25  ;;  %v1421_v27 = vadd.f32 %v1420_v26, %v1419_v24 }
 0x15d   : > { %1422 = vst [vmem:[%s220_s12] sm:$0x1] %v1421_v27 }
 0x15e PF: > { %s15_s15 = sadd.s32 1, %s2038_s15  }
 0x15f   : > { %p12_p5 = scmp.ge.s32.totalorder %s15_s15, 4  }
 0x161   :  { %14 = sbr.rel (!%p12_p5) target bundleno = 1 (0x1), region = 82 }

// kernel: _lambda_.53
= control target key start
LH: loop header
LB: loop body
LE: loop exit
PB: predicated region body
PF: predicated region fallthrough
CT: control target
= control target key end

     0   :  { %s578_s15 = smov 0   ;;  %s630_s0 = inlined_call_operand.vmem [shape: bf16[32,128], index: 0, kind: input, shape index: {}]   ;;  %s631_s1 = inlined_call_operand.vmem [shape: bf16[128,128], index: 1, kind: input, shape index: {}]   ;;  %s632_s2 = inlined_call_operand.vmem [shape: bf16[32,128], index: 2, kind: output, shape index: {0}]   ;;  %s633_s3 = inlined_call_operand.vmem [shape: f32[2,1,128], index: 3, kind: output, shape index: {1}]   ;;  %s634_s4 = inlined_call_operand.vmem [shape: f32[2,1,128], index: 4, kind: output, shape index: {2}]  }
   0x1 LB: > { %s584_s16 = sadd.s32 4294967295, %s549_s15   ;;  %p470_p0 = scmp.ge.s32.totalorder %s549_s15, 1  ;;  %s549_s15 = sphi %s578_s15, %s15_s15  }
   0x2   : > { %p168_p1 = scmp.lt.s32.totalorder %s549_s15, 3 }
   0x4   : > { %p169_p2 = pnand %p470_p0, %p168_p1 }
   0x5   : > { %v534_v0 = vld [vmem:[%s631_s1] sm:$0xff] (!%p169_p2)   ;;  %v551_v1 = vmov (!%p169_p2), 0.0   ;;  %v535_v2 = vld [vmem:[%s631_s1 + $0x8] sm:$0xff] (!%p169_p2)   ;;  %vm552_vm0 = vmmov (!%p169_p2), 0   ;;  %s471_s21 = sshll.u32 (!%p169_p2), %s584_s16, 1  ;;  %v536_v3 = vld [vmem:[%s631_s1 + $0x10] sm:$0xff] (!%p169_p2)  }
   0x6   : > { %172 = sbr.rel (%p169_p2) target bundleno = 269 (0x10d), region = 28  ;;  %504 = vmatprep.subr.bf16.mxu0 (!%p169_p2), %v551_v1  ;;  %520 = vmatprep.mubr.msk.bf16.mxu0 (!%p169_p2), %vm552_vm0, %v551_v1  ;;  %p201_p3 = scmp.lt.s32.totalorder (!%p169_p2), %s471_s21, 3  ;;  %v537_v4 = vld [vmem:[%s631_s1 + $0x18] sm:$0xff] (!%p169_p2)   ;;  %v538_v5 = vld [vmem:[%s631_s1 + $0x20] sm:$0xff] (!%p169_p2)   ;;  %v539_v6 = vld [vmem:[%s631_s1 + $0x28] sm:$0xff] (!%p169_p2)  }
   0x7   : > { %505 = vmatpush3.bf16.msra.mxu0 (!%p169_p2), %v534_v0  ;;  %v540_v7 = vld [vmem:[%s631_s1 + $0x30] sm:$0xff] (!%p169_p2)   ;;  %v541_v8 = vld [vmem:[%s631_s1 + $0x38] sm:$0xff] (!%p169_p2)   ;;  %p212_p4 = scmp.lt.s32.totalorder (!%p169_p2), %s584_s16, 1 }
   0x8   : > { %506 = vmatprep.subr.bf16.mxu0 (!%p169_p2), %v551_v1 }
   0xb   : > { %507 = vmatpush3.bf16.msra.mxu0 (!%p169_p2), %v535_v2 }
   0xc   : > { %508 = vmatprep.subr.bf16.mxu0 (!%p169_p2), %v551_v1 }
   0xd   : > { %s636_s21 = smov (!%p201_p3, %s471_s21), 3  ;;  %s638_s16 = smov (!%p212_p4, %s584_s16), 1 }
   0xe   : > { %s472_s24 = sshll.u32 %s636_s21, 2  ;;  %s214_s19 = scalar_lea.vmem %s633_s3, %s638_s16 }
   0xf   : > { %s204_s27 = scalar_lea.vmem %s630_s0, %s472_s24  ;;  %509 = vmatpush3.bf16.msra.mxu0 %v536_v3  ;;  %s210_s14 = scalar_lea.vmem %s632_s2, %s472_s24 }
  0x10   : > { %510 = vmatprep.subr.bf16.mxu0 %v551_v1  ;;  %v542_v9 = vld [vmem:[%s204_s27] sm:$0xff]   ;;  %s217_s22 = scalar_lea.vmem %s634_s4, %s638_s16 }
  0x13   : > { %511 = vmatpush3.bf16.msra.mxu0 %v537_v4 }
  0x14   : > { %512 = vmatprep.subr.bf16.mxu0 %v551_v1 }
  0x17   : > { %513 = vmatpush3.bf16.msra.mxu0 %v538_v5 }
  0x18   : > { %514 = vmatprep.subr.bf16.mxu0 %v551_v1 }
  0x1b   : > { %515 = vmatpush3.bf16.msra.mxu0 %v539_v6 }
  0x1c   : > { %516 = vmatprep.subr.bf16.mxu0 %v551_v1 }
  0x1f   : > { %517 = vmatpush3.bf16.msra.mxu0 %v540_v7 }
  0x20   : > { %518 = vmatprep.subr.bf16.mxu0 %v551_v1 }
  0x23   : > { %519 = vmatpush3.bf16.msra.mxu0 %v541_v8 }
  0x26   : > { %521 = vmatmul.mubr.bf16.vlgmr.msra.gmra.mrb[0].mxu0 %v542_v9 }
  0xf9   : > { %v325_v10 = vpop.f32.mrb[0].mxu0 }
  0xfa   : > { %v522_v11 = vpop.f32.mrb[1].mxu0  ;;  %v350_v13 = vmul.f32 %v325_v10, %v325_v10 }
  0xfb   : > { %v328_v12 = vpop.f32.mrb[2].mxu0 }
  0xfc   : > { %v493_v14 = vpack.c.bf16 %v328_v12, %v325_v10  ;;  %v342_v15 = vadd.f32 %v328_v12, %v325_v10  ;;  %v351_v16 = vmul.f32 %v328_v12, %v328_v12  ;;  %v523_v17 = vpop.f32.mrb[3].mxu0 }
  0xfe   : > { %494 = vst [vmem:[%s210_s14] sm:$0xff] %v493_v14   ;;  %v343_v18 = vrot.slane %v342_v15, 4  ;;  %v352_v19 = vadd.f32 %v351_v16, %v350_v13 }
 0x100   : > { %v344_v20 = vadd.f32 %v343_v18, %v342_v15  ;;  %v353_v21 = vrot.slane %v352_v19, 4 }
 0x102   : > { %v345_v22 = vrot.slane %v344_v20, 2  ;;  %v354_v23 = vadd.f32 %v353_v21, %v352_v19 }
 0x104   : > { %v346_v24 = vadd.f32 %v345_v22, %v344_v20  ;;  %v355_v25 = vrot.slane %v354_v23, 2 }
 0x106   : > { %v347_v26 = vrot.slane %v346_v24, 1  ;;  %v356_v27 = vadd.f32 %v355_v25, %v354_v23 }
 0x108   : > { %v348_v28 = vadd.f32 %v347_v26, %v346_v24  ;;  %v357_v29 = vrot.slane %v356_v27, 1 }
 0x10a   : > { %349 = vst [vmem:[%s214_s19] sm:$0x1] %v348_v28  ;;  %v358_v30 = vadd.f32 %v357_v29, %v356_v27 }
 0x10c   : > { %359 = vst [vmem:[%s217_s22] sm:$0x1] %v358_v30 }
 0x10d PF: > { %s15_s15 = sadd.s32 1, %s549_s15  }
 0x10e   : > { %p12_p5 = scmp.ge.s32.totalorder %s15_s15, 4  }
 0x110   :  { %14 = sbr.rel (!%p12_p5) target bundleno = 1 (0x1), region = 82 }

// kernel: _lambda_.49
= control target key start
LH: loop header
LB: loop body
LE: loop exit
PB: predicated region body
PF: predicated region fallthrough
CT: control target
= control target key end

     0   :  { %s724_s27 = smov 0   ;;  %s793_s0 = inlined_call_operand.vmem [shape: bf16[128,128], index: 0, kind: input, shape index: {}]   ;;  %s794_s1 = inlined_call_operand.vmem [shape: bf16[128,128], index: 1, kind: input, shape index: {}]   ;;  %s795_s2 = inlined_call_operand.vmem [shape: f32[2,1,128], index: 2, kind: input, shape index: {}]   ;;  %s796_s3 = inlined_call_operand.vmem [shape: f32[2,1,128], index: 3, kind: input, shape index: {}]   ;;  %s797_s4 = inlined_call_operand.vmem [shape: f32[2,1,128], index: 4, kind: input, shape index: {}]   ;;  %s798_s5 = inlined_call_operand.vmem [shape: f32[2,1,128], index: 5, kind: input, shape index: {}]   ;;  %s799_s6 = inlined_call_operand.vmem [shape: f32[2,128], index: 6, kind: input, shape index: {}]   ;;  %s800_s7 = inlined_call_operand.vmem [shape: f32[2,128], index: 7, kind: input, shape index: {}]   ;;  %s801_s8 = inlined_call_operand.vmem [shape: bf16[128,128], index: 8, kind: output, shape index: {}]  }
   0x1 LB: > { %s569_s28 = sadd.s32 4294967295, %s677_s27   ;;  %p573_p0 = scmp.ge.s32.totalorder %s677_s27, 1  ;;  %s677_s27 = sphi %s724_s27, %s18_s27  }
   0x2   : > { %p274_p1 = scmp.lt.s32.totalorder %s677_s27, 3 }
   0x4   : > { %p275_p2 = pnand %p573_p0, %p274_p1 }
   0x5   : > { %v331_v0 = vld [vmem:[%s795_s2] sm:$0x1] (!%p275_p2)  ;;  %v332_v1 = vld [vmem:[%s795_s2 + $0x1] sm:$0x1] (!%p275_p2)  ;;  %vm333_vm0 = vcmask (!%p275_p2), 1040384   ;;  %s574_s21 = sshll.u32 (!%p275_p2), %s569_s28, 3  ;;  %v393_v31 = vlaneseq (!%p275_p2) }
   0x6   : > { %278 = sbr.rel (%p275_p2) target bundleno = 51 (0x33), region = 52  ;;  %v334_v2 = vsel (!%p275_p2), %vm333_vm0, %v331_v0, 0.0  ;;  %v335_v3 = vsel (!%p275_p2), %vm333_vm0, %v332_v1, 0.0  ;;  %v338_v4 = vld [vmem:[%s796_s3] sm:$0x1] (!%p275_p2)  ;;  %p314_p3 = scmp.lt.s32.totalorder (!%p275_p2), %s574_s21, 15 }
   0x7   : > { %v336_v5 = vadd.f32 (!%p275_p2), %v335_v3, %v334_v2  ;;  %v339_v6 = vld [vmem:[%s796_s3 + $0x1] sm:$0x1] (!%p275_p2)  ;;  %v340_v7 = vsel (!%p275_p2), %vm333_vm0, %v338_v4, 0.0  ;;  %v354_v9 = vld [vmem:[%s797_s4] sm:$0x1] (!%p275_p2)  ;;  %v394_v33 = vshrl.u32 (!%p275_p2), %v393_v31, 7 }
   0x8   : > { %v341_v8 = vsel (!%p275_p2), %vm333_vm0, %v339_v6, 0.0  ;;  %v355_v12 = vld [vmem:[%s797_s4 + $0x1] sm:$0x1] (!%p275_p2)  ;;  %v356_v13 = vsel (!%p275_p2), %vm333_vm0, %v354_v9, 0.0  ;;  %v360_v14 = vld [vmem:[%s798_s5] sm:$0x1] (!%p275_p2) }
   0x9   : > { %v337_v10 = vmul.f32 (!%p275_p2), 0.0078125, %v336_v5  ;;  %v342_v11 = vadd.f32 (!%p275_p2), %v341_v8, %v340_v7  ;;  %v357_v15 = vsel (!%p275_p2), %vm333_vm0, %v355_v12, 0.0  ;;  %v361_v16 = vld [vmem:[%s798_s5 + $0x1] sm:$0x1] (!%p275_p2)  ;;  %v362_v17 = vsel (!%p275_p2), %vm333_vm0, %v360_v14, 0.0 }
   0xa   : > { %v358_v20 = vadd.f32 (!%p275_p2), %v357_v15, %v356_v13  ;;  %v363_v21 = vsel (!%p275_p2), %vm333_vm0, %v361_v16, 0.0  ;;  %v347_v34 = vld [vmem:[%s799_s6] sm:$0x1] (!%p275_p2)  ;;  %v395_v36 = vsub.s32 (!%p275_p2), 0, %v394_v33  ;;  %v351_v53 = vld [vmem:[%s799_s6 + $0x1] sm:$0x1] (!%p275_p2) }
   0xb   : > { %v343_v18 = vmul.f32 (!%p275_p2), 0.0078125, %v342_v11  ;;  %v344_v19 = vmul.f32 (!%p275_p2), %v337_v10, %v337_v10  ;;  %v364_v22 = vadd.f32 (!%p275_p2), %v363_v21, %v362_v17  ;;  %v369_v46 = vld [vmem:[%s800_s7] sm:$0x1] (!%p275_p2)  ;;  %v373_v4 = vld [vmem:[%s800_s7 + $0x1] sm:$0x1] (!%p275_p2) }
   0xc   : > { %v359_v24 = vmul.f32 (!%p275_p2), 0.0078125, %v358_v20 }
   0xd   : > { %v345_v23 = vsub.f32 %v343_v18, %v344_v19  ;;  %v365_v25 = vmul.f32 0.0078125, %v364_v22  ;;  %s803_s21 = smov (!%p314_p3, %s574_s21), 15 }
   0xe   : > { %v366_v27 = vmul.f32 %v359_v24, %v359_v24  ;;  %s764_s24 = sshll.u32 %s803_s21, 2 }
   0xf   : > { %v346_v26 = vmax.f32 %v345_v23, 0.0  ;;  %s317_s28 = scalar_lea.vmem %s793_s0, %s764_s24  ;;  %s323_s9 = scalar_lea.vmem %s794_s1, %s764_s24 }
  0x10   : > { %v367_v29 = vsub.f32 %v365_v25, %v366_v27  ;;  %v599_v35 = vld [vmem:[%s317_s28] sm:$0xff]   ;;  %v650_v38 = vld [vmem:[%s317_s28 + $0x8] sm:$0xff]   ;;  %v651_v44 = vld [vmem:[%s317_s28 + $0x10] sm:$0xff]   ;;  %s329_s20 = scalar_lea.vmem %s801_s8, %s764_s24 }
  0x11   : > { %v348_v28 = vadd.f32 1e-05, %v346_v26  ;;  %v615_v37 = vld [vmem:[%s323_s9] sm:$0xff]   ;;  %v653_v40 = vld [vmem:[%s323_s9 + $0x8] sm:$0xff]   ;;  %v600_v42 = vunpack.c.l.bf16 %v599_v35  ;;  %v601_v43 = vunpack.c.h.bf16 %v599_v35  ;;  %v652_v45 = vld [vmem:[%s317_s28 + $0x18] sm:$0xff]   ;;  %v604_v49 = vunpack.c.l.bf16 %v650_v38 }
  0x12   : > { %v368_v30 = vmax.f32 %v367_v29, 0.0  ;;  %v616_v47 = vunpack.c.l.bf16 %v615_v37  ;;  %v617_v48 = vunpack.c.h.bf16 %v615_v37  ;;  %v605_v50 = vunpack.c.h.bf16 %v650_v38  ;;  %v654_v51 = vld [vmem:[%s323_s9 + $0x10] sm:$0xff]   ;;  %v655_v52 = vld [vmem:[%s323_s9 + $0x18] sm:$0xff]  }
  0x13   : > { %667 = vrsqrt.f32 %v348_v28  ;;  %v620_v56 = vunpack.c.l.bf16 %v653_v40  ;;  %v621_v57 = vunpack.c.h.bf16 %v653_v40  ;;  %v608_v59 = vunpack.c.l.bf16 %v651_v44 }
  0x14   : > { %v370_v32 = vadd.f32 1e-05, %v368_v30  ;;  %v609_v60 = vunpack.c.h.bf16 %v651_v44  ;;  %v612_v61 = vunpack.c.l.bf16 %v652_v45  ;;  %v613_v62 = vunpack.c.h.bf16 %v652_v45 }
  0x15   : > { %v624_v0 = vunpack.c.l.bf16 %v654_v51  ;;  %v625_v1 = vunpack.c.h.bf16 %v654_v51  ;;  %v628_v2 = vunpack.c.l.bf16 %v655_v52  ;;  %v629_v7 = vunpack.c.h.bf16 %v655_v52 }
  0x16   : > { %669 = vrsqrt.f32 %v370_v32 }
  0x1d   : > { %v668_v39 = vpop.eup %667 }
  0x1e   : > { %v350_v41 = vmul.f32 %v668_v39, %v347_v34 }
  0x20   : > { %v352_v54 = vmul.f32 %v350_v41, %v337_v10  ;;  %v396_v55 = vrot.slane %v350_v41, %v395_v36  ;;  %v670_v58 = vpop.eup %669 }
  0x21   : > { %v372_v63 = vmul.f32 %v670_v58, %v369_v46 }
  0x22   : > { %v353_v3 = vsub.f32 %v351_v53, %v352_v54  ;;  %v397_v5 = vmul.f32 %v600_v42, %v396_v55  ;;  %v398_v6 = vmul.f32 %v601_v43, %v396_v55  ;;  %v399_v10 = vmul.f32 %v604_v49, %v396_v55 }
  0x23   : > { %v374_v8 = vmul.f32 %v372_v63, %v359_v24  ;;  %v424_v9 = vrot.slane %v372_v63, %v395_v36  ;;  %v400_v11 = vmul.f32 %v605_v50, %v396_v55  ;;  %v401_v12 = vmul.f32 %v608_v59, %v396_v55 }
  0x24   : > { %v402_v13 = vmul.f32 %v609_v60, %v396_v55  ;;  %v403_v14 = vmul.f32 %v612_v61, %v396_v55  ;;  %v404_v15 = vmul.f32 %v613_v62, %v396_v55 }
  0x25   : > { %v375_v16 = vsub.f32 %v373_v4, %v374_v8  ;;  %v425_v17 = vmul.f32 %v616_v47, %v424_v9  ;;  %v426_v18 = vmul.f32 %v617_v48, %v424_v9  ;;  %v427_v19 = vmul.f32 %v620_v56, %v424_v9 }
  0x26   : > { %v428_v20 = vmul.f32 %v621_v57, %v424_v9  ;;  %v429_v21 = vmul.f32 %v624_v0, %v424_v9  ;;  %v430_v22 = vmul.f32 %v625_v1, %v424_v9  ;;  %v431_v23 = vmul.f32 %v628_v2, %v424_v9 }
  0x27   : > { %v376_v25 = vadd.f32 %v375_v16, %v353_v3  ;;  %v433_v26 = vadd.f32 %v425_v17, %v397_v5  ;;  %v434_v27 = vadd.f32 %v426_v18, %v398_v6  ;;  %v435_v28 = vadd.f32 %v427_v19, %v399_v10 }
  0x28   : > { %v436_v24 = vadd.f32 %v428_v20, %v400_v11  ;;  %v437_v29 = vadd.f32 %v429_v21, %v401_v12  ;;  %v438_v30 = vadd.f32 %v430_v22, %v402_v13  ;;  %v432_v31 = vmul.f32 %v629_v7, %v424_v9 }
  0x29   : > { %v444_v32 = vrot.slane %v376_v25, %v395_v36  ;;  %v439_v33 = vadd.f32 %v431_v23, %v403_v14 }
  0x2a   : > { %v440_v34 = vadd.f32 %v432_v31, %v404_v15 }
  0x2b   : > { %v445_v35 = vadd.f32 %v444_v32, %v433_v26  ;;  %v446_v37 = vadd.f32 %v444_v32, %v434_v27  ;;  %v447_v38 = vadd.f32 %v444_v32, %v435_v28  ;;  %v448_v39 = vadd.f32 %v444_v32, %v436_v24 }
  0x2c   : > { %v449_v40 = vadd.f32 %v444_v32, %v437_v29  ;;  %v450_v41 = vadd.f32 %v444_v32, %v438_v30  ;;  %v451_v42 = vadd.f32 %v444_v32, %v439_v33  ;;  %v452_v43 = vadd.f32 %v444_v32, %v440_v34 }
  0x2d   : > { %v453_v44 = vmax.f32 %v445_v35, 0.0  ;;  %v454_v45 = vmax.f32 %v446_v37, 0.0  ;;  %v455_v46 = vmax.f32 %v447_v38, 0.0  ;;  %v456_v47 = vmax.f32 %v448_v39, 0.0 }
  0x2e   : > { %v457_v48 = vmax.f32 %v449_v40, 0.0  ;;  %v458_v36 = vmax.f32 %v450_v41, 0.0  ;;  %v459_v49 = vmax.f32 %v451_v42, 0.0  ;;  %v460_v50 = vmax.f32 %v452_v43, 0.0 }
  0x2f   : > { %v633_v51 = vpack.c.bf16 %v454_v45, %v453_v44  ;;  %v638_v52 = vpack.c.bf16 %v456_v47, %v455_v46 }
  0x30   : > { %v643_v53 = vpack.c.bf16 %v458_v36, %v457_v48  ;;  %v648_v54 = vpack.c.bf16 %v460_v50, %v459_v49 }
  0x31   : > { %634 = vst [vmem:[%s329_s20] sm:$0xff] %v633_v51   ;;  %656 = vst [vmem:[%s329_s20 + $0x8] sm:$0xff] %v638_v52  }
  0x32   : > { %657 = vst [vmem:[%s329_s20 + $0x10] sm:$0xff] %v643_v53   ;;  %658 = vst [vmem:[%s329_s20 + $0x18] sm:$0xff] %v648_v54  }
  0x33 PF: > { %s18_s27 = sadd.s32 1, %s677_s27  }
  0x34   : > { %p15_p4 = scmp.ge.s32.totalorder %s18_s27, 4  }
  0x36   :  { %17 = sbr.rel (!%p15_p4) target bundleno = 1 (0x1), region = 85 }

// kernel: _lambda_.51
= control target key start
LH: loop header
LB: loop body
LE: loop exit
PB: predicated region body
PF: predicated region fallthrough
CT: control target
= control target key end

     0   :  { %s375_s15 = smov 0   ;;  %s410_s0 = inlined_call_operand.vmem [shape: bf16[32,128], index: 0, kind: input, shape index: {}]   ;;  %s411_s1 = inlined_call_operand.vmem [shape: f32[2,1,128], index: 1, kind: input, shape index: {}]   ;;  %s412_s2 = inlined_call_operand.vmem [shape: f32[2,1,128], index: 2, kind: input, shape index: {}]   ;;  %s413_s3 = inlined_call_operand.vmem [shape: f32[2,128], index: 3, kind: input, shape index: {}]   ;;  %s414_s4 = inlined_call_operand.vmem [shape: bf16[32,128], index: 4, kind: output, shape index: {}]  }
   0x1 LB: > { %s308_s16 = sadd.s32 4294967295, %s348_s15   ;;  %p312_p0 = scmp.ge.s32.totalorder %s348_s15, 1  ;;  %s348_s15 = sphi %s375_s15, %s14_s15  }
   0x2   : > { %p163_p1 = scmp.lt.s32.totalorder %s348_s15, 3 }
   0x4   : > { %p164_p2 = pnand %p312_p0, %p163_p1 }
   0x5   : > { %v201_v0 = vld [vmem:[%s411_s1] sm:$0x1] (!%p164_p2)  ;;  %v202_v1 = vld [vmem:[%s411_s1 + $0x1] sm:$0x1] (!%p164_p2)  ;;  %vm203_vm0 = vcmask (!%p164_p2), 1040384   ;;  %s313_s25 = sshll.u32 (!%p164_p2), %s308_s16, 1  ;;  %v228_v16 = vlaneseq (!%p164_p2) }
   0x6   : > { %167 = sbr.rel (%p164_p2) target bundleno = 45 (0x2d), region = 36  ;;  %v204_v2 = vsel (!%p164_p2), %vm203_vm0, %v201_v0, 0.0  ;;  %v205_v3 = vsel (!%p164_p2), %vm203_vm0, %v202_v1, 0.0  ;;  %v208_v4 = vld [vmem:[%s412_s2] sm:$0x1] (!%p164_p2)  ;;  %p190_p3 = scmp.lt.s32.totalorder (!%p164_p2), %s313_s25, 3 }
   0x7   : > { %v206_v5 = vadd.f32 (!%p164_p2), %v205_v3, %v204_v2  ;;  %v209_v6 = vld [vmem:[%s412_s2 + $0x1] sm:$0x1] (!%p164_p2)  ;;  %v210_v7 = vsel (!%p164_p2), %vm203_vm0, %v208_v4, 0.0  ;;  %v229_v17 = vshrl.u32 (!%p164_p2), %v228_v16, 7  ;;  %v217_v18 = vld [vmem:[%s413_s3] sm:$0x1] (!%p164_p2) }
   0x8   : > { %v211_v8 = vsel (!%p164_p2), %vm203_vm0, %v209_v6, 0.0  ;;  %v221_v25 = vld [vmem:[%s413_s3 + $0x1] sm:$0x1] (!%p164_p2) }
   0x9   : > { %v207_v9 = vmul.f32 (!%p164_p2), 0.03125, %v206_v5  ;;  %v212_v10 = vadd.f32 (!%p164_p2), %v211_v8, %v210_v7  ;;  %v230_v20 = vsub.s32 (!%p164_p2), 0, %v229_v17 }
   0xb   : > { %v213_v11 = vmul.f32 (!%p164_p2), 0.03125, %v212_v10  ;;  %v214_v12 = vmul.f32 (!%p164_p2), %v207_v9, %v207_v9 }
   0xd   : > { %v215_v13 = vsub.f32 %v213_v11, %v214_v12  ;;  %s416_s25 = smov (!%p190_p3, %s313_s25), 3 }
   0xe   : > { %s314_s26 = sshll.u32 %s416_s25, 2 }
   0xf   : > { %v216_v14 = vmax.f32 %v215_v13, 0.0  ;;  %s193_s29 = scalar_lea.vmem %s410_s0, %s314_s26  ;;  %s199_s10 = scalar_lea.vmem %s414_s4, %s314_s26 }
  0x10   : > { %v324_v19 = vld [vmem:[%s193_s29] sm:$0xff]  }
  0x11   : > { %v218_v15 = vadd.f32 1e-05, %v216_v14  ;;  %v325_v23 = vunpack.c.l.bf16 %v324_v19  ;;  %v326_v24 = vunpack.c.h.bf16 %v324_v19 }
  0x13   : > { %340 = vrsqrt.f32 %v218_v15 }
  0x1d   : > { %v341_v21 = vpop.eup %340 }
  0x1e   : > { %v220_v22 = vmul.f32 %v341_v21, %v217_v18 }
  0x20   : > { %v222_v26 = vmul.f32 %v220_v22, %v207_v9  ;;  %v231_v27 = vrot.slane %v220_v22, %v230_v20 }
  0x22   : > { %v223_v28 = vsub.f32 %v221_v25, %v222_v26  ;;  %v232_v29 = vmul.f32 %v325_v23, %v231_v27  ;;  %v233_v30 = vmul.f32 %v326_v24, %v231_v27 }
  0x24   : > { %v237_v31 = vrot.slane %v223_v28, %v230_v20 }
  0x26   : > { %v238_v32 = vadd.f32 %v237_v31, %v232_v29  ;;  %v239_v33 = vadd.f32 %v237_v31, %v233_v30 }
  0x28   : > { %v240_v34 = vmax.f32 %v238_v32, 0.0  ;;  %v241_v35 = vmax.f32 %v239_v33, 0.0 }
  0x2a   : > { %v330_v36 = vpack.c.bf16 %v241_v35, %v240_v34 }
  0x2c   : > { %331 = vst [vmem:[%s199_s10] sm:$0xff] %v330_v36  }
  0x2d PF: > { %s14_s15 = sadd.s32 1, %s348_s15  }
  0x2e   : > { %p11_p4 = scmp.ge.s32.totalorder %s14_s15, 4  }
  0x30   :  { %13 = sbr.rel (!%p11_p4) target bundleno = 1 (0x1), region = 66 }

// kernel: _lambda_.50
= control target key start
LH: loop header
LB: loop body
LE: loop exit
PB: predicated region body
PF: predicated region fallthrough
CT: control target
= control target key end

     0   :  { %s1542_s15 = smov 0   ;;  %s1801_s0 = inlined_call_operand.vmem [shape: bf16[32,1152], index: 0, kind: input, shape index: {}]   ;;  %s1802_s1 = inlined_call_operand.vmem [shape: bf16[1152,128], index: 1, kind: input, shape index: {}]   ;;  %s1803_s2 = inlined_call_operand.vmem [shape: bf16[32,128], index: 2, kind: output, shape index: {0}]   ;;  %s1804_s3 = inlined_call_operand.vmem [shape: f32[2,1,128], index: 3, kind: output, shape index: {1}]   ;;  %s1805_s4 = inlined_call_operand.vmem [shape: f32[2,1,128], index: 4, kind: output, shape index: {2}]  }
   0x1 LB: > { %s1548_s16 = sadd.s32 4294967295, %s1513_s15   ;;  %p1197_p0 = scmp.ge.s32.totalorder %s1513_s15, 1  ;;  %s1513_s15 = sphi %s1542_s15, %s15_s15  }
   0x2   : > { %p169_p1 = scmp.lt.s32.totalorder %s1513_s15, 3 }
   0x4   : > { %p170_p2 = pnand %p1197_p0, %p169_p1 }
   0x5   : > { %v1422_v0 = vld [vmem:[%s1802_s1 + $0x40] sm:$0xff] (!%p170_p2)   ;;  %v1426_v4 = vld [vmem:[%s1802_s1 + $0x48] sm:$0xff] (!%p170_p2)   ;;  %v1430_v8 = vld [vmem:[%s1802_s1 + $0x50] sm:$0xff] (!%p170_p2)   ;;  %s1198_s23 = sshll.u32 (!%p170_p2), %s1548_s16, 1  ;;  %vm1516_vm0 = vmmov (!%p170_p2), 0   ;;  %p215_p4 = scmp.lt.s32.totalorder (!%p170_p2), %s1548_s16, 1 }
   0x6   : > { %173 = sbr.rel (%p170_p2) target bundleno = 336 (0x150), region = 28  ;;  %v1423_v1 = vld [vmem:[%s1802_s1 + $0xc0] sm:$0xff] (!%p170_p2)   ;;  %1294 = vmatprep.subr.bf16.mxu0 (!%p170_p2), %v1422_v0  ;;  %v1427_v5 = vld [vmem:[%s1802_s1 + $0xc8] sm:$0xff] (!%p170_p2)   ;;  %v1431_v9 = vld [vmem:[%s1802_s1 + $0xd0] sm:$0xff] (!%p170_p2)   ;;  %p203_p3 = scmp.lt.s32.totalorder (!%p170_p2), %s1198_s23, 3 }
   0x7   : > { %v1424_v2 = vld [vmem:[%s1802_s1] sm:$0xff] (!%p170_p2)   ;;  %1316 = vmatprep.subr.bf16.mxu1 (!%p170_p2), %v1423_v1  ;;  %v1428_v6 = vld [vmem:[%s1802_s1 + $0x8] sm:$0xff] (!%p170_p2)   ;;  %v1432_v10 = vld [vmem:[%s1802_s1 + $0x10] sm:$0xff] (!%p170_p2)  }
   0x8   : > { %v1425_v3 = vld [vmem:[%s1802_s1 + $0x80] sm:$0xff] (!%p170_p2)   ;;  %1295 = vmatpush3.bf16.msra.mxu0 (!%p170_p2), %v1424_v2  ;;  %v1429_v7 = vld [vmem:[%s1802_s1 + $0x88] sm:$0xff] (!%p170_p2)   ;;  %v1433_v11 = vld [vmem:[%s1802_s1 + $0x90] sm:$0xff] (!%p170_p2)  }
   0x9   : > { %1317 = vmatpush3.bf16.msra.mxu1 (!%p170_p2), %v1425_v3  ;;  %1296 = vmatprep.subr.bf16.mxu0 (!%p170_p2), %v1426_v4  ;;  %v1434_v12 = vld [vmem:[%s1802_s1 + $0x58] sm:$0xff] (!%p170_p2)   ;;  %v1438_v16 = vld [vmem:[%s1802_s1 + $0x60] sm:$0xff] (!%p170_p2)   ;;  %v1442_v20 = vld [vmem:[%s1802_s1 + $0x68] sm:$0xff] (!%p170_p2)  }
   0xa   : > { %1318 = vmatprep.subr.bf16.mxu1 (!%p170_p2), %v1427_v5  ;;  %v1435_v13 = vld [vmem:[%s1802_s1 + $0xd8] sm:$0xff] (!%p170_p2)   ;;  %v1439_v17 = vld [vmem:[%s1802_s1 + $0xe0] sm:$0xff] (!%p170_p2)   ;;  %v1443_v21 = vld [vmem:[%s1802_s1 + $0xe8] sm:$0xff] (!%p170_p2)  }
   0xb   : > { %v1436_v14 = vld [vmem:[%s1802_s1 + $0x18] sm:$0xff] (!%p170_p2)   ;;  %v1440_v18 = vld [vmem:[%s1802_s1 + $0x20] sm:$0xff] (!%p170_p2)   ;;  %v1444_v22 = vld [vmem:[%s1802_s1 + $0x28] sm:$0xff] (!%p170_p2)  }
   0xc   : > { %1297 = vmatpush3.bf16.msra.mxu0 (!%p170_p2), %v1428_v6  ;;  %v1437_v15 = vld [vmem:[%s1802_s1 + $0x98] sm:$0xff] (!%p170_p2)   ;;  %v1441_v19 = vld [vmem:[%s1802_s1 + $0xa0] sm:$0xff] (!%p170_p2)   ;;  %v1445_v23 = vld [vmem:[%s1802_s1 + $0xa8] sm:$0xff] (!%p170_p2)   ;;  %v1515_v6 = vmov (!%p170_p2), 0.0  }
   0xd   : > { %1319 = vmatpush3.bf16.msra.mxu1 %v1429_v7  ;;  %1298 = vmatprep.subr.bf16.mxu0 %v1430_v8  ;;  %s1807_s23 = smov (!%p203_p3, %s1198_s23), 3  ;;  %v1446_v24 = vld [vmem:[%s1802_s1 + $0x70] sm:$0xff]   ;;  %v1450_v28 = vld [vmem:[%s1802_s1 + $0x78] sm:$0xff]   ;;  %v1460_v36 = vld [vmem:[%s1802_s1 + $0x140] sm:$0xff]   ;;  %s1809_s16 = smov (!%p215_p4, %s1548_s16), 1 }
   0xe   : > { %1320 = vmatprep.subr.bf16.mxu1 %v1431_v9  ;;  %v1447_v25 = vld [vmem:[%s1802_s1 + $0xf0] sm:$0xff]   ;;  %s1411_s22 = smul.u32 36, %s1807_s23  ;;  %v1451_v29 = vld [vmem:[%s1802_s1 + $0xf8] sm:$0xff]   ;;  %v1461_v37 = vld [vmem:[%s1802_s1 + $0x100] sm:$0xff]   ;;  %s217_s9 = scalar_lea.vmem %s1804_s3, %s1809_s16 }
   0xf   : > { %v1448_v26 = vld [vmem:[%s1802_s1 + $0x30] sm:$0xff]   ;;  %v1452_v30 = vld [vmem:[%s1802_s1 + $0x38] sm:$0xff]   ;;  %v1462_v38 = vld [vmem:[%s1802_s1 + $0x1c0] sm:$0xff]   ;;  %s220_s12 = scalar_lea.vmem %s1805_s4, %s1809_s16 }
  0x10   : > { %1299 = vmatpush3.bf16.msra.mxu0 %v1432_v10  ;;  %v1449_v27 = vld [vmem:[%s1802_s1 + $0xb0] sm:$0xff]   ;;  %s1649_s8 = scalar_lea.vmem %s1801_s0, %s1411_s22  ;;  %v1453_v31 = vld [vmem:[%s1802_s1 + $0xb8] sm:$0xff]   ;;  %v1463_v39 = vld [vmem:[%s1802_s1 + $0x180] sm:$0xff]  }
  0x11   : > { %1321 = vmatpush3.bf16.msra.mxu1 %v1433_v11  ;;  %1300 = vmatprep.subr.bf16.mxu0 %v1434_v12  ;;  %v1454_v32 = vld [vmem:[%s1649_s8] ss:$36 sps:$4 sm:$0xff]   ;;  %v1457_v34 = vld [vmem:[%s1649_s8 + $0x8] ss:$36 sps:$4 sm:$0xff]   ;;  %v1468_v44 = vld [vmem:[%s1802_s1 + $0x150] sm:$0xff]  }
  0x12   : > { %1322 = vmatprep.subr.bf16.mxu1 %v1435_v13  ;;  %v1456_v33 = vld [vmem:[%s1649_s8 + $0x4] ss:$36 sps:$4 sm:$0xff]   ;;  %v1459_v35 = vld [vmem:[%s1649_s8 + $0xc] ss:$36 sps:$4 sm:$0xff]   ;;  %v1472_v48 = vld [vmem:[%s1802_s1 + $0x158] sm:$0xff]  }
  0x13   : > { %886 = vmatprep.mubr.bf16.mxu0 %v1456_v33  ;;  %927 = vmatprep.mubr.bf16.mxu1 %v1459_v35  ;;  %v1464_v40 = vld [vmem:[%s1802_s1 + $0x148] sm:$0xff]   ;;  %v1469_v45 = vld [vmem:[%s1802_s1 + $0x110] sm:$0xff]   ;;  %v1473_v49 = vld [vmem:[%s1802_s1 + $0x118] sm:$0xff]  }
  0x14   : > { %1301 = vmatpush3.bf16.msra.mxu0 %v1436_v14  ;;  %v1465_v41 = vld [vmem:[%s1802_s1 + $0x108] sm:$0xff]   ;;  %v1470_v46 = vld [vmem:[%s1802_s1 + $0x1d0] sm:$0xff]   ;;  %v1474_v50 = vld [vmem:[%s1802_s1 + $0x1d8] sm:$0xff]  }
  0x15   : > { %1323 = vmatpush3.bf16.msra.mxu1 %v1437_v15  ;;  %1302 = vmatprep.subr.bf16.mxu0 %v1438_v16  ;;  %v1466_v42 = vld [vmem:[%s1802_s1 + $0x1c8] sm:$0xff]   ;;  %v1471_v47 = vld [vmem:[%s1802_s1 + $0x190] sm:$0xff]   ;;  %v1475_v51 = vld [vmem:[%s1802_s1 + $0x198] sm:$0xff]  }
  0x16   : > { %1324 = vmatprep.subr.bf16.mxu1 %v1439_v17  ;;  %v1467_v43 = vld [vmem:[%s1802_s1 + $0x188] sm:$0xff]   ;;  %v1476_v52 = vld [vmem:[%s1802_s1 + $0x160] sm:$0xff]   ;;  %v1484_v60 = vld [vmem:[%s1802_s1 + $0x170] sm:$0xff]  }
  0x17   : > { %v1477_v53 = vld [vmem:[%s1802_s1 + $0x120] sm:$0xff]   ;;  %v1480_v56 = vld [vmem:[%s1802_s1 + $0x168] sm:$0xff]   ;;  %v1485_v61 = vld [vmem:[%s1802_s1 + $0x130] sm:$0xff]  }
  0x18   : > { %1303 = vmatpush3.bf16.msra.mxu0 %v1440_v18  ;;  %v1478_v54 = vld [vmem:[%s1802_s1 + $0x1e0] sm:$0xff]   ;;  %v1481_v57 = vld [vmem:[%s1802_s1 + $0x128] sm:$0xff]   ;;  %v1486_v62 = vld [vmem:[%s1802_s1 + $0x1f0] sm:$0xff]  }
  0x19   : > { %1325 = vmatpush3.bf16.msra.mxu1 %v1441_v19  ;;  %1304 = vmatprep.subr.bf16.mxu0 %v1442_v20  ;;  %v1479_v55 = vld [vmem:[%s1802_s1 + $0x1a0] sm:$0xff]   ;;  %v1482_v58 = vld [vmem:[%s1802_s1 + $0x1e8] sm:$0xff]   ;;  %v1487_v63 = vld [vmem:[%s1802_s1 + $0x1b0] sm:$0xff]  }
  0x1a   : > { %1326 = vmatprep.subr.bf16.mxu1 %v1443_v21  ;;  %v1483_v59 = vld [vmem:[%s1802_s1 + $0x1a8] sm:$0xff]   ;;  %v1488_v0 = vld [vmem:[%s1802_s1 + $0x178] sm:$0xff]   ;;  %v1491_v3 = vld [vmem:[%s1649_s8 + $0x10] ss:$36 sps:$4 sm:$0xff]  }
  0x1b   : > { %v1489_v1 = vld [vmem:[%s1802_s1 + $0x138] sm:$0xff]   ;;  %v1498_v9 = vld [vmem:[%s1802_s1 + $0x200] sm:$0xff]   ;;  %v1499_v10 = vld [vmem:[%s1802_s1 + $0x208] sm:$0xff]  }
  0x1c   : > { %1305 = vmatpush3.bf16.msra.mxu0 %v1444_v22  ;;  %v1490_v2 = vld [vmem:[%s1802_s1 + $0x1f8] sm:$0xff]   ;;  %v1500_v11 = vld [vmem:[%s1802_s1 + $0x210] sm:$0xff]   ;;  %v1502_v13 = vld [vmem:[%s1802_s1 + $0x220] sm:$0xff]  }
  0x1d   : > { %1327 = vmatpush3.bf16.msra.mxu1 %v1445_v23  ;;  %1306 = vmatprep.subr.bf16.mxu0 %v1446_v24  ;;  %v1493_v4 = vld [vmem:[%s1649_s8 + $0x14] ss:$36 sps:$4 sm:$0xff]   ;;  %v1497_v8 = vld [vmem:[%s1649_s8 + $0x1c] ss:$36 sps:$4 sm:$0xff]   ;;  %v1503_v14 = vld [vmem:[%s1802_s1 + $0x228] sm:$0xff]  }
  0x1e   : > { %1328 = vmatprep.subr.bf16.mxu1 %v1447_v25  ;;  %v1494_v5 = vld [vmem:[%s1802_s1 + $0x1b8] sm:$0xff]   ;;  %v1504_v15 = vld [vmem:[%s1802_s1 + $0x230] sm:$0xff]   ;;  %v1506_v17 = vld [vmem:[%s1649_s8 + $0x20] ss:$36 sps:$4 sm:$0xff]  }
  0x1f   : > { %v1495_v7 = vld [vmem:[%s1649_s8 + $0x18] ss:$36 sps:$4 sm:$0xff]   ;;  %s1201_s8 = sshll.u32 %s1807_s23, 2 }
  0x20   : > { %1307 = vmatpush3.bf16.msra.mxu0 %v1448_v26  ;;  %v1501_v12 = vld [vmem:[%s1802_s1 + $0x218] sm:$0xff]   ;;  %s213_s6 = scalar_lea.vmem %s1803_s2, %s1201_s8 }
  0x21   : > { %1329 = vmatpush3.bf16.msra.mxu1 %v1449_v27  ;;  %1308 = vmatprep.subr.bf16.mxu0 %v1450_v28  ;;  %v1505_v16 = vld [vmem:[%s1802_s1 + $0x238] sm:$0xff]  }
  0x22   : > { %1330 = vmatprep.subr.bf16.mxu1 %v1451_v29 }
  0x24   : > { %1309 = vmatpush3.bf16.msra.mxu0 %v1452_v30 }
  0x25   : > { %1331 = vmatpush3.bf16.msra.mxu1 %v1453_v31  ;;  %1338 = vmatprep.subr.bf16.mxu0 %v1460_v36 }
  0x26   : > { %1360 = vmatprep.subr.bf16.mxu1 %v1462_v38 }
  0x27   : > { %887 = vmatmul.mubr.bf16.vlgmr.msra.gmra.mrb[0].mxu0 %v1454_v32 }
  0x28   : > { %928 = vmatmul.mubr.bf16.vlgmr.msra.gmra.mrb[0].mxu1 %v1457_v34  ;;  %1339 = vmatpush3.bf16.msra.mxu0 %v1461_v37 }
  0x29   : > { %1361 = vmatpush3.bf16.msra.mxu1 %v1463_v39  ;;  %1340 = vmatprep.subr.bf16.mxu0 %v1464_v40 }
  0x2a   : > { %1362 = vmatprep.subr.bf16.mxu1 %v1466_v42  ;;  %968 = vmatprep.mubr.bf16.mxu0 %v1493_v4 }
  0x2b   : > { %1009 = vmatprep.mubr.bf16.mxu1 %v1497_v8 }
  0x2c   : > { %1341 = vmatpush3.bf16.msra.mxu0 %v1465_v41 }
  0x2d   : > { %1363 = vmatpush3.bf16.msra.mxu1 %v1467_v43  ;;  %1342 = vmatprep.subr.bf16.mxu0 %v1468_v44 }
  0x2e   : > { %1364 = vmatprep.subr.bf16.mxu1 %v1470_v46 }
  0x30   : > { %1343 = vmatpush3.bf16.msra.mxu0 %v1469_v45 }
  0x31   : > { %1365 = vmatpush3.bf16.msra.mxu1 %v1471_v47  ;;  %1344 = vmatprep.subr.bf16.mxu0 %v1472_v48 }
  0x32   : > { %1366 = vmatprep.subr.bf16.mxu1 %v1474_v50 }
  0x34   : > { %1345 = vmatpush3.bf16.msra.mxu0 %v1473_v49 }
  0x35   : > { %1367 = vmatpush3.bf16.msra.mxu1 %v1475_v51  ;;  %1346 = vmatprep.subr.bf16.mxu0 %v1476_v52 }
  0x36   : > { %1368 = vmatprep.subr.bf16.mxu1 %v1478_v54 }
  0x38   : > { %1347 = vmatpush3.bf16.msra.mxu0 %v1477_v53 }
  0x39   : > { %1369 = vmatpush3.bf16.msra.mxu1 %v1479_v55  ;;  %1348 = vmatprep.subr.bf16.mxu0 %v1480_v56 }
  0x3a   : > { %1370 = vmatprep.subr.bf16.mxu1 %v1482_v58 }
  0x3c   : > { %1349 = vmatpush3.bf16.msra.mxu0 %v1481_v57 }
  0x3d   : > { %1371 = vmatpush3.bf16.msra.mxu1 %v1483_v59  ;;  %1350 = vmatprep.subr.bf16.mxu0 %v1484_v60 }
  0x3e   : > { %1372 = vmatprep.subr.bf16.mxu1 %v1486_v62 }
  0x40   : > { %1351 = vmatpush3.bf16.msra.mxu0 %v1485_v61 }
  0x41   : > { %1373 = vmatpush3.bf16.msra.mxu1 %v1487_v63  ;;  %1352 = vmatprep.subr.bf16.mxu0 %v1488_v0 }
  0x42   : > { %1374 = vmatprep.subr.bf16.mxu1 %v1490_v2 }
  0x44   : > { %1353 = vmatpush3.bf16.msra.mxu0 %v1489_v1 }
  0x45   : > { %1391 = vmatprep.subr.bf16.mxu0 %v1515_v6  ;;  %1375 = vmatpush3.bf16.msra.mxu1 %v1494_v5 }
  0x47   : > { %969 = vmatmul.mubr.bf16.vlgmr.msra.gmra.mrb[4].mxu0 %v1491_v3 }
  0x48   : > { %1407 = vmatprep.mubr.msk.bf16.mxu0 %vm1516_vm0, %v1515_v6  ;;  %1392 = vmatpush3.bf16.msra.mxu0 %v1498_v9 }
  0x49   : > { %1010 = vmatmul.mubr.bf16.vlgmr.msra.gmra.mrb[4].mxu1 %v1495_v7  ;;  %1393 = vmatprep.subr.bf16.mxu0 %v1515_v6 }
  0x4c   : > { %1394 = vmatpush3.bf16.msra.mxu0 %v1499_v10 }
  0x4d   : > { %1395 = vmatprep.subr.bf16.mxu0 %v1515_v6 }
  0x50   : > { %1396 = vmatpush3.bf16.msra.mxu0 %v1500_v11 }
  0x51   : > { %1397 = vmatprep.subr.bf16.mxu0 %v1515_v6 }
  0x54   : > { %1398 = vmatpush3.bf16.msra.mxu0 %v1501_v12 }
  0x55   : > { %1399 = vmatprep.subr.bf16.mxu0 %v1515_v6 }
  0x58   : > { %1400 = vmatpush3.bf16.msra.mxu0 %v1502_v13 }
  0x59   : > { %1401 = vmatprep.subr.bf16.mxu0 %v1515_v6 }
  0x5c   : > { %1402 = vmatpush3.bf16.msra.mxu0 %v1503_v14 }
  0x5d   : > { %1403 = vmatprep.subr.bf16.mxu0 %v1515_v6 }
  0x60   : > { %1404 = vmatpush3.bf16.msra.mxu0 %v1504_v15 }
  0x61   : > { %1405 = vmatprep.subr.bf16.mxu0 %v1515_v6 }
  0x64   : > { %1406 = vmatpush3.bf16.msra.mxu0 %v1505_v16 }
  0x67   : > { %1408 = vmatmul.mubr.bf16.vlgmr.msra.gmra.mrb[8].mxu0 %v1506_v17 }
  0xfa   : > { %v1310_v18 = vpop.f32.mrb[0].mxu0 }
  0xfb   : > { %v1332_v19 = vpop.f32.mrb[0].mxu1  ;;  %v1311_v20 = vpop.f32.mrb[1].mxu0 }
  0xfc   : > { %v1312_v21 = vadd.f32 %v1311_v20, %v1310_v18  ;;  %v1333_v22 = vpop.f32.mrb[1].mxu1  ;;  %v1313_v23 = vpop.f32.mrb[2].mxu0 }
  0xfd   : > { %v1334_v24 = vadd.f32 %v1333_v22, %v1332_v19  ;;  %v1335_v25 = vpop.f32.mrb[2].mxu1  ;;  %v1314_v26 = vpop.f32.mrb[3].mxu0 }
  0xfe   : > { %v1315_v27 = vadd.f32 %v1314_v26, %v1313_v23  ;;  %v1336_v28 = vpop.f32.mrb[3].mxu1 }
  0xff   : > { %v930_v29 = vadd.f32 %v1334_v24, %v1312_v21  ;;  %v1337_v30 = vadd.f32 %v1336_v28, %v1335_v25 }
 0x101   : > { %v933_v31 = vadd.f32 %v1337_v30, %v1315_v27 }
 0x11a   : > { %v1354_v32 = vpop.f32.mrb[4].mxu0 }
 0x11b   : > { %v1355_v33 = vpop.f32.mrb[5].mxu0 }
 0x11c   : > { %v1356_v34 = vadd.f32 %v1355_v33, %v1354_v32  ;;  %v1357_v35 = vpop.f32.mrb[6].mxu0  ;;  %v1376_v36 = vpop.f32.mrb[4].mxu1 }
 0x11d   : > { %v1358_v37 = vpop.f32.mrb[7].mxu0  ;;  %v1377_v40 = vpop.f32.mrb[5].mxu1 }
 0x11e   : > { %v971_v38 = vadd.f32 %v1356_v34, %v930_v29  ;;  %v1359_v39 = vadd.f32 %v1358_v37, %v1357_v35  ;;  %v1378_v41 = vadd.f32 %v1377_v40, %v1376_v36  ;;  %v1379_v42 = vpop.f32.mrb[6].mxu1 }
 0x11f   : > { %v1380_v44 = vpop.f32.mrb[7].mxu1 }
 0x120   : > { %v974_v43 = vadd.f32 %v1359_v39, %v933_v31  ;;  %v1381_v45 = vadd.f32 %v1380_v44, %v1379_v42  ;;  %v1012_v46 = vadd.f32 %v1378_v41, %v971_v38 }
 0x122   : > { %v1015_v47 = vadd.f32 %v1381_v45, %v974_v43 }
 0x13a   : > { %v1052_v48 = vpop.f32.mrb[8].mxu0 }
 0x13b   : > { %v1053_v49 = vadd.f32 %v1052_v48, %v1012_v46  ;;  %v1409_v50 = vpop.f32.mrb[9].mxu0 }
 0x13c   : > { %v1055_v51 = vpop.f32.mrb[10].mxu0 }
 0x13d   : > { %v1056_v52 = vadd.f32 %v1055_v51, %v1015_v47  ;;  %v1410_v53 = vpop.f32.mrb[11].mxu0  ;;  %v1077_v54 = vmul.f32 %v1053_v49, %v1053_v49 }
 0x13f   : > { %v1292_v55 = vpack.c.bf16 %v1056_v52, %v1053_v49  ;;  %v1069_v56 = vadd.f32 %v1056_v52, %v1053_v49  ;;  %v1078_v57 = vmul.f32 %v1056_v52, %v1056_v52 }
 0x141   : > { %1293 = vst [vmem:[%s213_s6] sm:$0xff] %v1292_v55   ;;  %v1070_v58 = vrot.slane %v1069_v56, 4  ;;  %v1079_v59 = vadd.f32 %v1078_v57, %v1077_v54 }
 0x143   : > { %v1071_v60 = vadd.f32 %v1070_v58, %v1069_v56  ;;  %v1080_v61 = vrot.slane %v1079_v59, 4 }
 0x145   : > { %v1072_v62 = vrot.slane %v1071_v60, 2  ;;  %v1081_v63 = vadd.f32 %v1080_v61, %v1079_v59 }
 0x147   : > { %v1073_v0 = vadd.f32 %v1072_v62, %v1071_v60  ;;  %v1082_v1 = vrot.slane %v1081_v63, 2 }
 0x149   : > { %v1074_v2 = vrot.slane %v1073_v0, 1  ;;  %v1083_v3 = vadd.f32 %v1082_v1, %v1081_v63 }
 0x14b   : > { %v1075_v4 = vadd.f32 %v1074_v2, %v1073_v0  ;;  %v1084_v5 = vrot.slane %v1083_v3, 1 }
 0x14d   : > { %1076 = vst [vmem:[%s217_s9] sm:$0x1] %v1075_v4  ;;  %v1085_v6 = vadd.f32 %v1084_v5, %v1083_v3 }
 0x14f   : > { %1086 = vst [vmem:[%s220_s12] sm:$0x1] %v1085_v6 }
 0x150 PF: > { %s15_s15 = sadd.s32 1, %s1513_s15  }
 0x151   : > { %p12_p5 = scmp.ge.s32.totalorder %s15_s15, 4  }
 0x153   :  { %14 = sbr.rel (!%p12_p5) target bundleno = 1 (0x1), region = 82 }

// kernel: _lambda_.60
= control target key start
LH: loop header
LB: loop body
LE: loop exit
PB: predicated region body
PF: predicated region fallthrough
CT: control target
= control target key end

     0   :  { %s659_s15 = smov 0   ;;  %s739_s0 = inlined_call_operand.vmem [shape: bf16[32,256], index: 0, kind: input, shape index: {}]   ;;  %s740_s1 = inlined_call_operand.vmem [shape: bf16[256,128], index: 1, kind: input, shape index: {}]   ;;  %s741_s2 = inlined_call_operand.vmem [shape: bf16[32,128], index: 2, kind: output, shape index: {0}]   ;;  %s742_s3 = inlined_call_operand.vmem [shape: f32[2,1,128], index: 3, kind: output, shape index: {1}]   ;;  %s743_s4 = inlined_call_operand.vmem [shape: f32[2,1,128], index: 4, kind: output, shape index: {2}]  }
   0x1 LB: > { %s665_s16 = sadd.s32 4294967295, %s632_s15   ;;  %p541_p0 = scmp.ge.s32.totalorder %s632_s15, 1  ;;  %s632_s15 = sphi %s659_s15, %s15_s15  }
   0x2   : > { %p169_p1 = scmp.lt.s32.totalorder %s632_s15, 3 }
   0x4   : > { %p170_p2 = pnand %p541_p0, %p169_p1 }
   0x5   : > { %v607_v0 = vld [vmem:[%s740_s1 + $0x40] sm:$0xff] (!%p170_p2)   ;;  %s542_s19 = sshll.u32 (!%p170_p2), %s665_s16, 1  ;;  %v609_v2 = vld [vmem:[%s740_s1 + $0x48] sm:$0xff] (!%p170_p2)   ;;  %v611_v4 = vld [vmem:[%s740_s1 + $0x50] sm:$0xff] (!%p170_p2)   ;;  %p215_p4 = scmp.lt.s32.totalorder (!%p170_p2), %s665_s16, 1 }
   0x6   : > { %173 = sbr.rel (%p170_p2) target bundleno = 272 (0x110), region = 28  ;;  %v608_v1 = vld [vmem:[%s740_s1] sm:$0xff] (!%p170_p2)   ;;  %577 = vmatprep.subr.bf16.mxu0 (!%p170_p2), %v607_v0  ;;  %v610_v3 = vld [vmem:[%s740_s1 + $0x8] sm:$0xff] (!%p170_p2)   ;;  %p203_p3 = scmp.lt.s32.totalorder (!%p170_p2), %s542_s19, 3  ;;  %v612_v5 = vld [vmem:[%s740_s1 + $0x10] sm:$0xff] (!%p170_p2)  }
   0x7   : > { %578 = vmatpush3.bf16.msra.mxu0 (!%p170_p2), %v608_v1  ;;  %v613_v6 = vld [vmem:[%s740_s1 + $0x58] sm:$0xff] (!%p170_p2)   ;;  %v615_v8 = vld [vmem:[%s740_s1 + $0x60] sm:$0xff] (!%p170_p2)   ;;  %v617_v10 = vld [vmem:[%s740_s1 + $0x68] sm:$0xff] (!%p170_p2)  }
   0x8   : > { %579 = vmatprep.subr.bf16.mxu0 (!%p170_p2), %v609_v2  ;;  %v614_v7 = vld [vmem:[%s740_s1 + $0x18] sm:$0xff] (!%p170_p2)   ;;  %v616_v9 = vld [vmem:[%s740_s1 + $0x20] sm:$0xff] (!%p170_p2)   ;;  %v618_v12 = vld [vmem:[%s740_s1 + $0x28] sm:$0xff] (!%p170_p2)  }
   0x9   : > { %v619_v13 = vld [vmem:[%s740_s1 + $0x70] sm:$0xff] (!%p170_p2)   ;;  %v621_v15 = vld [vmem:[%s740_s1 + $0x78] sm:$0xff] (!%p170_p2)  }
   0xa   : > { %v620_v14 = vld [vmem:[%s740_s1 + $0x30] sm:$0xff] (!%p170_p2)   ;;  %v622_v16 = vld [vmem:[%s740_s1 + $0x38] sm:$0xff] (!%p170_p2)  }
   0xb   : > { %580 = vmatpush3.bf16.msra.mxu0 (!%p170_p2), %v610_v3 }
   0xc   : > { %581 = vmatprep.subr.bf16.mxu0 (!%p170_p2), %v611_v4 }
   0xd   : > { %s745_s19 = smov (!%p203_p3, %s542_s19), 3  ;;  %s747_s16 = smov (!%p215_p4, %s665_s16), 1 }
   0xe   : > { %s569_s8 = sshll.u32 %s745_s19, 3  ;;  %s546_s5 = sshll.u32 %s745_s19, 2 }
   0xf   : > { %582 = vmatpush3.bf16.msra.mxu0 %v612_v5  ;;  %s207_s13 = scalar_lea.vmem %s739_s0, %s569_s8  ;;  %s213_s8 = scalar_lea.vmem %s741_s2, %s546_s5 }
  0x10   : > { %583 = vmatprep.subr.bf16.mxu0 %v613_v6  ;;  %v625_v11 = vld [vmem:[%s207_s13 + $0x4] ss:$8 sps:$4 sm:$0xff]   ;;  %v623_v17 = vld [vmem:[%s207_s13] ss:$8 sps:$4 sm:$0xff]   ;;  %s217_s10 = scalar_lea.vmem %s742_s3, %s747_s16  ;;  %s220_s13 = scalar_lea.vmem %s743_s4, %s747_s16 }
  0x11   : > { %394 = vmatprep.mubr.bf16.mxu0 %v625_v11 }
  0x13   : > { %584 = vmatpush3.bf16.msra.mxu0 %v614_v7 }
  0x14   : > { %585 = vmatprep.subr.bf16.mxu0 %v615_v8 }
  0x17   : > { %586 = vmatpush3.bf16.msra.mxu0 %v616_v9 }
  0x18   : > { %587 = vmatprep.subr.bf16.mxu0 %v617_v10 }
  0x1b   : > { %588 = vmatpush3.bf16.msra.mxu0 %v618_v12 }
  0x1c   : > { %589 = vmatprep.subr.bf16.mxu0 %v619_v13 }
  0x1f   : > { %590 = vmatpush3.bf16.msra.mxu0 %v620_v14 }
  0x20   : > { %591 = vmatprep.subr.bf16.mxu0 %v621_v15 }
  0x23   : > { %592 = vmatpush3.bf16.msra.mxu0 %v622_v16 }
  0x26   : > { %395 = vmatmul.mubr.bf16.vlgmr.msra.gmra.mrb[0].mxu0 %v623_v17 }
  0xf9   : > { %v593_v18 = vpop.f32.mrb[0].mxu0 }
  0xfa   : > { %v594_v19 = vpop.f32.mrb[1].mxu0 }
  0xfb   : > { %v595_v20 = vadd.f32 %v594_v19, %v593_v18  ;;  %v596_v21 = vpop.f32.mrb[2].mxu0 }
  0xfc   : > { %v597_v22 = vpop.f32.mrb[3].mxu0 }
  0xfd   : > { %v598_v23 = vadd.f32 %v597_v22, %v596_v21  ;;  %v421_v24 = vmul.f32 %v595_v20, %v595_v20 }
  0xff   : > { %v575_v25 = vpack.c.bf16 %v598_v23, %v595_v20  ;;  %v413_v26 = vadd.f32 %v598_v23, %v595_v20  ;;  %v422_v27 = vmul.f32 %v598_v23, %v598_v23 }
 0x101   : > { %576 = vst [vmem:[%s213_s8] sm:$0xff] %v575_v25   ;;  %v414_v28 = vrot.slane %v413_v26, 4  ;;  %v423_v29 = vadd.f32 %v422_v27, %v421_v24 }
 0x103   : > { %v415_v30 = vadd.f32 %v414_v28, %v413_v26  ;;  %v424_v31 = vrot.slane %v423_v29, 4 }
 0x105   : > { %v416_v32 = vrot.slane %v415_v30, 2  ;;  %v425_v33 = vadd.f32 %v424_v31, %v423_v29 }
 0x107   : > { %v417_v34 = vadd.f32 %v416_v32, %v415_v30  ;;  %v426_v35 = vrot.slane %v425_v33, 2 }
 0x109   : > { %v418_v36 = vrot.slane %v417_v34, 1  ;;  %v427_v37 = vadd.f32 %v426_v35, %v425_v33 }
 0x10b   : > { %v419_v38 = vadd.f32 %v418_v36, %v417_v34  ;;  %v428_v39 = vrot.slane %v427_v37, 1 }
 0x10d   : > { %420 = vst [vmem:[%s217_s10] sm:$0x1] %v419_v38  ;;  %v429_v40 = vadd.f32 %v428_v39, %v427_v37 }
 0x10f   : > { %430 = vst [vmem:[%s220_s13] sm:$0x1] %v429_v40 }
 0x110 PF: > { %s15_s15 = sadd.s32 1, %s632_s15  }
 0x111   : > { %p12_p5 = scmp.ge.s32.totalorder %s15_s15, 4  }
 0x113   :  { %14 = sbr.rel (!%p12_p5) target bundleno = 1 (0x1), region = 82 }

// kernel: _lambda_.54
= control target key start
LH: loop header
LB: loop body
LE: loop exit
PB: predicated region body
PF: predicated region fallthrough
CT: control target
= control target key end

     0   :  { %s580_s27 = smov 0   ;;  %s649_s0 = inlined_call_operand.vmem [shape: bf16[32,128], index: 0, kind: input, shape index: {}]   ;;  %s650_s1 = inlined_call_operand.vmem [shape: bf16[32,128], index: 1, kind: input, shape index: {}]   ;;  %s651_s2 = inlined_call_operand.vmem [shape: f32[2,1,128], index: 2, kind: input, shape index: {}]   ;;  %s652_s3 = inlined_call_operand.vmem [shape: f32[2,1,128], index: 3, kind: input, shape index: {}]   ;;  %s653_s4 = inlined_call_operand.vmem [shape: f32[2,1,128], index: 4, kind: input, shape index: {}]   ;;  %s654_s5 = inlined_call_operand.vmem [shape: f32[2,1,128], index: 5, kind: input, shape index: {}]   ;;  %s655_s6 = inlined_call_operand.vmem [shape: f32[2,128], index: 6, kind: input, shape index: {}]   ;;  %s656_s7 = inlined_call_operand.vmem [shape: f32[2,128], index: 7, kind: input, shape index: {}]   ;;  %s657_s8 = inlined_call_operand.vmem [shape: bf16[32,128], index: 8, kind: output, shape index: {}]  }
   0x1 LB: > { %s485_s28 = sadd.s32 4294967295, %s533_s27   ;;  %p489_p0 = scmp.ge.s32.totalorder %s533_s27, 1  ;;  %s533_s27 = sphi %s580_s27, %s18_s27  }
   0x2   : > { %p274_p1 = scmp.lt.s32.totalorder %s533_s27, 3 }
   0x4   : > { %p275_p2 = pnand %p489_p0, %p274_p1 }
   0x5   : > { %v331_v0 = vld [vmem:[%s651_s2] sm:$0x1] (!%p275_p2)  ;;  %v332_v1 = vld [vmem:[%s651_s2 + $0x1] sm:$0x1] (!%p275_p2)  ;;  %vm333_vm0 = vcmask (!%p275_p2), 1040384   ;;  %s490_s23 = sshll.u32 (!%p275_p2), %s485_s28, 1  ;;  %v381_v31 = vlaneseq (!%p275_p2) }
   0x6   : > { %278 = sbr.rel (%p275_p2) target bundleno = 50 (0x32), region = 52  ;;  %v334_v2 = vsel (!%p275_p2), %vm333_vm0, %v331_v0, 0.0  ;;  %v335_v3 = vsel (!%p275_p2), %vm333_vm0, %v332_v1, 0.0  ;;  %v338_v4 = vld [vmem:[%s652_s3] sm:$0x1] (!%p275_p2)  ;;  %p314_p3 = scmp.lt.s32.totalorder (!%p275_p2), %s490_s23, 3 }
   0x7   : > { %v336_v5 = vadd.f32 (!%p275_p2), %v335_v3, %v334_v2  ;;  %v339_v6 = vld [vmem:[%s652_s3 + $0x1] sm:$0x1] (!%p275_p2)  ;;  %v340_v7 = vsel (!%p275_p2), %vm333_vm0, %v338_v4, 0.0  ;;  %v354_v9 = vld [vmem:[%s653_s4] sm:$0x1] (!%p275_p2)  ;;  %v382_v33 = vshrl.u32 (!%p275_p2), %v381_v31, 7 }
   0x8   : > { %v341_v8 = vsel (!%p275_p2), %vm333_vm0, %v339_v6, 0.0  ;;  %v355_v12 = vld [vmem:[%s653_s4 + $0x1] sm:$0x1] (!%p275_p2)  ;;  %v356_v13 = vsel (!%p275_p2), %vm333_vm0, %v354_v9, 0.0  ;;  %v360_v14 = vld [vmem:[%s654_s5] sm:$0x1] (!%p275_p2) }
   0x9   : > { %v337_v10 = vmul.f32 (!%p275_p2), 0.03125, %v336_v5  ;;  %v342_v11 = vadd.f32 (!%p275_p2), %v341_v8, %v340_v7  ;;  %v357_v15 = vsel (!%p275_p2), %vm333_vm0, %v355_v12, 0.0  ;;  %v361_v16 = vld [vmem:[%s654_s5 + $0x1] sm:$0x1] (!%p275_p2)  ;;  %v362_v17 = vsel (!%p275_p2), %vm333_vm0, %v360_v14, 0.0 }
   0xa   : > { %v358_v20 = vadd.f32 (!%p275_p2), %v357_v15, %v356_v13  ;;  %v363_v21 = vsel (!%p275_p2), %vm333_vm0, %v361_v16, 0.0  ;;  %v347_v34 = vld [vmem:[%s655_s6] sm:$0x1] (!%p275_p2)  ;;  %v383_v35 = vsub.s32 (!%p275_p2), 0, %v382_v33  ;;  %v351_v41 = vld [vmem:[%s655_s6 + $0x1] sm:$0x1] (!%p275_p2) }
   0xb   : > { %v343_v18 = vmul.f32 (!%p275_p2), 0.03125, %v342_v11  ;;  %v344_v19 = vmul.f32 (!%p275_p2), %v337_v10, %v337_v10  ;;  %v364_v22 = vadd.f32 (!%p275_p2), %v363_v21, %v362_v17  ;;  %v369_v39 = vld [vmem:[%s656_s7] sm:$0x1] (!%p275_p2)  ;;  %v373_v51 = vld [vmem:[%s656_s7 + $0x1] sm:$0x1] (!%p275_p2) }
   0xc   : > { %v359_v24 = vmul.f32 (!%p275_p2), 0.03125, %v358_v20 }
   0xd   : > { %v345_v23 = vsub.f32 %v343_v18, %v344_v19  ;;  %v365_v25 = vmul.f32 0.03125, %v364_v22  ;;  %s659_s23 = smov (!%p314_p3, %s490_s23), 3 }
   0xe   : > { %v366_v27 = vmul.f32 %v359_v24, %v359_v24  ;;  %s620_s24 = sshll.u32 %s659_s23, 2 }
   0xf   : > { %v346_v26 = vmax.f32 %v345_v23, 0.0  ;;  %s317_s28 = scalar_lea.vmem %s649_s0, %s620_s24  ;;  %s323_s11 = scalar_lea.vmem %s650_s1, %s620_s24 }
  0x10   : > { %v367_v29 = vsub.f32 %v365_v25, %v366_v27  ;;  %v503_v37 = vld [vmem:[%s317_s28] sm:$0xff]   ;;  %s329_s20 = scalar_lea.vmem %s657_s8, %s620_s24 }
  0x11   : > { %v348_v28 = vadd.f32 1e-05, %v346_v26  ;;  %v507_v40 = vld [vmem:[%s323_s11] sm:$0xff]   ;;  %v504_v43 = vunpack.c.l.bf16 %v503_v37  ;;  %v505_v44 = vunpack.c.h.bf16 %v503_v37 }
  0x12   : > { %v368_v30 = vmax.f32 %v367_v29, 0.0  ;;  %v508_v48 = vunpack.c.l.bf16 %v507_v40  ;;  %v509_v49 = vunpack.c.h.bf16 %v507_v40 }
  0x13   : > { %523 = vrsqrt.f32 %v348_v28 }
  0x14   : > { %v370_v32 = vadd.f32 1e-05, %v368_v30 }
  0x16   : > { %525 = vrsqrt.f32 %v370_v32 }
  0x1d   : > { %v524_v36 = vpop.eup %523 }
  0x1e   : > { %v350_v38 = vmul.f32 %v524_v36, %v347_v34 }
  0x20   : > { %v352_v42 = vmul.f32 %v350_v38, %v337_v10  ;;  %v384_v45 = vrot.slane %v350_v38, %v383_v35  ;;  %v526_v46 = vpop.eup %525 }
  0x21   : > { %v372_v47 = vmul.f32 %v526_v46, %v369_v39 }
  0x22   : > { %v353_v50 = vsub.f32 %v351_v41, %v352_v42  ;;  %v385_v53 = vmul.f32 %v504_v43, %v384_v45  ;;  %v386_v54 = vmul.f32 %v505_v44, %v384_v45 }
  0x23   : > { %v374_v52 = vmul.f32 %v372_v47, %v359_v24  ;;  %v394_v55 = vrot.slane %v372_v47, %v383_v35 }
  0x25   : > { %v375_v56 = vsub.f32 %v373_v51, %v374_v52  ;;  %v395_v57 = vmul.f32 %v508_v48, %v394_v55  ;;  %v396_v58 = vmul.f32 %v509_v49, %v394_v55 }
  0x27   : > { %v376_v59 = vadd.f32 %v375_v56, %v353_v50  ;;  %v397_v60 = vadd.f32 %v395_v57, %v385_v53  ;;  %v398_v61 = vadd.f32 %v396_v58, %v386_v54 }
  0x29   : > { %v402_v62 = vrot.slane %v376_v59, %v383_v35 }
  0x2b   : > { %v403_v63 = vadd.f32 %v402_v62, %v397_v60  ;;  %v404_v0 = vadd.f32 %v402_v62, %v398_v61 }
  0x2d   : > { %v405_v1 = vmax.f32 %v403_v63, 0.0  ;;  %v406_v2 = vmax.f32 %v404_v0, 0.0 }
  0x2f   : > { %v513_v3 = vpack.c.bf16 %v406_v2, %v405_v1 }
  0x31   : > { %514 = vst [vmem:[%s329_s20] sm:$0xff] %v513_v3  }
  0x32 PF: > { %s18_s27 = sadd.s32 1, %s533_s27  }
  0x33   : > { %p15_p4 = scmp.ge.s32.totalorder %s18_s27, 4  }
  0x35   :  { %17 = sbr.rel (!%p15_p4) target bundleno = 1 (0x1), region = 85 }

// kernel: _lambda_.72
= control target key start
LH: loop header
LB: loop body
LE: loop exit
PB: predicated region body
PF: predicated region fallthrough
CT: control target
= control target key end

     0   :  { %s822_s15 = smov 0   ;;  %s926_s0 = inlined_call_operand.vmem [shape: bf16[32,384], index: 0, kind: input, shape index: {}]   ;;  %s927_s1 = inlined_call_operand.vmem [shape: bf16[384,128], index: 1, kind: input, shape index: {}]   ;;  %s928_s2 = inlined_call_operand.vmem [shape: bf16[32,128], index: 2, kind: output, shape index: {0}]   ;;  %s929_s3 = inlined_call_operand.vmem [shape: f32[2,1,128], index: 3, kind: output, shape index: {1}]   ;;  %s930_s4 = inlined_call_operand.vmem [shape: f32[2,1,128], index: 4, kind: output, shape index: {2}]  }
   0x1 LB: > { %s828_s16 = sadd.s32 4294967295, %s793_s15   ;;  %p654_p0 = scmp.ge.s32.totalorder %s793_s15, 1  ;;  %s793_s15 = sphi %s822_s15, %s15_s15  }
   0x2   : > { %p169_p1 = scmp.lt.s32.totalorder %s793_s15, 3 }
   0x4   : > { %p170_p2 = pnand %p654_p0, %p169_p1 }
   0x5   : > { %v759_v0 = vld [vmem:[%s927_s1 + $0x40] sm:$0xff] (!%p170_p2)   ;;  %v795_v1 = vmov (!%p170_p2), 0.0   ;;  %v762_v4 = vld [vmem:[%s927_s1 + $0x48] sm:$0xff] (!%p170_p2)   ;;  %vm796_vm0 = vmmov (!%p170_p2), 0   ;;  %v765_v7 = vld [vmem:[%s927_s1 + $0x50] sm:$0xff] (!%p170_p2)   ;;  %s655_s7 = sshll.u32 (!%p170_p2), %s828_s16, 1 }
   0x6   : > { %173 = sbr.rel (%p170_p2) target bundleno = 274 (0x112), region = 28  ;;  %728 = vmatprep.subr.bf16.mxu1 (!%p170_p2), %v795_v1  ;;  %v760_v2 = vld [vmem:[%s927_s1] sm:$0xff] (!%p170_p2)   ;;  %697 = vmatprep.subr.bf16.mxu0 (!%p170_p2), %v759_v0  ;;  %v763_v5 = vld [vmem:[%s927_s1 + $0x8] sm:$0xff] (!%p170_p2)   ;;  %v766_v8 = vld [vmem:[%s927_s1 + $0x10] sm:$0xff] (!%p170_p2)   ;;  %p203_p3 = scmp.lt.s32.totalorder (!%p170_p2), %s655_s7, 3 }
   0x7   : > { %v761_v3 = vld [vmem:[%s927_s1 + $0x80] sm:$0xff] (!%p170_p2)   ;;  %698 = vmatpush3.bf16.msra.mxu0 (!%p170_p2), %v760_v2  ;;  %744 = vmatprep.mubr.msk.bf16.mxu1 (!%p170_p2), %vm796_vm0, %v795_v1  ;;  %v764_v6 = vld [vmem:[%s927_s1 + $0x88] sm:$0xff] (!%p170_p2)   ;;  %v767_v9 = vld [vmem:[%s927_s1 + $0x90] sm:$0xff] (!%p170_p2)   ;;  %p215_p4 = scmp.lt.s32.totalorder (!%p170_p2), %s828_s16, 1 }
   0x8   : > { %729 = vmatpush3.bf16.msra.mxu1 (!%p170_p2), %v761_v3  ;;  %699 = vmatprep.subr.bf16.mxu0 (!%p170_p2), %v762_v4  ;;  %v768_v10 = vld [vmem:[%s927_s1 + $0x58] sm:$0xff] (!%p170_p2)   ;;  %v771_v13 = vld [vmem:[%s927_s1 + $0x60] sm:$0xff] (!%p170_p2)   ;;  %v774_v16 = vld [vmem:[%s927_s1 + $0x68] sm:$0xff] (!%p170_p2)  }
   0x9   : > { %730 = vmatprep.subr.bf16.mxu1 (!%p170_p2), %v795_v1  ;;  %v769_v11 = vld [vmem:[%s927_s1 + $0x18] sm:$0xff] (!%p170_p2)   ;;  %v772_v14 = vld [vmem:[%s927_s1 + $0x20] sm:$0xff] (!%p170_p2)   ;;  %v775_v17 = vld [vmem:[%s927_s1 + $0x28] sm:$0xff] (!%p170_p2)  }
   0xa   : > { %v770_v12 = vld [vmem:[%s927_s1 + $0x98] sm:$0xff] (!%p170_p2)   ;;  %v773_v15 = vld [vmem:[%s927_s1 + $0xa0] sm:$0xff] (!%p170_p2)   ;;  %v776_v18 = vld [vmem:[%s927_s1 + $0xa8] sm:$0xff] (!%p170_p2)  }
   0xb   : > { %700 = vmatpush3.bf16.msra.mxu0 (!%p170_p2), %v763_v5  ;;  %v777_v19 = vld [vmem:[%s927_s1 + $0x70] sm:$0xff] (!%p170_p2)   ;;  %v780_v22 = vld [vmem:[%s927_s1 + $0x78] sm:$0xff] (!%p170_p2)  }
   0xc   : > { %731 = vmatpush3.bf16.msra.mxu1 (!%p170_p2), %v764_v6  ;;  %701 = vmatprep.subr.bf16.mxu0 (!%p170_p2), %v765_v7  ;;  %v778_v20 = vld [vmem:[%s927_s1 + $0x30] sm:$0xff] (!%p170_p2)   ;;  %v781_v24 = vld [vmem:[%s927_s1 + $0x38] sm:$0xff] (!%p170_p2)  }
   0xd   : > { %732 = vmatprep.subr.bf16.mxu1 %v795_v1  ;;  %s932_s7 = smov (!%p203_p3, %s655_s7), 3  ;;  %v779_v21 = vld [vmem:[%s927_s1 + $0xb0] sm:$0xff]   ;;  %v782_v25 = vld [vmem:[%s927_s1 + $0xb8] sm:$0xff]   ;;  %s934_s16 = smov (!%p215_p4, %s828_s16), 1 }
   0xe   : > { %s748_s28 = smul.u32 12, %s932_s7  ;;  %s658_s23 = sshll.u32 %s932_s7, 2 }
   0xf   : > { %702 = vmatpush3.bf16.msra.mxu0 %v766_v8  ;;  %s213_s26 = scalar_lea.vmem %s928_s2, %s658_s23  ;;  %s220_s5 = scalar_lea.vmem %s930_s4, %s934_s16 }
  0x10   : > { %733 = vmatpush3.bf16.msra.mxu1 %v767_v9  ;;  %703 = vmatprep.subr.bf16.mxu0 %v768_v10  ;;  %s207_s12 = scalar_lea.vmem %s926_s0, %s748_s28  ;;  %s217_s28 = scalar_lea.vmem %s929_s3, %s934_s16 }
  0x11   : > { %734 = vmatprep.subr.bf16.mxu1 %v795_v1  ;;  %v785_v23 = vld [vmem:[%s207_s12 + $0x4] ss:$12 sps:$4 sm:$0xff]   ;;  %v783_v26 = vld [vmem:[%s207_s12] ss:$12 sps:$4 sm:$0xff]   ;;  %v786_v27 = vld [vmem:[%s207_s12 + $0x8] ss:$12 sps:$4 sm:$0xff]  }
  0x12   : > { %466 = vmatprep.mubr.bf16.mxu0 %v785_v23 }
  0x13   : > { %704 = vmatpush3.bf16.msra.mxu0 %v769_v11 }
  0x14   : > { %735 = vmatpush3.bf16.msra.mxu1 %v770_v12  ;;  %705 = vmatprep.subr.bf16.mxu0 %v771_v13 }
  0x15   : > { %736 = vmatprep.subr.bf16.mxu1 %v795_v1 }
  0x17   : > { %706 = vmatpush3.bf16.msra.mxu0 %v772_v14 }
  0x18   : > { %737 = vmatpush3.bf16.msra.mxu1 %v773_v15  ;;  %707 = vmatprep.subr.bf16.mxu0 %v774_v16 }
  0x19   : > { %738 = vmatprep.subr.bf16.mxu1 %v795_v1 }
  0x1b   : > { %708 = vmatpush3.bf16.msra.mxu0 %v775_v17 }
  0x1c   : > { %739 = vmatpush3.bf16.msra.mxu1 %v776_v18  ;;  %709 = vmatprep.subr.bf16.mxu0 %v777_v19 }
  0x1d   : > { %740 = vmatprep.subr.bf16.mxu1 %v795_v1 }
  0x1f   : > { %710 = vmatpush3.bf16.msra.mxu0 %v778_v20 }
  0x20   : > { %741 = vmatpush3.bf16.msra.mxu1 %v779_v21  ;;  %711 = vmatprep.subr.bf16.mxu0 %v780_v22 }
  0x21   : > { %742 = vmatprep.subr.bf16.mxu1 %v795_v1 }
  0x23   : > { %712 = vmatpush3.bf16.msra.mxu0 %v781_v24 }
  0x24   : > { %743 = vmatpush3.bf16.msra.mxu1 %v782_v25 }
  0x26   : > { %467 = vmatmul.mubr.bf16.vlgmr.msra.gmra.mrb[0].mxu0 %v783_v26 }
  0x27   : > { %745 = vmatmul.mubr.bf16.vlgmr.msra.gmra.mrb[0].mxu1 %v786_v27 }
  0xf9   : > { %v713_v28 = vpop.f32.mrb[0].mxu0 }
  0xfa   : > { %v509_v29 = vpop.f32.mrb[0].mxu1  ;;  %v714_v30 = vpop.f32.mrb[1].mxu0 }
  0xfb   : > { %v715_v31 = vadd.f32 %v714_v30, %v713_v28  ;;  %v746_v32 = vpop.f32.mrb[1].mxu1  ;;  %v716_v33 = vpop.f32.mrb[2].mxu0 }
  0xfc   : > { %v512_v34 = vpop.f32.mrb[2].mxu1  ;;  %v717_v35 = vpop.f32.mrb[3].mxu0 }
  0xfd   : > { %v510_v36 = vadd.f32 %v715_v31, %v509_v29  ;;  %v718_v37 = vadd.f32 %v717_v35, %v716_v33  ;;  %v747_v38 = vpop.f32.mrb[3].mxu1 }
  0xff   : > { %v513_v39 = vadd.f32 %v718_v37, %v512_v34  ;;  %v534_v40 = vmul.f32 %v510_v36, %v510_v36 }
 0x101   : > { %v695_v41 = vpack.c.bf16 %v513_v39, %v510_v36  ;;  %v526_v42 = vadd.f32 %v513_v39, %v510_v36  ;;  %v535_v43 = vmul.f32 %v513_v39, %v513_v39 }
 0x103   : > { %696 = vst [vmem:[%s213_s26] sm:$0xff] %v695_v41   ;;  %v527_v44 = vrot.slane %v526_v42, 4  ;;  %v536_v45 = vadd.f32 %v535_v43, %v534_v40 }
 0x105   : > { %v528_v46 = vadd.f32 %v527_v44, %v526_v42  ;;  %v537_v47 = vrot.slane %v536_v45, 4 }
 0x107   : > { %v529_v48 = vrot.slane %v528_v46, 2  ;;  %v538_v49 = vadd.f32 %v537_v47, %v536_v45 }
 0x109   : > { %v530_v50 = vadd.f32 %v529_v48, %v528_v46  ;;  %v539_v51 = vrot.slane %v538_v49, 2 }
 0x10b   : > { %v531_v52 = vrot.slane %v530_v50, 1  ;;  %v540_v53 = vadd.f32 %v539_v51, %v538_v49 }
 0x10d   : > { %v532_v54 = vadd.f32 %v531_v52, %v530_v50  ;;  %v541_v55 = vrot.slane %v540_v53, 1 }
 0x10f   : > { %533 = vst [vmem:[%s217_s28] sm:$0x1] %v532_v54  ;;  %v542_v56 = vadd.f32 %v541_v55, %v540_v53 }
 0x111   : > { %543 = vst [vmem:[%s220_s5] sm:$0x1] %v542_v56 }
 0x112 PF: > { %s15_s15 = sadd.s32 1, %s793_s15  }
 0x113   : > { %p12_p5 = scmp.ge.s32.totalorder %s15_s15, 4  }
 0x115   :  { %14 = sbr.rel (!%p12_p5) target bundleno = 1 (0x1), region = 82 }

// kernel: _lambda_.77
= control target key start
LH: loop header
LB: loop body
LE: loop exit
PB: predicated region body
PF: predicated region fallthrough
CT: control target
= control target key end

     0   :  { %v196_v0 = vmov 0.0   ;;  %vm197_vm0 = vmmov 0   ;;  %s259_s1 = inlined_call_operand.vmem [shape: bf16[128,128], index: 1, kind: input, shape index: {}]   ;;  %s260_s0 = inlined_call_operand.vmem [shape: bf16[8,128], index: 0, kind: input, shape index: {}]   ;;  %s261_s2 = inlined_call_operand.vmem [shape: bf16[8,128], index: 2, kind: output, shape index: {0}]   ;;  %s262_s3 = inlined_call_operand.vmem [shape: f32[1,1,128], index: 3, kind: output, shape index: {1}]   ;;  %s263_s4 = inlined_call_operand.vmem [shape: f32[1,1,128], index: 4, kind: output, shape index: {2}]  }
   0x1   :  { %166 = vmatprep.subr.bf16.mxu0 %v196_v0  ;;  %v188_v1 = vld [vmem:[%s259_s1] sm:$0xff]   ;;  %182 = vmatprep.mubr.msk.bf16.mxu0 %vm197_vm0, %v196_v0  ;;  %v189_v2 = vld [vmem:[%s259_s1 + $0x8] sm:$0xff]   ;;  %v190_v3 = vld [vmem:[%s259_s1 + $0x10] sm:$0xff]  }
   0x2   :  { %167 = vmatpush3.bf16.msra.mxu0 %v188_v1  ;;  %v191_v4 = vld [vmem:[%s259_s1 + $0x18] sm:$0xff]   ;;  %v192_v5 = vld [vmem:[%s259_s1 + $0x20] sm:$0xff]   ;;  %v193_v6 = vld [vmem:[%s259_s1 + $0x28] sm:$0xff]  }
   0x3   :  { %168 = vmatprep.subr.bf16.mxu0 %v196_v0  ;;  %v194_v7 = vld [vmem:[%s259_s1 + $0x30] sm:$0xff]   ;;  %v195_v8 = vld [vmem:[%s259_s1 + $0x38] sm:$0xff]   ;;  %v15_v9 = vld [vmem:[%s260_s0] sm:$0xf] }
   0x6   :  { %169 = vmatpush3.bf16.msra.mxu0 %v189_v2 }
   0x7   :  { %170 = vmatprep.subr.bf16.mxu0 %v196_v0 }
   0xa   :  { %171 = vmatpush3.bf16.msra.mxu0 %v190_v3 }
   0xb   :  { %172 = vmatprep.subr.bf16.mxu0 %v196_v0 }
   0xe   :  { %173 = vmatpush3.bf16.msra.mxu0 %v191_v4 }
   0xf   :  { %174 = vmatprep.subr.bf16.mxu0 %v196_v0 }
  0x12   :  { %175 = vmatpush3.bf16.msra.mxu0 %v192_v5 }
  0x13   :  { %176 = vmatprep.subr.bf16.mxu0 %v196_v0 }
  0x16   :  { %177 = vmatpush3.bf16.msra.mxu0 %v193_v6 }
  0x17   :  { %178 = vmatprep.subr.bf16.mxu0 %v196_v0 }
  0x1a   :  { %179 = vmatpush3.bf16.msra.mxu0 %v194_v7 }
  0x1b   :  { %180 = vmatprep.subr.bf16.mxu0 %v196_v0 }
  0x1e   :  { %181 = vmatpush3.bf16.msra.mxu0 %v195_v8 }
  0x21   :  { %183 = vmatmul.mubr.bf16.vlgmr.msra.gmra.mrb[0].mxu0 %v15_v9 }
  0xf4   :  { %v114_v10 = vpop.f32.mrb[0].mxu0 }
  0xf5   :  { %v120_v11 = vpack.c.bf16 %v114_v10, %v114_v10  ;;  %v122_v12 = vrot.slane %v114_v10, 4  ;;  %v129_v13 = vmul.f32 %v114_v10, %v114_v10  ;;  %v184_v14 = vpop.f32.mrb[1].mxu0 }
  0xf6   :  { %v117_v15 = vpop.f32.mrb[2].mxu0 }
  0xf7   :  { %121 = vst [vmem:[%s261_s2] sm:$0xf] %v120_v11  ;;  %v123_v16 = vadd.f32 %v122_v12, %v114_v10  ;;  %v130_v17 = vrot.slane %v129_v13, 4  ;;  %v185_v18 = vpop.f32.mrb[3].mxu0 }
  0xf9   :  { %v124_v19 = vrot.slane %v123_v16, 2  ;;  %v131_v20 = vadd.f32 %v130_v17, %v129_v13 }
  0xfb   :  { %v125_v21 = vadd.f32 %v124_v19, %v123_v16  ;;  %v132_v22 = vrot.slane %v131_v20, 2 }
  0xfd   :  { %v126_v23 = vrot.slane %v125_v21, 1  ;;  %v133_v24 = vadd.f32 %v132_v22, %v131_v20 }
  0xff   :  { %v127_v25 = vadd.f32 %v126_v23, %v125_v21  ;;  %v134_v26 = vrot.slane %v133_v24, 1 }
 0x101   :  { %128 = vst [vmem:[%s262_s3] sm:$0x1] %v127_v25  ;;  %v135_v27 = vadd.f32 %v134_v26, %v133_v24 }
 0x103   :  { %136 = vst [vmem:[%s263_s4] sm:$0x1] %v135_v27 }

// kernel: _lambda_.75
= control target key start
LH: loop header
LB: loop body
LE: loop exit
PB: predicated region body
PF: predicated region fallthrough
CT: control target
= control target key end

     0   :  { %v35_v8 = vlaneseq  ;;  %s97_s1 = inlined_call_operand.vmem [shape: f32[1,1,128], index: 1, kind: input, shape index: {}]   ;;  %s98_s2 = inlined_call_operand.vmem [shape: f32[1,1,128], index: 2, kind: input, shape index: {}]   ;;  %s99_s0 = inlined_call_operand.vmem [shape: bf16[8,128], index: 0, kind: input, shape index: {}]   ;;  %s100_s3 = inlined_call_operand.vmem [shape: f32[2,128], index: 3, kind: input, shape index: {}]   ;;  %s101_s4 = inlined_call_operand.vmem [shape: bf16[8,128], index: 4, kind: output, shape index: {}]  }
   0x1   :  { %v17_v0 = vld [vmem:[%s97_s1] sm:$0x1]  ;;  %v30_v16 = vld [vmem:[%s100_s3 + $0x1] sm:$0x1] }
   0x2   :  { %v20_v1 = vld [vmem:[%s98_s2] sm:$0x1]  ;;  %v19_v2 = vmul.f32 0.125, %v17_v0  ;;  %v36_v9 = vshrl.u32 %v35_v8, 7 }
   0x3   :  { %v22_v3 = vmul.f32 0.125, %v20_v1  ;;  %v26_v10 = vld [vmem:[%s100_s3] sm:$0x1] }
   0x4   :  { %v23_v4 = vmul.f32 %v19_v2, %v19_v2  ;;  %v33_v11 = vld [vmem:[%s99_s0] sm:$0xf]  ;;  %v37_v12 = vsub.s32 0, %v36_v9 }
   0x5   :  { %v34_v15 = vunpack.c.l.bf16 %v33_v11 }
   0x6   :  { %v24_v5 = vsub.f32 %v22_v3, %v23_v4 }
   0x8   :  { %v25_v6 = vmax.f32 %v24_v5, 0.0 }
   0xa   :  { %v27_v7 = vadd.f32 1e-05, %v25_v6 }
   0xc   :  { %52 = vrsqrt.f32 %v27_v7 }
  0x16   :  { %v53_v13 = vpop.eup %52 }
  0x17   :  { %v29_v14 = vmul.f32 %v53_v13, %v26_v10 }
  0x19   :  { %v31_v17 = vmul.f32 %v29_v14, %v19_v2  ;;  %v38_v18 = vrot.slane %v29_v14, %v37_v12 }
  0x1b   :  { %v32_v19 = vsub.f32 %v30_v16, %v31_v17  ;;  %v39_v20 = vmul.f32 %v38_v18, %v34_v15 }
  0x1d   :  { %v43_v21 = vrot.slane %v32_v19, %v37_v12 }
  0x1f   :  { %v44_v22 = vadd.f32 %v43_v21, %v39_v20 }
  0x21   :  { %v45_v23 = vmax.f32 %v44_v22, 0.0 }
  0x23   :  { %v46_v24 = vpack.c.bf16 %v45_v23, %v45_v23 }
  0x25   :  { %47 = vst [vmem:[%s101_s4] sm:$0xf] %v46_v24 }

// kernel: _lambda_.74
= control target key start
LH: loop header
LB: loop body
LE: loop exit
PB: predicated region body
PF: predicated region fallthrough
CT: control target
= control target key end

     0   :  { %vm1139_vm0 = vmmov 0   ;;  %s1405_s1 = inlined_call_operand.vmem [shape: bf16[1152,128], index: 1, kind: input, shape index: {}]   ;;  %s1406_s0 = inlined_call_operand.vmem [shape: bf16[8,1152], index: 0, kind: input, shape index: {}]   ;;  %s1407_s2 = inlined_call_operand.vmem [shape: bf16[8,128], index: 2, kind: output, shape index: {0}]   ;;  %s1408_s3 = inlined_call_operand.vmem [shape: f32[1,1,128], index: 3, kind: output, shape index: {1}]   ;;  %s1409_s4 = inlined_call_operand.vmem [shape: f32[1,1,128], index: 4, kind: output, shape index: {2}]  }
   0x1   :  { %v1057_v0 = vld [vmem:[%s1405_s1 + $0x40] sm:$0xff]   ;;  %v1061_v4 = vld [vmem:[%s1405_s1 + $0x48] sm:$0xff]   ;;  %v1065_v8 = vld [vmem:[%s1405_s1 + $0x50] sm:$0xff]  }
   0x2   :  { %v1058_v1 = vld [vmem:[%s1405_s1 + $0xc0] sm:$0xff]   ;;  %938 = vmatprep.subr.bf16.mxu0 %v1057_v0  ;;  %v1062_v5 = vld [vmem:[%s1405_s1 + $0xc8] sm:$0xff]   ;;  %v1066_v9 = vld [vmem:[%s1405_s1 + $0xd0] sm:$0xff]  }
   0x3   :  { %v1059_v2 = vld [vmem:[%s1405_s1] sm:$0xff]   ;;  %960 = vmatprep.subr.bf16.mxu1 %v1058_v1  ;;  %v1063_v6 = vld [vmem:[%s1405_s1 + $0x8] sm:$0xff]   ;;  %v1067_v10 = vld [vmem:[%s1405_s1 + $0x10] sm:$0xff]  }
   0x4   :  { %v1060_v3 = vld [vmem:[%s1405_s1 + $0x80] sm:$0xff]   ;;  %939 = vmatpush3.bf16.msra.mxu0 %v1059_v2  ;;  %v1064_v7 = vld [vmem:[%s1405_s1 + $0x88] sm:$0xff]   ;;  %v1068_v11 = vld [vmem:[%s1405_s1 + $0x90] sm:$0xff]  }
   0x5   :  { %961 = vmatpush3.bf16.msra.mxu1 %v1060_v3  ;;  %940 = vmatprep.subr.bf16.mxu0 %v1061_v4  ;;  %v1069_v12 = vld [vmem:[%s1405_s1 + $0x58] sm:$0xff]   ;;  %v1073_v16 = vld [vmem:[%s1405_s1 + $0x60] sm:$0xff]   ;;  %v1077_v20 = vld [vmem:[%s1405_s1 + $0x68] sm:$0xff]  }
   0x6   :  { %962 = vmatprep.subr.bf16.mxu1 %v1062_v5  ;;  %v1070_v13 = vld [vmem:[%s1405_s1 + $0xd8] sm:$0xff]   ;;  %v1074_v17 = vld [vmem:[%s1405_s1 + $0xe0] sm:$0xff]   ;;  %v1078_v21 = vld [vmem:[%s1405_s1 + $0xe8] sm:$0xff]  }
   0x7   :  { %v1071_v14 = vld [vmem:[%s1405_s1 + $0x18] sm:$0xff]   ;;  %v1075_v18 = vld [vmem:[%s1405_s1 + $0x20] sm:$0xff]   ;;  %v1079_v22 = vld [vmem:[%s1405_s1 + $0x28] sm:$0xff]  }
   0x8   :  { %941 = vmatpush3.bf16.msra.mxu0 %v1063_v6  ;;  %v1072_v15 = vld [vmem:[%s1405_s1 + $0x98] sm:$0xff]   ;;  %v1076_v19 = vld [vmem:[%s1405_s1 + $0xa0] sm:$0xff]   ;;  %v1080_v23 = vld [vmem:[%s1405_s1 + $0xa8] sm:$0xff]  }
   0x9   :  { %963 = vmatpush3.bf16.msra.mxu1 %v1064_v7  ;;  %942 = vmatprep.subr.bf16.mxu0 %v1065_v8  ;;  %v1081_v24 = vld [vmem:[%s1405_s1 + $0x70] sm:$0xff]   ;;  %v1085_v28 = vld [vmem:[%s1405_s1 + $0x78] sm:$0xff]   ;;  %v15_v32 = vld [vmem:[%s1406_s0] sm:$0xff] }
   0xa   :  { %964 = vmatprep.subr.bf16.mxu1 %v1066_v9  ;;  %v1082_v25 = vld [vmem:[%s1405_s1 + $0xf0] sm:$0xff]   ;;  %v1086_v29 = vld [vmem:[%s1405_s1 + $0xf8] sm:$0xff]   ;;  %v16_v33 = vld [vmem:[%s1406_s0 + $0x8] sm:$0xff]  ;;  %v857_v34 = vcombine.low %v15_v32, %v15_v32  ;;  %v858_v35 = vcombine.high %v15_v32, %v15_v32 }
   0xb   :  { %v1083_v26 = vld [vmem:[%s1405_s1 + $0x30] sm:$0xff]   ;;  %v1087_v30 = vld [vmem:[%s1405_s1 + $0x38] sm:$0xff]   ;;  %v859_v36 = vcombine.low %v16_v33, %v16_v33  ;;  %v860_v37 = vcombine.high %v16_v33, %v16_v33  ;;  %v1093_v38 = vld [vmem:[%s1405_s1 + $0x140] sm:$0xff]  }
   0xc   :  { %943 = vmatpush3.bf16.msra.mxu0 %v1067_v10  ;;  %v1084_v27 = vld [vmem:[%s1405_s1 + $0xb0] sm:$0xff]   ;;  %v1088_v31 = vld [vmem:[%s1405_s1 + $0xb8] sm:$0xff]   ;;  %v1094_v39 = vld [vmem:[%s1405_s1 + $0x100] sm:$0xff]   ;;  %660 = vmatprep.mubr.bf16.mxu0 %v858_v35 }
   0xd   :  { %965 = vmatpush3.bf16.msra.mxu1 %v1068_v11  ;;  %944 = vmatprep.subr.bf16.mxu0 %v1069_v12  ;;  %v1095_v40 = vld [vmem:[%s1405_s1 + $0x1c0] sm:$0xff]   ;;  %v1097_v42 = vld [vmem:[%s1405_s1 + $0x148] sm:$0xff]   ;;  %v1101_v46 = vld [vmem:[%s1405_s1 + $0x150] sm:$0xff]  }
   0xe   :  { %966 = vmatprep.subr.bf16.mxu1 %v1070_v13  ;;  %700 = vmatprep.mubr.bf16.mxu1 %v860_v37  ;;  %v1096_v41 = vld [vmem:[%s1405_s1 + $0x180] sm:$0xff]   ;;  %v1098_v43 = vld [vmem:[%s1405_s1 + $0x108] sm:$0xff]   ;;  %v1102_v47 = vld [vmem:[%s1405_s1 + $0x110] sm:$0xff]   ;;  %v1138_v13 = vmov 0.0  }
   0xf   :  { %v1099_v44 = vld [vmem:[%s1405_s1 + $0x1c8] sm:$0xff]   ;;  %v1103_v48 = vld [vmem:[%s1405_s1 + $0x1d0] sm:$0xff]   ;;  %v1105_v50 = vld [vmem:[%s1405_s1 + $0x158] sm:$0xff]  }
  0x10   :  { %945 = vmatpush3.bf16.msra.mxu0 %v1071_v14  ;;  %v1100_v45 = vld [vmem:[%s1405_s1 + $0x188] sm:$0xff]   ;;  %v1104_v49 = vld [vmem:[%s1405_s1 + $0x190] sm:$0xff]   ;;  %v1106_v51 = vld [vmem:[%s1405_s1 + $0x118] sm:$0xff]  }
  0x11   :  { %967 = vmatpush3.bf16.msra.mxu1 %v1072_v15  ;;  %946 = vmatprep.subr.bf16.mxu0 %v1073_v16  ;;  %v1107_v52 = vld [vmem:[%s1405_s1 + $0x1d8] sm:$0xff]   ;;  %v1109_v54 = vld [vmem:[%s1405_s1 + $0x160] sm:$0xff]   ;;  %v1113_v58 = vld [vmem:[%s1405_s1 + $0x168] sm:$0xff]  }
  0x12   :  { %968 = vmatprep.subr.bf16.mxu1 %v1074_v17  ;;  %v1108_v53 = vld [vmem:[%s1405_s1 + $0x198] sm:$0xff]   ;;  %v1110_v55 = vld [vmem:[%s1405_s1 + $0x120] sm:$0xff]   ;;  %v1114_v59 = vld [vmem:[%s1405_s1 + $0x128] sm:$0xff]  }
  0x13   :  { %v1111_v56 = vld [vmem:[%s1405_s1 + $0x1e0] sm:$0xff]   ;;  %v1115_v60 = vld [vmem:[%s1405_s1 + $0x1e8] sm:$0xff]   ;;  %v1117_v62 = vld [vmem:[%s1405_s1 + $0x170] sm:$0xff]  }
  0x14   :  { %947 = vmatpush3.bf16.msra.mxu0 %v1075_v18  ;;  %v1112_v57 = vld [vmem:[%s1405_s1 + $0x1a0] sm:$0xff]   ;;  %v1116_v61 = vld [vmem:[%s1405_s1 + $0x1a8] sm:$0xff]   ;;  %v1118_v63 = vld [vmem:[%s1405_s1 + $0x130] sm:$0xff]  }
  0x15   :  { %969 = vmatpush3.bf16.msra.mxu1 %v1076_v19  ;;  %948 = vmatprep.subr.bf16.mxu0 %v1077_v20  ;;  %v1119_v0 = vld [vmem:[%s1405_s1 + $0x1f0] sm:$0xff]   ;;  %v1121_v2 = vld [vmem:[%s1405_s1 + $0x178] sm:$0xff]   ;;  %v1129_v12 = vld [vmem:[%s1405_s1 + $0x200] sm:$0xff]  }
  0x16   :  { %970 = vmatprep.subr.bf16.mxu1 %v1078_v21  ;;  %v1120_v1 = vld [vmem:[%s1405_s1 + $0x1b0] sm:$0xff]   ;;  %v1122_v3 = vld [vmem:[%s1405_s1 + $0x138] sm:$0xff]   ;;  %v1130_v14 = vld [vmem:[%s1405_s1 + $0x208] sm:$0xff]  }
  0x17   :  { %v1123_v4 = vld [vmem:[%s1405_s1 + $0x1f8] sm:$0xff]   ;;  %v17_v5 = vld [vmem:[%s1406_s0 + $0x10] sm:$0xff]  ;;  %v1133_v17 = vld [vmem:[%s1405_s1 + $0x220] sm:$0xff]  }
  0x18   :  { %949 = vmatpush3.bf16.msra.mxu0 %v1079_v22  ;;  %v862_v6 = vcombine.high %v17_v5, %v17_v5  ;;  %v1126_v7 = vld [vmem:[%s1405_s1 + $0x1b8] sm:$0xff]   ;;  %v861_v8 = vcombine.low %v17_v5, %v17_v5  ;;  %v1131_v15 = vld [vmem:[%s1405_s1 + $0x210] sm:$0xff]   ;;  %v1134_v18 = vld [vmem:[%s1405_s1 + $0x228] sm:$0xff]  }
  0x19   :  { %971 = vmatpush3.bf16.msra.mxu1 %v1080_v23  ;;  %950 = vmatprep.subr.bf16.mxu0 %v1081_v24  ;;  %v18_v9 = vld [vmem:[%s1406_s0 + $0x18] sm:$0xff]  ;;  %v1135_v19 = vld [vmem:[%s1405_s1 + $0x230] sm:$0xff]   ;;  %v1137_v21 = vld [vmem:[%s1406_s0 + $0x20] ss:$0 sps:$4 sm:$0xff]  }
  0x1a   :  { %972 = vmatprep.subr.bf16.mxu1 %v1082_v25  ;;  %v863_v10 = vcombine.low %v18_v9, %v18_v9  ;;  %v864_v11 = vcombine.high %v18_v9, %v18_v9  ;;  %v1132_v16 = vld [vmem:[%s1405_s1 + $0x218] sm:$0xff]  }
  0x1b   :  { %v1136_v20 = vld [vmem:[%s1405_s1 + $0x238] sm:$0xff]  }
  0x1c   :  { %951 = vmatpush3.bf16.msra.mxu0 %v1083_v26 }
  0x1d   :  { %973 = vmatpush3.bf16.msra.mxu1 %v1084_v27  ;;  %952 = vmatprep.subr.bf16.mxu0 %v1085_v28 }
  0x1e   :  { %974 = vmatprep.subr.bf16.mxu1 %v1086_v29 }
  0x20   :  { %953 = vmatpush3.bf16.msra.mxu0 %v1087_v30 }
  0x21   :  { %975 = vmatpush3.bf16.msra.mxu1 %v1088_v31  ;;  %982 = vmatprep.subr.bf16.mxu0 %v1093_v38 }
  0x22   :  { %1004 = vmatprep.subr.bf16.mxu1 %v1095_v40 }
  0x23   :  { %661 = vmatmul.mubr.bf16.vlgmr.msra.gmra.mrb[0].mxu0 %v857_v34 }
  0x24   :  { %701 = vmatmul.mubr.bf16.vlgmr.msra.gmra.mrb[0].mxu1 %v859_v36  ;;  %983 = vmatpush3.bf16.msra.mxu0 %v1094_v39 }
  0x25   :  { %1005 = vmatpush3.bf16.msra.mxu1 %v1096_v41  ;;  %984 = vmatprep.subr.bf16.mxu0 %v1097_v42 }
  0x26   :  { %1006 = vmatprep.subr.bf16.mxu1 %v1099_v44  ;;  %740 = vmatprep.mubr.bf16.mxu0 %v862_v6 }
  0x27   :  { %780 = vmatprep.mubr.bf16.mxu1 %v864_v11 }
  0x28   :  { %985 = vmatpush3.bf16.msra.mxu0 %v1098_v43 }
  0x29   :  { %1007 = vmatpush3.bf16.msra.mxu1 %v1100_v45  ;;  %986 = vmatprep.subr.bf16.mxu0 %v1101_v46 }
  0x2a   :  { %1008 = vmatprep.subr.bf16.mxu1 %v1103_v48 }
  0x2c   :  { %987 = vmatpush3.bf16.msra.mxu0 %v1102_v47 }
  0x2d   :  { %1009 = vmatpush3.bf16.msra.mxu1 %v1104_v49  ;;  %988 = vmatprep.subr.bf16.mxu0 %v1105_v50 }
  0x2e   :  { %1010 = vmatprep.subr.bf16.mxu1 %v1107_v52 }
  0x30   :  { %989 = vmatpush3.bf16.msra.mxu0 %v1106_v51 }
  0x31   :  { %1011 = vmatpush3.bf16.msra.mxu1 %v1108_v53  ;;  %990 = vmatprep.subr.bf16.mxu0 %v1109_v54 }
  0x32   :  { %1012 = vmatprep.subr.bf16.mxu1 %v1111_v56 }
  0x34   :  { %991 = vmatpush3.bf16.msra.mxu0 %v1110_v55 }
  0x35   :  { %1013 = vmatpush3.bf16.msra.mxu1 %v1112_v57  ;;  %992 = vmatprep.subr.bf16.mxu0 %v1113_v58 }
  0x36   :  { %1014 = vmatprep.subr.bf16.mxu1 %v1115_v60 }
  0x38   :  { %993 = vmatpush3.bf16.msra.mxu0 %v1114_v59 }
  0x39   :  { %1015 = vmatpush3.bf16.msra.mxu1 %v1116_v61  ;;  %994 = vmatprep.subr.bf16.mxu0 %v1117_v62 }
  0x3a   :  { %1016 = vmatprep.subr.bf16.mxu1 %v1119_v0 }
  0x3c   :  { %995 = vmatpush3.bf16.msra.mxu0 %v1118_v63 }
  0x3d   :  { %1017 = vmatpush3.bf16.msra.mxu1 %v1120_v1  ;;  %996 = vmatprep.subr.bf16.mxu0 %v1121_v2 }
  0x3e   :  { %1018 = vmatprep.subr.bf16.mxu1 %v1123_v4 }
  0x40   :  { %997 = vmatpush3.bf16.msra.mxu0 %v1122_v3 }
  0x41   :  { %1019 = vmatpush3.bf16.msra.mxu1 %v1126_v7  ;;  %1035 = vmatprep.subr.bf16.mxu0 %v1138_v13 }
  0x43   :  { %741 = vmatmul.mubr.bf16.vlgmr.msra.gmra.mrb[4].mxu0 %v861_v8 }
  0x44   :  { %1036 = vmatpush3.bf16.msra.mxu0 %v1129_v12  ;;  %781 = vmatmul.mubr.bf16.vlgmr.msra.gmra.mrb[4].mxu1 %v863_v10 }
  0x45   :  { %1037 = vmatprep.subr.bf16.mxu0 %v1138_v13  ;;  %1051 = vmatprep.mubr.msk.bf16.mxu0 %vm1139_vm0, %v1138_v13 }
  0x48   :  { %1038 = vmatpush3.bf16.msra.mxu0 %v1130_v14 }
  0x49   :  { %1039 = vmatprep.subr.bf16.mxu0 %v1138_v13 }
  0x4c   :  { %1040 = vmatpush3.bf16.msra.mxu0 %v1131_v15 }
  0x4d   :  { %1041 = vmatprep.subr.bf16.mxu0 %v1138_v13 }
  0x50   :  { %1042 = vmatpush3.bf16.msra.mxu0 %v1132_v16 }
  0x51   :  { %1043 = vmatprep.subr.bf16.mxu0 %v1138_v13 }
  0x54   :  { %1044 = vmatpush3.bf16.msra.mxu0 %v1133_v17 }
  0x55   :  { %1045 = vmatprep.subr.bf16.mxu0 %v1138_v13 }
  0x58   :  { %1046 = vmatpush3.bf16.msra.mxu0 %v1134_v18 }
  0x59   :  { %1047 = vmatprep.subr.bf16.mxu0 %v1138_v13 }
  0x5c   :  { %1048 = vmatpush3.bf16.msra.mxu0 %v1135_v19 }
  0x5d   :  { %1049 = vmatprep.subr.bf16.mxu0 %v1138_v13 }
  0x60   :  { %1050 = vmatpush3.bf16.msra.mxu0 %v1136_v20 }
  0x63   :  { %1052 = vmatmul.mubr.bf16.vlgmr.msra.gmra.mrb[8].mxu0 %v1137_v21 }
  0xf6   :  { %v954_v22 = vpop.f32.mrb[0].mxu0 }
  0xf7   :  { %v976_v23 = vpop.f32.mrb[0].mxu1  ;;  %v955_v24 = vpop.f32.mrb[1].mxu0 }
  0xf8   :  { %v977_v25 = vpop.f32.mrb[1].mxu1  ;;  %v956_v26 = vadd.f32 %v955_v24, %v954_v22  ;;  %v957_v28 = vpop.f32.mrb[2].mxu0 }
  0xf9   :  { %v978_v27 = vadd.f32 %v977_v25, %v976_v23  ;;  %v979_v29 = vpop.f32.mrb[2].mxu1  ;;  %v958_v30 = vpop.f32.mrb[3].mxu0 }
  0xfa   :  { %v980_v31 = vpop.f32.mrb[3].mxu1 }
  0xfb   :  { %v703_v32 = vadd.f32 %v978_v27, %v956_v26 }
 0x116   :  { %v998_v33 = vpop.f32.mrb[4].mxu0 }
 0x117   :  { %v999_v34 = vpop.f32.mrb[5].mxu0  ;;  %v1020_v35 = vpop.f32.mrb[4].mxu1 }
 0x118   :  { %v1000_v36 = vadd.f32 %v999_v34, %v998_v33  ;;  %v1001_v37 = vpop.f32.mrb[6].mxu0  ;;  %v1021_v38 = vpop.f32.mrb[5].mxu1 }
 0x119   :  { %v1002_v39 = vpop.f32.mrb[7].mxu0  ;;  %v1022_v40 = vadd.f32 %v1021_v38, %v1020_v35  ;;  %v1023_v41 = vpop.f32.mrb[6].mxu1 }
 0x11a   :  { %v743_v42 = vadd.f32 %v1000_v36, %v703_v32  ;;  %v1024_v43 = vpop.f32.mrb[7].mxu1 }
 0x11c   :  { %v783_v44 = vadd.f32 %v1022_v40, %v743_v42 }
 0x136   :  { %v822_v45 = vpop.f32.mrb[8].mxu0 }
 0x137   :  { %v823_v46 = vadd.f32 %v822_v45, %v783_v44  ;;  %v1053_v47 = vpop.f32.mrb[9].mxu0 }
 0x138   :  { %v825_v48 = vpop.f32.mrb[10].mxu0 }
 0x139   :  { %v828_v49 = vpack.c.bf16 %v823_v46, %v823_v46  ;;  %v830_v50 = vrot.slane %v823_v46, 4  ;;  %v837_v51 = vmul.f32 %v823_v46, %v823_v46  ;;  %v1054_v52 = vpop.f32.mrb[11].mxu0 }
 0x13b   :  { %829 = vst [vmem:[%s1407_s2] sm:$0xf] %v828_v49  ;;  %v831_v53 = vadd.f32 %v830_v50, %v823_v46  ;;  %v838_v54 = vrot.slane %v837_v51, 4 }
 0x13d   :  { %v832_v55 = vrot.slane %v831_v53, 2  ;;  %v839_v56 = vadd.f32 %v838_v54, %v837_v51 }
 0x13f   :  { %v833_v57 = vadd.f32 %v832_v55, %v831_v53  ;;  %v840_v58 = vrot.slane %v839_v56, 2 }
 0x141   :  { %v834_v59 = vrot.slane %v833_v57, 1  ;;  %v841_v60 = vadd.f32 %v840_v58, %v839_v56 }
 0x143   :  { %v835_v61 = vadd.f32 %v834_v59, %v833_v57  ;;  %v842_v62 = vrot.slane %v841_v60, 1 }
 0x145   :  { %836 = vst [vmem:[%s1408_s3] sm:$0x1] %v835_v61  ;;  %v843_v63 = vadd.f32 %v842_v62, %v841_v60 }
 0x147   :  { %844 = vst [vmem:[%s1409_s4] sm:$0x1] %v843_v63 }

// kernel: _lambda_.78
= control target key start
LH: loop header
LB: loop body
LE: loop exit
PB: predicated region body
PF: predicated region fallthrough
CT: control target
= control target key end

     0   :  { %v64_v16 = vlaneseq  ;;  %s171_s2 = inlined_call_operand.vmem [shape: f32[1,1,128], index: 2, kind: input, shape index: {}]   ;;  %s172_s3 = inlined_call_operand.vmem [shape: f32[1,1,128], index: 3, kind: input, shape index: {}]   ;;  %s173_s4 = inlined_call_operand.vmem [shape: f32[1,1,128], index: 4, kind: input, shape index: {}]   ;;  %s174_s5 = inlined_call_operand.vmem [shape: f32[1,1,128], index: 5, kind: input, shape index: {}]   ;;  %s175_s0 = inlined_call_operand.vmem [shape: bf16[8,128], index: 0, kind: input, shape index: {}]   ;;  %s176_s6 = inlined_call_operand.vmem [shape: f32[2,128], index: 6, kind: input, shape index: {}]   ;;  %s177_s1 = inlined_call_operand.vmem [shape: bf16[8,128], index: 1, kind: input, shape index: {}]   ;;  %s178_s7 = inlined_call_operand.vmem [shape: f32[2,128], index: 7, kind: input, shape index: {}]   ;;  %s179_s8 = inlined_call_operand.vmem [shape: bf16[8,128], index: 8, kind: output, shape index: {}]  }
   0x1   :  { %v29_v0 = vld [vmem:[%s171_s2] sm:$0x1]  ;;  %v42_v27 = vld [vmem:[%s176_s6 + $0x1] sm:$0x1] }
   0x2   :  { %v32_v1 = vld [vmem:[%s172_s3] sm:$0x1]  ;;  %v31_v2 = vmul.f32 0.125, %v29_v0  ;;  %v65_v17 = vshrl.u32 %v64_v16, 7  ;;  %v58_v31 = vld [vmem:[%s178_s7 + $0x1] sm:$0x1] }
   0x3   :  { %v34_v3 = vmul.f32 0.125, %v32_v1  ;;  %v45_v4 = vld [vmem:[%s173_s4] sm:$0x1] }
   0x4   :  { %v47_v5 = vmul.f32 0.125, %v45_v4  ;;  %v48_v6 = vld [vmem:[%s174_s5] sm:$0x1]  ;;  %v35_v7 = vmul.f32 %v31_v2, %v31_v2  ;;  %v66_v21 = vsub.s32 0, %v65_v17 }
   0x5   :  { %v50_v8 = vmul.f32 0.125, %v48_v6  ;;  %v38_v18 = vld [vmem:[%s176_s6] sm:$0x1] }
   0x6   :  { %v51_v9 = vmul.f32 %v47_v5, %v47_v5  ;;  %v36_v10 = vsub.f32 %v34_v3, %v35_v7  ;;  %v62_v19 = vld [vmem:[%s175_s0] sm:$0xf] }
   0x7   :  { %v54_v20 = vld [vmem:[%s178_s7] sm:$0x1]  ;;  %v63_v26 = vunpack.c.l.bf16 %v62_v19 }
   0x8   :  { %v52_v11 = vsub.f32 %v50_v8, %v51_v9  ;;  %v37_v12 = vmax.f32 %v36_v10, 0.0  ;;  %v69_v22 = vld [vmem:[%s177_s1] sm:$0xf] }
   0x9   :  { %v70_v29 = vunpack.c.l.bf16 %v69_v22 }
   0xa   :  { %v53_v13 = vmax.f32 %v52_v11, 0.0  ;;  %v39_v14 = vadd.f32 1e-05, %v37_v12 }
   0xc   :  { %v55_v15 = vadd.f32 1e-05, %v53_v13  ;;  %89 = vrsqrt.f32 %v39_v14 }
   0xe   :  { %91 = vrsqrt.f32 %v55_v15 }
  0x16   :  { %v90_v23 = vpop.eup %89 }
  0x17   :  { %v41_v25 = vmul.f32 %v90_v23, %v38_v18 }
  0x18   :  { %v92_v24 = vpop.eup %91 }
  0x19   :  { %v57_v28 = vmul.f32 %v92_v24, %v54_v20  ;;  %v43_v30 = vmul.f32 %v41_v25, %v31_v2  ;;  %v67_v32 = vrot.slane %v41_v25, %v66_v21 }
  0x1b   :  { %v59_v33 = vmul.f32 %v57_v28, %v47_v5  ;;  %v74_v34 = vrot.slane %v57_v28, %v66_v21  ;;  %v44_v35 = vsub.f32 %v42_v27, %v43_v30  ;;  %v68_v36 = vmul.f32 %v67_v32, %v63_v26 }
  0x1d   :  { %v60_v37 = vsub.f32 %v58_v31, %v59_v33  ;;  %v75_v38 = vmul.f32 %v74_v34, %v70_v29 }
  0x1f   :  { %v61_v39 = vadd.f32 %v60_v37, %v44_v35  ;;  %v76_v40 = vadd.f32 %v75_v38, %v68_v36 }
  0x21   :  { %v80_v41 = vrot.slane %v61_v39, %v66_v21 }
  0x23   :  { %v81_v42 = vadd.f32 %v80_v41, %v76_v40 }
  0x25   :  { %v82_v43 = vmax.f32 %v81_v42, 0.0 }
  0x27   :  { %v83_v44 = vpack.c.bf16 %v82_v43, %v82_v43 }
  0x29   :  { %84 = vst [vmem:[%s179_s8] sm:$0xf] %v83_v44 }

// kernel: _lambda_.84
= control target key start
LH: loop header
LB: loop body
LE: loop exit
PB: predicated region body
PF: predicated region fallthrough
CT: control target
= control target key end

     0   :  { %s363_s1 = inlined_call_operand.vmem [shape: bf16[256,128], index: 1, kind: input, shape index: {}]   ;;  %s364_s0 = inlined_call_operand.vmem [shape: bf16[8,256], index: 0, kind: input, shape index: {}]   ;;  %s365_s2 = inlined_call_operand.vmem [shape: bf16[8,128], index: 2, kind: output, shape index: {0}]   ;;  %s366_s3 = inlined_call_operand.vmem [shape: f32[1,1,128], index: 3, kind: output, shape index: {1}]   ;;  %s367_s4 = inlined_call_operand.vmem [shape: f32[1,1,128], index: 4, kind: output, shape index: {2}]  }
   0x1   :  { %v260_v0 = vld [vmem:[%s363_s1 + $0x40] sm:$0xff]   ;;  %v262_v2 = vld [vmem:[%s363_s1 + $0x48] sm:$0xff]   ;;  %v264_v4 = vld [vmem:[%s363_s1 + $0x50] sm:$0xff]  }
   0x2   :  { %v261_v1 = vld [vmem:[%s363_s1] sm:$0xff]   ;;  %238 = vmatprep.subr.bf16.mxu0 %v260_v0  ;;  %v263_v3 = vld [vmem:[%s363_s1 + $0x8] sm:$0xff]   ;;  %v265_v5 = vld [vmem:[%s363_s1 + $0x10] sm:$0xff]  }
   0x3   :  { %239 = vmatpush3.bf16.msra.mxu0 %v261_v1  ;;  %v266_v6 = vld [vmem:[%s363_s1 + $0x58] sm:$0xff]   ;;  %v268_v8 = vld [vmem:[%s363_s1 + $0x60] sm:$0xff]   ;;  %v270_v10 = vld [vmem:[%s363_s1 + $0x68] sm:$0xff]  }
   0x4   :  { %240 = vmatprep.subr.bf16.mxu0 %v262_v2  ;;  %v267_v7 = vld [vmem:[%s363_s1 + $0x18] sm:$0xff]   ;;  %v269_v9 = vld [vmem:[%s363_s1 + $0x20] sm:$0xff]   ;;  %v271_v13 = vld [vmem:[%s363_s1 + $0x28] sm:$0xff]  }
   0x5   :  { %v15_v11 = vld [vmem:[%s364_s0] sm:$0xff]  ;;  %v272_v14 = vld [vmem:[%s363_s1 + $0x70] sm:$0xff]   ;;  %v274_v16 = vld [vmem:[%s363_s1 + $0x78] sm:$0xff]  }
   0x6   :  { %v221_v12 = vcombine.high %v15_v11, %v15_v11  ;;  %v273_v15 = vld [vmem:[%s363_s1 + $0x30] sm:$0xff]   ;;  %v275_v17 = vld [vmem:[%s363_s1 + $0x38] sm:$0xff]   ;;  %v220_v18 = vcombine.low %v15_v11, %v15_v11 }
   0x7   :  { %241 = vmatpush3.bf16.msra.mxu0 %v263_v3 }
   0x8   :  { %242 = vmatprep.subr.bf16.mxu0 %v264_v4  ;;  %183 = vmatprep.mubr.bf16.mxu0 %v221_v12 }
   0xb   :  { %243 = vmatpush3.bf16.msra.mxu0 %v265_v5 }
   0xc   :  { %244 = vmatprep.subr.bf16.mxu0 %v266_v6 }
   0xf   :  { %245 = vmatpush3.bf16.msra.mxu0 %v267_v7 }
  0x10   :  { %246 = vmatprep.subr.bf16.mxu0 %v268_v8 }
  0x13   :  { %247 = vmatpush3.bf16.msra.mxu0 %v269_v9 }
  0x14   :  { %248 = vmatprep.subr.bf16.mxu0 %v270_v10 }
  0x17   :  { %249 = vmatpush3.bf16.msra.mxu0 %v271_v13 }
  0x18   :  { %250 = vmatprep.subr.bf16.mxu0 %v272_v14 }
  0x1b   :  { %251 = vmatpush3.bf16.msra.mxu0 %v273_v15 }
  0x1c   :  { %252 = vmatprep.subr.bf16.mxu0 %v274_v16 }
  0x1f   :  { %253 = vmatpush3.bf16.msra.mxu0 %v275_v17 }
  0x22   :  { %184 = vmatmul.mubr.bf16.vlgmr.msra.gmra.mrb[0].mxu0 %v220_v18 }
  0xf5   :  { %v254_v19 = vpop.f32.mrb[0].mxu0 }
  0xf6   :  { %v255_v20 = vpop.f32.mrb[1].mxu0 }
  0xf7   :  { %v256_v21 = vadd.f32 %v255_v20, %v254_v19  ;;  %v257_v22 = vpop.f32.mrb[2].mxu0 }
  0xf8   :  { %v258_v23 = vpop.f32.mrb[3].mxu0 }
  0xf9   :  { %v191_v24 = vpack.c.bf16 %v256_v21, %v256_v21  ;;  %v193_v25 = vrot.slane %v256_v21, 4  ;;  %v200_v26 = vmul.f32 %v256_v21, %v256_v21 }
  0xfb   :  { %192 = vst [vmem:[%s365_s2] sm:$0xf] %v191_v24  ;;  %v194_v27 = vadd.f32 %v256_v21, %v193_v25  ;;  %v201_v28 = vrot.slane %v200_v26, 4 }
  0xfd   :  { %v195_v29 = vrot.slane %v194_v27, 2  ;;  %v202_v30 = vadd.f32 %v201_v28, %v200_v26 }
  0xff   :  { %v196_v31 = vadd.f32 %v195_v29, %v194_v27  ;;  %v203_v32 = vrot.slane %v202_v30, 2 }
 0x101   :  { %v197_v33 = vrot.slane %v196_v31, 1  ;;  %v204_v34 = vadd.f32 %v203_v32, %v202_v30 }
 0x103   :  { %v198_v35 = vadd.f32 %v197_v33, %v196_v31  ;;  %v205_v36 = vrot.slane %v204_v34, 1 }
 0x105   :  { %199 = vst [vmem:[%s366_s3] sm:$0x1] %v198_v35  ;;  %v206_v37 = vadd.f32 %v205_v36, %v204_v34 }
 0x107   :  { %207 = vst [vmem:[%s367_s4] sm:$0x1] %v206_v37 }

</bundles_post_ra>
